<compile_context>
chip_gen: v7x
topology: tpu7x:2x2x1
jax: 0.10.0
libtpu: 0.0.40
codegen_flags: <defaults>
</compile_context>

<pallas_src>
import functools

import jax
import jax.numpy as jnp
from jax.experimental import pallas as pl
from jax.experimental.pallas import tpu as pltpu

KSIZE = 7


def _round_up(a, b):
    return (a + b - 1) // b * b


def _vmem_capacity_bytes():
    try:
        return int(pltpu.get_tpu_info().vmem_capacity_bytes)
    except Exception:
        return 64 * 1024 * 1024  # conservative default (v7x per-core VMEM)


def _spatial_attn_kernel(w_ref, x_ref, o_ref, sa_ref, sm_ref, pa_ref, pm_ref,
                         *, C, Ct, H, W, K, PAD):
    # w_ref : SMEM (2*K*K,) f32; [0:K*K] avg-path weights (pre-scaled by 1/C),
    #                            [K*K:]  max-path weights.
    # x_ref : VMEM (Bt, Ct, H*W) lane-dense input block.
    # o_ref : VMEM (Bt, 1, H*W) lane-dense output block.
    # sa_ref, sm_ref : VMEM (Bt, H*W) f32 unpadded sum / max accumulators.
    # pa_ref, pm_ref : VMEM (Bt, Hp, Wp) f32 padded maps (built once at the end).
    HW = H * W
    c_step = pl.program_id(1)
    n_c = pl.num_programs(1)

    xb = x_ref[...]                                   # (Bt, Ct, HW), input dtype

    if C % Ct != 0:
        # Ragged last channel block: mask out-of-range channels so they do not
        # contribute (0 for the sum, -inf/min for the max).
        valid = C - c_step * Ct                        # >= Ct for non-last steps
        ch = jax.lax.broadcasted_iota(jnp.int32, (Ct, HW), 0)
        in_bounds = (ch < valid)[None]                 # (1, Ct, HW)
        if jnp.issubdtype(xb.dtype, jnp.floating):
            neg = jnp.array(-jnp.inf, dtype=xb.dtype)
        else:
            neg = jnp.array(jnp.iinfo(xb.dtype).min, dtype=xb.dtype)
        x_sum_src = jnp.where(in_bounds, xb, jnp.zeros((), dtype=xb.dtype))
        x_max_src = jnp.where(in_bounds, xb, neg)
    else:
        x_sum_src = xb
        x_max_src = xb

    # f32 accumulation for the sum; max is exact in the input dtype.
    s = jnp.sum(x_sum_src, axis=1, dtype=jnp.float32)     # (Bt, HW)
    m = jnp.max(x_max_src, axis=1).astype(jnp.float32)    # (Bt, HW)

    @pl.when(c_step == 0)
    def _init():
        sa_ref[...] = s
        sm_ref[...] = m

    @pl.when(c_step > 0)
    def _accumulate():
        sa_ref[...] = sa_ref[...] + s
        sm_ref[...] = jnp.maximum(sm_ref[...], m)

    @pl.when(c_step == n_c - 1)
    def _conv_and_store():
        sa = sa_ref[...]                               # (Bt, HW) f32
        sm = sm_ref[...]

        # Build the tiny zero-padded 2-D maps once per batch block. Borders stay
        # zero (the conv's zero padding); interior filled row-by-row (static
        # slices only; O(H) small copies, negligible vs. the C-times-larger
        # reduction stream above).
        pa_ref[...] = jnp.zeros_like(pa_ref)
        pm_ref[...] = jnp.zeros_like(pm_ref)
        for i in range(H):
            row_a = sa[:, i * W:(i + 1) * W][:, None, :]   # (Bt, 1, W)
            row_m = sm[:, i * W:(i + 1) * W][:, None, :]
            pa_ref[:, PAD + i:PAD + i + 1, PAD:PAD + W] = row_a
            pm_ref[:, PAD + i:PAD + i + 1, PAD:PAD + W] = row_m

        # 7x7 conv on the VPU: one column window per dj (7 per map, 14 total),
        # cheap sublane slices per di, 4 independent accumulators.
        pa = pa_ref[...]                               # (Bt, Hp, Wp)
        pm = pm_ref[...]
        bt = pa.shape[0]
        accs = [jnp.zeros((bt, H, W), jnp.float32) for _ in range(4)]
        t = 0
        for cin, pmap in ((0, pa), (1, pm)):
            for dj in range(K):
                col = pmap[:, :, dj:dj + W]            # (Bt, Hp, W)
                for di in range(K):
                    w = w_ref[cin * K * K + di * K + dj]
                    accs[t % 4] = accs[t % 4] + w * col[:, di:di + H, :]
                    t += 1
        acc = (accs[0] + accs[1]) + (accs[2] + accs[3])
        out = jax.nn.sigmoid(acc)                      # (Bt, H, W) f32

        # Lane-dense store into the (Bt, 1, H*W) output block.
        for i in range(H):
            o_ref[:, :, i * W:(i + 1) * W] = (
                out[:, i:i + 1, :].astype(o_ref.dtype))


def spatial_attention(x, conv_weight):
    """x: (B, C, H, W); conv_weight: (1, 2, K, K). Returns (B, 1, H, W)."""
    B, C, H, W = x.shape
    K = conv_weight.shape[-1]
    assert conv_weight.shape == (1, 2, K, K)
    PAD = (K - 1) // 2
    Hp, Wp = H + 2 * PAD, W + 2 * PAD
    HW = H * W

    # Fold 1/C into the avg-path weights so the kernel does a pure channel sum.
    w = conv_weight.astype(jnp.float32)
    w = w.at[:, 0].multiply(1.0 / C)
    w_flat = w.reshape(-1)                             # (2*K*K,)

    # Lane-dense layout: flatten the spatial dims onto the 128-lane axis.
    x_flat = x.reshape(B, C, HW)                       # contiguous view, no copy

    itemsize = jnp.dtype(x.dtype).itemsize
    sub = {4: 8, 2: 16, 1: 32}.get(itemsize, 8)        # sublane tile for dtype
    lanes = _round_up(HW, 128)                         # padded lane extent

    # Generation-aware VMEM budget (per x block; x is double-buffered, plus
    # output buffers, f32 scratches and in-kernel temporaries).
    vmem_cap = _vmem_capacity_bytes()
    x_budget = max(2 << 20, min(24 << 20, vmem_cap // 6))

    # Channel tile: all of C if one sample's channels fit the budget, else a
    # sublane-aligned tile (ragged last block handled in-kernel).
    ct_cap = max(1, x_budget // (lanes * itemsize))
    if ct_cap >= C:
        Ct = C
    else:
        Ct = min(C, max(sub, (ct_cap // sub) * sub))

    # Batch tile: as many samples as fit (tile-padded bytes), but keep >= 2
    # batch grid steps so the parallel axis can shard across 2 TCs on v7x.
    per_sample = _round_up(Ct, sub) * lanes * itemsize
    Bt = max(1, min(B, x_budget // per_sample))
    if B >= 2:
        Bt = min(Bt, (B + 1) // 2)

    grid = (pl.cdiv(B, Bt), pl.cdiv(C, Ct))

    kernel = functools.partial(
        _spatial_attn_kernel, C=C, Ct=Ct, H=H, W=W, K=K, PAD=PAD)

    out_flat = pl.pallas_call(
        kernel,
        out_shape=jax.ShapeDtypeStruct((B, 1, HW), x.dtype),
        grid_spec=pltpu.PrefetchScalarGridSpec(
            num_scalar_prefetch=0,
            grid=grid,
            in_specs=[
                pl.BlockSpec(memory_space=pltpu.MemorySpace.SMEM),        # weights
                pl.BlockSpec((Bt, Ct, HW), lambda b, c: (b, c, 0)),       # x (lane-dense)
            ],
            out_specs=pl.BlockSpec((Bt, 1, HW), lambda b, c: (b, 0, 0)),
            scratch_shapes=[
                pltpu.VMEM((Bt, HW), jnp.float32),     # channel-sum accumulator
                pltpu.VMEM((Bt, HW), jnp.float32),     # channel-max accumulator
                pltpu.VMEM((Bt, Hp, Wp), jnp.float32),  # padded sum map (built once)
                pltpu.VMEM((Bt, Hp, Wp), jnp.float32),  # padded max map (built once)
            ]),
        compiler_params=pltpu.CompilerParams(
            # Channel carry in scratch requires the channel axis innermost + arbitrary.
            dimension_semantics=("parallel", "arbitrary"),
            vmem_limit_bytes=int(min(vmem_cap * 3 // 4, 100 << 20))),
    )(w_flat, x_flat)

    return out_flat.reshape(B, 1, H, W)


def _reference(x, conv_weight):
    avg = jnp.mean(x, axis=1, keepdims=True)
    mx = jnp.max(x, axis=1, keepdims=True)
    cat = jnp.concatenate([avg, mx], axis=1)
    pad = (conv_weight.shape[-1] - 1) // 2
    y = jax.lax.conv_general_dilated(
        cat.astype(jnp.float32), conv_weight.astype(jnp.float32),
        window_strides=(1, 1), padding=((pad, pad), (pad, pad)),
        dimension_numbers=("NCHW", "OIHW", "NCHW"))
    return jax.nn.sigmoid(y).astype(x.dtype)


if __name__ == "__main__":
    key = jax.random.PRNGKey(0)
    kx, kw = jax.random.split(key)

    B, C, H, W = 2, 4, 16, 16
    x = jax.random.normal(kx, (B, C, H, W), dtype=jnp.float32)

    # Deterministic init mimicking PyTorch Conv2d default (uniform, bound=1/sqrt(fan_in)).
    fan_in = 2 * KSIZE * KSIZE
    bound = 1.0 / (fan_in ** 0.5)
    conv_weight = jax.random.uniform(
        kw, (1, 2, KSIZE, KSIZE), minval=-bound, maxval=bound, dtype=jnp.float32)

    out = spatial_attention(x, conv_weight)
    out = jax.block_until_ready(out)

    ref = _reference(x, conv_weight)
    assert out.shape == (B, 1, H, W)
    assert jnp.allclose(out, ref, atol=1e-5, rtol=1e-5)

    print("KERNEL_OK")
</pallas_src>

<mosaic_0001>
module attributes {stable_mosaic.version = 11 : i64} {
  func.func @_spatial_attn_kernel(%arg0: i32, %arg1: i32, %arg2: memref<98xf32, #tpu.memory_space<smem>>, %arg3: memref<1x4x256xf32, #tpu.memory_space<vmem>>, %arg4: memref<1x1x256xf32, #tpu.memory_space<vmem>>, %arg5: memref<1x256xf32, #tpu.memory_space<vmem>>, %arg6: memref<1x256xf32, #tpu.memory_space<vmem>>, %arg7: memref<1x22x22xf32, #tpu.memory_space<vmem>>, %arg8: memref<1x22x22xf32, #tpu.memory_space<vmem>>) attributes {dimension_semantics = [#tpu.dimension_semantics<parallel>, #tpu.dimension_semantics<arbitrary>], iteration_bounds = array<i64: 2, 1>, scalar_prefetch = 0 : i64, scratch_operands = 4 : i64, tpu.core_type = #tpu.core_type<tc>, window_params = [{transform_indices = @transform_0, window_bounds = array<i64: 98>}, {transform_indices = @transform_1, window_bounds = array<i64: 1, 4, 256>}, {transform_indices = @transform_2, window_bounds = array<i64: 1, 1, 256>}]} {
    %c0 = arith.constant 0 : index
    %c0_0 = arith.constant 0 : index
    %c0_1 = arith.constant 0 : index
    %0 = vector.load %arg3[%c0, %c0_0, %c0_1] : memref<1x4x256xf32, #tpu.memory_space<vmem>>, vector<1x4x256xf32>
    %cst = arith.constant dense<0.000000e+00> : vector<1x256xf32>
    %1 = vector.multi_reduction <add>, %0, %cst [1] : vector<1x4x256xf32> to vector<1x256xf32>
    %cst_2 = arith.constant dense<0xFF800000> : vector<1x256xf32>
    %2 = vector.multi_reduction <maximumf>, %0, %cst_2 [1] : vector<1x4x256xf32> to vector<1x256xf32>
    %c0_i32 = arith.constant 0 : i32
    %3 = arith.cmpi eq, %arg1, %c0_i32 : i32
    %4 = arith.extui %3 : i1 to i32
    %c0_i32_3 = arith.constant 0 : i32
    %5 = arith.cmpi ne, %4, %c0_i32_3 : i32
    scf.if %5 {
      %c0_8 = arith.constant 0 : index
      %c0_9 = arith.constant 0 : index
      %12 = vector.load %arg5[%c0_8, %c0_9] : memref<1x256xf32, #tpu.memory_space<vmem>>, vector<1x256xf32>
      tpu.vector_store %arg5[%c0_8, %c0_9], %1 {strides = array<i32>} : memref<1x256xf32, #tpu.memory_space<vmem>>, vector<1x256xf32>,
      %c0_10 = arith.constant 0 : index
      %c0_11 = arith.constant 0 : index
      %13 = vector.load %arg6[%c0_10, %c0_11] : memref<1x256xf32, #tpu.memory_space<vmem>>, vector<1x256xf32>
      tpu.vector_store %arg6[%c0_10, %c0_11], %2 {strides = array<i32>} : memref<1x256xf32, #tpu.memory_space<vmem>>, vector<1x256xf32>,
    } else {
    }
    %c0_i32_4 = arith.constant 0 : i32
    %6 = arith.cmpi sgt, %arg1, %c0_i32_4 : i32
    %7 = arith.extui %6 : i1 to i32
    %c0_i32_5 = arith.constant 0 : i32
    %8 = arith.cmpi ne, %7, %c0_i32_5 : i32
    scf.if %8 {
      %c0_8 = arith.constant 0 : index
      %c0_9 = arith.constant 0 : index
      %12 = vector.load %arg5[%c0_8, %c0_9] : memref<1x256xf32, #tpu.memory_space<vmem>>, vector<1x256xf32>
      %13 = arith.addf %12, %1 : vector<1x256xf32>
      %c0_10 = arith.constant 0 : index
      %c0_11 = arith.constant 0 : index
      %14 = vector.load %arg5[%c0_10, %c0_11] : memref<1x256xf32, #tpu.memory_space<vmem>>, vector<1x256xf32>
      tpu.vector_store %arg5[%c0_10, %c0_11], %13 {strides = array<i32>} : memref<1x256xf32, #tpu.memory_space<vmem>>, vector<1x256xf32>,
      %c0_12 = arith.constant 0 : index
      %c0_13 = arith.constant 0 : index
      %15 = vector.load %arg6[%c0_12, %c0_13] : memref<1x256xf32, #tpu.memory_space<vmem>>, vector<1x256xf32>
      %16 = arith.maximumf %15, %2 : vector<1x256xf32>
      %c0_14 = arith.constant 0 : index
      %c0_15 = arith.constant 0 : index
      %17 = vector.load %arg6[%c0_14, %c0_15] : memref<1x256xf32, #tpu.memory_space<vmem>>, vector<1x256xf32>
      tpu.vector_store %arg6[%c0_14, %c0_15], %16 {strides = array<i32>} : memref<1x256xf32, #tpu.memory_space<vmem>>, vector<1x256xf32>,
    } else {
    }
    %c0_i32_6 = arith.constant 0 : i32
    %9 = arith.cmpi eq, %arg1, %c0_i32_6 : i32
    %10 = arith.extui %9 : i1 to i32
    %c0_i32_7 = arith.constant 0 : i32
    %11 = arith.cmpi ne, %10, %c0_i32_7 : i32
    scf.if %11 {
      %c0_8 = arith.constant 0 : index
      %c0_9 = arith.constant 0 : index
      %12 = vector.load %arg5[%c0_8, %c0_9] : memref<1x256xf32, #tpu.memory_space<vmem>>, vector<1x256xf32>
      %c0_10 = arith.constant 0 : index
      %c0_11 = arith.constant 0 : index
      %13 = vector.load %arg6[%c0_10, %c0_11] : memref<1x256xf32, #tpu.memory_space<vmem>>, vector<1x256xf32>
      %cst_12 = arith.constant 0.000000e+00 : f32
      %14 = vector.broadcast %cst_12 : f32 to vector<1x22x22xf32>
      %c0_13 = arith.constant 0 : index
      %c0_14 = arith.constant 0 : index
      %c0_15 = arith.constant 0 : index
      %15 = vector.load %arg7[%c0_13, %c0_14, %c0_15] : memref<1x22x22xf32, #tpu.memory_space<vmem>>, vector<1x22x22xf32>
      tpu.vector_store %arg7[%c0_13, %c0_14, %c0_15], %14 {strides = array<i32>} : memref<1x22x22xf32, #tpu.memory_space<vmem>>, vector<1x22x22xf32>,
      %cst_16 = arith.constant 0.000000e+00 : f32
      %16 = vector.broadcast %cst_16 : f32 to vector<1x22x22xf32>
      %c0_17 = arith.constant 0 : index
      %c0_18 = arith.constant 0 : index
      %c0_19 = arith.constant 0 : index
      %17 = vector.load %arg8[%c0_17, %c0_18, %c0_19] : memref<1x22x22xf32, #tpu.memory_space<vmem>>, vector<1x22x22xf32>
      tpu.vector_store %arg8[%c0_17, %c0_18, %c0_19], %16 {strides = array<i32>} : memref<1x22x22xf32, #tpu.memory_space<vmem>>, vector<1x22x22xf32>,
      %18 = vector.extract_strided_slice %12 {offsets = [0, 0], sizes = [1, 16], strides = [1, 1]} : vector<1x256xf32> to vector<1x16xf32>
      %19 = vector.shape_cast %18 : vector<1x16xf32> to vector<1x1x16xf32>
      %20 = vector.extract_strided_slice %13 {offsets = [0, 0], sizes = [1, 16], strides = [1, 1]} : vector<1x256xf32> to vector<1x16xf32>
      %21 = vector.shape_cast %20 : vector<1x16xf32> to vector<1x1x16xf32>
      %c0_20 = arith.constant 0 : index
      %c3 = arith.constant 3 : index
      %c3_21 = arith.constant 3 : index
      %22 = vector.load %arg7[%c0_20, %c3, %c3_21] : memref<1x22x22xf32, #tpu.memory_space<vmem>>, vector<1x1x16xf32>
      tpu.vector_store %arg7[%c0_20, %c3, %c3_21], %19 {strides = array<i32>} : memref<1x22x22xf32, #tpu.memory_space<vmem>>, vector<1x1x16xf32>,
      %c0_22 = arith.constant 0 : index
      %c3_23 = arith.constant 3 : index
      %c3_24 = arith.constant 3 : index
      %23 = vector.load %arg8[%c0_22, %c3_23, %c3_24] : memref<1x22x22xf32, #tpu.memory_space<vmem>>, vector<1x1x16xf32>
      tpu.vector_store %arg8[%c0_22, %c3_23, %c3_24], %21 {strides = array<i32>} : memref<1x22x22xf32, #tpu.memory_space<vmem>>, vector<1x1x16xf32>,
      %24 = vector.extract_strided_slice %12 {offsets = [0, 16], sizes = [1, 16], strides = [1, 1]} : vector<1x256xf32> to vector<1x16xf32>
      %25 = vector.shape_cast %24 : vector<1x16xf32> to vector<1x1x16xf32>
      %26 = vector.extract_strided_slice %13 {offsets = [0, 16], sizes = [1, 16], strides = [1, 1]} : vector<1x256xf32> to vector<1x16xf32>
      %27 = vector.shape_cast %26 : vector<1x16xf32> to vector<1x1x16xf32>
      %c0_25 = arith.constant 0 : index
      %c4 = arith.constant 4 : index
      %c3_26 = arith.constant 3 : index
      %28 = vector.load %arg7[%c0_25, %c4, %c3_26] : memref<1x22x22xf32, #tpu.memory_space<vmem>>, vector<1x1x16xf32>
      tpu.vector_store %arg7[%c0_25, %c4, %c3_26], %25 {strides = array<i32>} : memref<1x22x22xf32, #tpu.memory_space<vmem>>, vector<1x1x16xf32>,
      %c0_27 = arith.constant 0 : index
      %c4_28 = arith.constant 4 : index
      %c3_29 = arith.constant 3 : index
      %29 = vector.load %arg8[%c0_27, %c4_28, %c3_29] : memref<1x22x22xf32, #tpu.memory_space<vmem>>, vector<1x1x16xf32>
      tpu.vector_store %arg8[%c0_27, %c4_28, %c3_29], %27 {strides = array<i32>} : memref<1x22x22xf32, #tpu.memory_space<vmem>>, vector<1x1x16xf32>,
      %30 = vector.extract_strided_slice %12 {offsets = [0, 32], sizes = [1, 16], strides = [1, 1]} : vector<1x256xf32> to vector<1x16xf32>
      %31 = vector.shape_cast %30 : vector<1x16xf32> to vector<1x1x16xf32>
      %32 = vector.extract_strided_slice %13 {offsets = [0, 32], sizes = [1, 16], strides = [1, 1]} : vector<1x256xf32> to vector<1x16xf32>
      %33 = vector.shape_cast %32 : vector<1x16xf32> to vector<1x1x16xf32>
      %c0_30 = arith.constant 0 : index
      %c5 = arith.constant 5 : index
      %c3_31 = arith.constant 3 : index
      %34 = vector.load %arg7[%c0_30, %c5, %c3_31] : memref<1x22x22xf32, #tpu.memory_space<vmem>>, vector<1x1x16xf32>
      tpu.vector_store %arg7[%c0_30, %c5, %c3_31], %31 {strides = array<i32>} : memref<1x22x22xf32, #tpu.memory_space<vmem>>, vector<1x1x16xf32>,
      %c0_32 = arith.constant 0 : index
      %c5_33 = arith.constant 5 : index
      %c3_34 = arith.constant 3 : index
      %35 = vector.load %arg8[%c0_32, %c5_33, %c3_34] : memref<1x22x22xf32, #tpu.memory_space<vmem>>, vector<1x1x16xf32>
      tpu.vector_store %arg8[%c0_32, %c5_33, %c3_34], %33 {strides = array<i32>} : memref<1x22x22xf32, #tpu.memory_space<vmem>>, vector<1x1x16xf32>,
      %36 = vector.extract_strided_slice %12 {offsets = [0, 48], sizes = [1, 16], strides = [1, 1]} : vector<1x256xf32> to vector<1x16xf32>
      %37 = vector.shape_cast %36 : vector<1x16xf32> to vector<1x1x16xf32>
      %38 = vector.extract_strided_slice %13 {offsets = [0, 48], sizes = [1, 16], strides = [1, 1]} : vector<1x256xf32> to vector<1x16xf32>
      %39 = vector.shape_cast %38 : vector<1x16xf32> to vector<1x1x16xf32>
      %c0_35 = arith.constant 0 : index
      %c6 = arith.constant 6 : index
      %c3_36 = arith.constant 3 : index
      %40 = vector.load %arg7[%c0_35, %c6, %c3_36] : memref<1x22x22xf32, #tpu.memory_space<vmem>>, vector<1x1x16xf32>
      tpu.vector_store %arg7[%c0_35, %c6, %c3_36], %37 {strides = array<i32>} : memref<1x22x22xf32, #tpu.memory_space<vmem>>, vector<1x1x16xf32>,
      %c0_37 = arith.constant 0 : index
      %c6_38 = arith.constant 6 : index
      %c3_39 = arith.constant 3 : index
      %41 = vector.load %arg8[%c0_37, %c6_38, %c3_39] : memref<1x22x22xf32, #tpu.memory_space<vmem>>, vector<1x1x16xf32>
      tpu.vector_store %arg8[%c0_37, %c6_38, %c3_39], %39 {strides = array<i32>} : memref<1x22x22xf32, #tpu.memory_space<vmem>>, vector<1x1x16xf32>,
      %42 = vector.extract_strided_slice %12 {offsets = [0, 64], sizes = [1, 16], strides = [1, 1]} : vector<1x256xf32> to vector<1x16xf32>
      %43 = vector.shape_cast %42 : vector<1x16xf32> to vector<1x1x16xf32>
      %44 = vector.extract_strided_slice %13 {offsets = [0, 64], sizes = [1, 16], strides = [1, 1]} : vector<1x256xf32> to vector<1x16xf32>
      %45 = vector.shape_cast %44 : vector<1x16xf32> to vector<1x1x16xf32>
      %c0_40 = arith.constant 0 : index
      %c7 = arith.constant 7 : index
      %c3_41 = arith.constant 3 : index
      %46 = vector.load %arg7[%c0_40, %c7, %c3_41] : memref<1x22x22xf32, #tpu.memory_space<vmem>>, vector<1x1x16xf32>
      tpu.vector_store %arg7[%c0_40, %c7, %c3_41], %43 {strides = array<i32>} : memref<1x22x22xf32, #tpu.memory_space<vmem>>, vector<1x1x16xf32>,
      %c0_42 = arith.constant 0 : index
      %c7_43 = arith.constant 7 : index
      %c3_44 = arith.constant 3 : index
      %47 = vector.load %arg8[%c0_42, %c7_43, %c3_44] : memref<1x22x22xf32, #tpu.memory_space<vmem>>, vector<1x1x16xf32>
      tpu.vector_store %arg8[%c0_42, %c7_43, %c3_44], %45 {strides = array<i32>} : memref<1x22x22xf32, #tpu.memory_space<vmem>>, vector<1x1x16xf32>,
      %48 = vector.extract_strided_slice %12 {offsets = [0, 80], sizes = [1, 16], strides = [1, 1]} : vector<1x256xf32> to vector<1x16xf32>
      %49 = vector.shape_cast %48 : vector<1x16xf32> to vector<1x1x16xf32>
      %50 = vector.extract_strided_slice %13 {offsets = [0, 80], sizes = [1, 16], strides = [1, 1]} : vector<1x256xf32> to vector<1x16xf32>
      %51 = vector.shape_cast %50 : vector<1x16xf32> to vector<1x1x16xf32>
      %c0_45 = arith.constant 0 : index
      %c8 = arith.constant 8 : index
      %c3_46 = arith.constant 3 : index
      %52 = vector.load %arg7[%c0_45, %c8, %c3_46] : memref<1x22x22xf32, #tpu.memory_space<vmem>>, vector<1x1x16xf32>
      tpu.vector_store %arg7[%c0_45, %c8, %c3_46], %49 {strides = array<i32>} : memref<1x22x22xf32, #tpu.memory_space<vmem>>, vector<1x1x16xf32>,
      %c0_47 = arith.constant 0 : index
      %c8_48 = arith.constant 8 : index
      %c3_49 = arith.constant 3 : index
      %53 = vector.load %arg8[%c0_47, %c8_48, %c3_49] : memref<1x22x22xf32, #tpu.memory_space<vmem>>, vector<1x1x16xf32>
      tpu.vector_store %arg8[%c0_47, %c8_48, %c3_49], %51 {strides = array<i32>} : memref<1x22x22xf32, #tpu.memory_space<vmem>>, vector<1x1x16xf32>,
      %54 = vector.extract_strided_slice %12 {offsets = [0, 96], sizes = [1, 16], strides = [1, 1]} : vector<1x256xf32> to vector<1x16xf32>
      %55 = vector.shape_cast %54 : vector<1x16xf32> to vector<1x1x16xf32>
      %56 = vector.extract_strided_slice %13 {offsets = [0, 96], sizes = [1, 16], strides = [1, 1]} : vector<1x256xf32> to vector<1x16xf32>
      %57 = vector.shape_cast %56 : vector<1x16xf32> to vector<1x1x16xf32>
      %c0_50 = arith.constant 0 : index
      %c9 = arith.constant 9 : index
      %c3_51 = arith.constant 3 : index
      %58 = vector.load %arg7[%c0_50, %c9, %c3_51] : memref<1x22x22xf32, #tpu.memory_space<vmem>>, vector<1x1x16xf32>
      tpu.vector_store %arg7[%c0_50, %c9, %c3_51], %55 {strides = array<i32>} : memref<1x22x22xf32, #tpu.memory_space<vmem>>, vector<1x1x16xf32>,
      %c0_52 = arith.constant 0 : index
      %c9_53 = arith.constant 9 : index
      %c3_54 = arith.constant 3 : index
      %59 = vector.load %arg8[%c0_52, %c9_53, %c3_54] : memref<1x22x22xf32, #tpu.memory_space<vmem>>, vector<1x1x16xf32>
      tpu.vector_store %arg8[%c0_52, %c9_53, %c3_54], %57 {strides = array<i32>} : memref<1x22x22xf32, #tpu.memory_space<vmem>>, vector<1x1x16xf32>,
      %60 = vector.extract_strided_slice %12 {offsets = [0, 112], sizes = [1, 16], strides = [1, 1]} : vector<1x256xf32> to vector<1x16xf32>
      %61 = vector.shape_cast %60 : vector<1x16xf32> to vector<1x1x16xf32>
      %62 = vector.extract_strided_slice %13 {offsets = [0, 112], sizes = [1, 16], strides = [1, 1]} : vector<1x256xf32> to vector<1x16xf32>
      %63 = vector.shape_cast %62 : vector<1x16xf32> to vector<1x1x16xf32>
      %c0_55 = arith.constant 0 : index
      %c10 = arith.constant 10 : index
      %c3_56 = arith.constant 3 : index
      %64 = vector.load %arg7[%c0_55, %c10, %c3_56] : memref<1x22x22xf32, #tpu.memory_space<vmem>>, vector<1x1x16xf32>
      tpu.vector_store %arg7[%c0_55, %c10, %c3_56], %61 {strides = array<i32>} : memref<1x22x22xf32, #tpu.memory_space<vmem>>, vector<1x1x16xf32>,
      %c0_57 = arith.constant 0 : index
      %c10_58 = arith.constant 10 : index
      %c3_59 = arith.constant 3 : index
      %65 = vector.load %arg8[%c0_57, %c10_58, %c3_59] : memref<1x22x22xf32, #tpu.memory_space<vmem>>, vector<1x1x16xf32>
      tpu.vector_store %arg8[%c0_57, %c10_58, %c3_59], %63 {strides = array<i32>} : memref<1x22x22xf32, #tpu.memory_space<vmem>>, vector<1x1x16xf32>,
      %66 = vector.extract_strided_slice %12 {offsets = [0, 128], sizes = [1, 16], strides = [1, 1]} : vector<1x256xf32> to vector<1x16xf32>
      %67 = vector.shape_cast %66 : vector<1x16xf32> to vector<1x1x16xf32>
      %68 = vector.extract_strided_slice %13 {offsets = [0, 128], sizes = [1, 16], strides = [1, 1]} : vector<1x256xf32> to vector<1x16xf32>
      %69 = vector.shape_cast %68 : vector<1x16xf32> to vector<1x1x16xf32>
      %c0_60 = arith.constant 0 : index
      %c11 = arith.constant 11 : index
      %c3_61 = arith.constant 3 : index
      %70 = vector.load %arg7[%c0_60, %c11, %c3_61] : memref<1x22x22xf32, #tpu.memory_space<vmem>>, vector<1x1x16xf32>
      tpu.vector_store %arg7[%c0_60, %c11, %c3_61], %67 {strides = array<i32>} : memref<1x22x22xf32, #tpu.memory_space<vmem>>, vector<1x1x16xf32>,
      %c0_62 = arith.constant 0 : index
      %c11_63 = arith.constant 11 : index
      %c3_64 = arith.constant 3 : index
      %71 = vector.load %arg8[%c0_62, %c11_63, %c3_64] : memref<1x22x22xf32, #tpu.memory_space<vmem>>, vector<1x1x16xf32>
      tpu.vector_store %arg8[%c0_62, %c11_63, %c3_64], %69 {strides = array<i32>} : memref<1x22x22xf32, #tpu.memory_space<vmem>>, vector<1x1x16xf32>,
      %72 = vector.extract_strided_slice %12 {offsets = [0, 144], sizes = [1, 16], strides = [1, 1]} : vector<1x256xf32> to vector<1x16xf32>
      %73 = vector.shape_cast %72 : vector<1x16xf32> to vector<1x1x16xf32>
      %74 = vector.extract_strided_slice %13 {offsets = [0, 144], sizes = [1, 16], strides = [1, 1]} : vector<1x256xf32> to vector<1x16xf32>
      %75 = vector.shape_cast %74 : vector<1x16xf32> to vector<1x1x16xf32>
      %c0_65 = arith.constant 0 : index
      %c12 = arith.constant 12 : index
      %c3_66 = arith.constant 3 : index
      %76 = vector.load %arg7[%c0_65, %c12, %c3_66] : memref<1x22x22xf32, #tpu.memory_space<vmem>>, vector<1x1x16xf32>
      tpu.vector_store %arg7[%c0_65, %c12, %c3_66], %73 {strides = array<i32>} : memref<1x22x22xf32, #tpu.memory_space<vmem>>, vector<1x1x16xf32>,
      %c0_67 = arith.constant 0 : index
      %c12_68 = arith.constant 12 : index
      %c3_69 = arith.constant 3 : index
      %77 = vector.load %arg8[%c0_67, %c12_68, %c3_69] : memref<1x22x22xf32, #tpu.memory_space<vmem>>, vector<1x1x16xf32>
      tpu.vector_store %arg8[%c0_67, %c12_68, %c3_69], %75 {strides = array<i32>} : memref<1x22x22xf32, #tpu.memory_space<vmem>>, vector<1x1x16xf32>,
      %78 = vector.extract_strided_slice %12 {offsets = [0, 160], sizes = [1, 16], strides = [1, 1]} : vector<1x256xf32> to vector<1x16xf32>
      %79 = vector.shape_cast %78 : vector<1x16xf32> to vector<1x1x16xf32>
      %80 = vector.extract_strided_slice %13 {offsets = [0, 160], sizes = [1, 16], strides = [1, 1]} : vector<1x256xf32> to vector<1x16xf32>
      %81 = vector.shape_cast %80 : vector<1x16xf32> to vector<1x1x16xf32>
      %c0_70 = arith.constant 0 : index
      %c13 = arith.constant 13 : index
      %c3_71 = arith.constant 3 : index
      %82 = vector.load %arg7[%c0_70, %c13, %c3_71] : memref<1x22x22xf32, #tpu.memory_space<vmem>>, vector<1x1x16xf32>
      tpu.vector_store %arg7[%c0_70, %c13, %c3_71], %79 {strides = array<i32>} : memref<1x22x22xf32, #tpu.memory_space<vmem>>, vector<1x1x16xf32>,
      %c0_72 = arith.constant 0 : index
      %c13_73 = arith.constant 13 : index
      %c3_74 = arith.constant 3 : index
      %83 = vector.load %arg8[%c0_72, %c13_73, %c3_74] : memref<1x22x22xf32, #tpu.memory_space<vmem>>, vector<1x1x16xf32>
      tpu.vector_store %arg8[%c0_72, %c13_73, %c3_74], %81 {strides = array<i32>} : memref<1x22x22xf32, #tpu.memory_space<vmem>>, vector<1x1x16xf32>,
      %84 = vector.extract_strided_slice %12 {offsets = [0, 176], sizes = [1, 16], strides = [1, 1]} : vector<1x256xf32> to vector<1x16xf32>
      %85 = vector.shape_cast %84 : vector<1x16xf32> to vector<1x1x16xf32>
      %86 = vector.extract_strided_slice %13 {offsets = [0, 176], sizes = [1, 16], strides = [1, 1]} : vector<1x256xf32> to vector<1x16xf32>
      %87 = vector.shape_cast %86 : vector<1x16xf32> to vector<1x1x16xf32>
      %c0_75 = arith.constant 0 : index
      %c14 = arith.constant 14 : index
      %c3_76 = arith.constant 3 : index
      %88 = vector.load %arg7[%c0_75, %c14, %c3_76] : memref<1x22x22xf32, #tpu.memory_space<vmem>>, vector<1x1x16xf32>
      tpu.vector_store %arg7[%c0_75, %c14, %c3_76], %85 {strides = array<i32>} : memref<1x22x22xf32, #tpu.memory_space<vmem>>, vector<1x1x16xf32>,
      %c0_77 = arith.constant 0 : index
      %c14_78 = arith.constant 14 : index
      %c3_79 = arith.constant 3 : index
      %89 = vector.load %arg8[%c0_77, %c14_78, %c3_79] : memref<1x22x22xf32, #tpu.memory_space<vmem>>, vector<1x1x16xf32>
      tpu.vector_store %arg8[%c0_77, %c14_78, %c3_79], %87 {strides = array<i32>} : memref<1x22x22xf32, #tpu.memory_space<vmem>>, vector<1x1x16xf32>,
      %90 = vector.extract_strided_slice %12 {offsets = [0, 192], sizes = [1, 16], strides = [1, 1]} : vector<1x256xf32> to vector<1x16xf32>
      %91 = vector.shape_cast %90 : vector<1x16xf32> to vector<1x1x16xf32>
      %92 = vector.extract_strided_slice %13 {offsets = [0, 192], sizes = [1, 16], strides = [1, 1]} : vector<1x256xf32> to vector<1x16xf32>
      %93 = vector.shape_cast %92 : vector<1x16xf32> to vector<1x1x16xf32>
      %c0_80 = arith.constant 0 : index
      %c15 = arith.constant 15 : index
      %c3_81 = arith.constant 3 : index
      %94 = vector.load %arg7[%c0_80, %c15, %c3_81] : memref<1x22x22xf32, #tpu.memory_space<vmem>>, vector<1x1x16xf32>
      tpu.vector_store %arg7[%c0_80, %c15, %c3_81], %91 {strides = array<i32>} : memref<1x22x22xf32, #tpu.memory_space<vmem>>, vector<1x1x16xf32>,
      %c0_82 = arith.constant 0 : index
      %c15_83 = arith.constant 15 : index
      %c3_84 = arith.constant 3 : index
      %95 = vector.load %arg8[%c0_82, %c15_83, %c3_84] : memref<1x22x22xf32, #tpu.memory_space<vmem>>, vector<1x1x16xf32>
      tpu.vector_store %arg8[%c0_82, %c15_83, %c3_84], %93 {strides = array<i32>} : memref<1x22x22xf32, #tpu.memory_space<vmem>>, vector<1x1x16xf32>,
      %96 = vector.extract_strided_slice %12 {offsets = [0, 208], sizes = [1, 16], strides = [1, 1]} : vector<1x256xf32> to vector<1x16xf32>
      %97 = vector.shape_cast %96 : vector<1x16xf32> to vector<1x1x16xf32>
      %98 = vector.extract_strided_slice %13 {offsets = [0, 208], sizes = [1, 16], strides = [1, 1]} : vector<1x256xf32> to vector<1x16xf32>
      %99 = vector.shape_cast %98 : vector<1x16xf32> to vector<1x1x16xf32>
      %c0_85 = arith.constant 0 : index
      %c16 = arith.constant 16 : index
      %c3_86 = arith.constant 3 : index
      %100 = vector.load %arg7[%c0_85, %c16, %c3_86] : memref<1x22x22xf32, #tpu.memory_space<vmem>>, vector<1x1x16xf32>
      tpu.vector_store %arg7[%c0_85, %c16, %c3_86], %97 {strides = array<i32>} : memref<1x22x22xf32, #tpu.memory_space<vmem>>, vector<1x1x16xf32>,
      %c0_87 = arith.constant 0 : index
      %c16_88 = arith.constant 16 : index
      %c3_89 = arith.constant 3 : index
      %101 = vector.load %arg8[%c0_87, %c16_88, %c3_89] : memref<1x22x22xf32, #tpu.memory_space<vmem>>, vector<1x1x16xf32>
      tpu.vector_store %arg8[%c0_87, %c16_88, %c3_89], %99 {strides = array<i32>} : memref<1x22x22xf32, #tpu.memory_space<vmem>>, vector<1x1x16xf32>,
      %102 = vector.extract_strided_slice %12 {offsets = [0, 224], sizes = [1, 16], strides = [1, 1]} : vector<1x256xf32> to vector<1x16xf32>
      %103 = vector.shape_cast %102 : vector<1x16xf32> to vector<1x1x16xf32>
      %104 = vector.extract_strided_slice %13 {offsets = [0, 224], sizes = [1, 16], strides = [1, 1]} : vector<1x256xf32> to vector<1x16xf32>
      %105 = vector.shape_cast %104 : vector<1x16xf32> to vector<1x1x16xf32>
      %c0_90 = arith.constant 0 : index
      %c17 = arith.constant 17 : index
      %c3_91 = arith.constant 3 : index
      %106 = vector.load %arg7[%c0_90, %c17, %c3_91] : memref<1x22x22xf32, #tpu.memory_space<vmem>>, vector<1x1x16xf32>
      tpu.vector_store %arg7[%c0_90, %c17, %c3_91], %103 {strides = array<i32>} : memref<1x22x22xf32, #tpu.memory_space<vmem>>, vector<1x1x16xf32>,
      %c0_92 = arith.constant 0 : index
      %c17_93 = arith.constant 17 : index
      %c3_94 = arith.constant 3 : index
      %107 = vector.load %arg8[%c0_92, %c17_93, %c3_94] : memref<1x22x22xf32, #tpu.memory_space<vmem>>, vector<1x1x16xf32>
      tpu.vector_store %arg8[%c0_92, %c17_93, %c3_94], %105 {strides = array<i32>} : memref<1x22x22xf32, #tpu.memory_space<vmem>>, vector<1x1x16xf32>,
      %108 = vector.extract_strided_slice %12 {offsets = [0, 240], sizes = [1, 16], strides = [1, 1]} : vector<1x256xf32> to vector<1x16xf32>
      %109 = vector.shape_cast %108 : vector<1x16xf32> to vector<1x1x16xf32>
      %110 = vector.extract_strided_slice %13 {offsets = [0, 240], sizes = [1, 16], strides = [1, 1]} : vector<1x256xf32> to vector<1x16xf32>
      %111 = vector.shape_cast %110 : vector<1x16xf32> to vector<1x1x16xf32>
      %c0_95 = arith.constant 0 : index
      %c18 = arith.constant 18 : index
      %c3_96 = arith.constant 3 : index
      %112 = vector.load %arg7[%c0_95, %c18, %c3_96] : memref<1x22x22xf32, #tpu.memory_space<vmem>>, vector<1x1x16xf32>
      tpu.vector_store %arg7[%c0_95, %c18, %c3_96], %109 {strides = array<i32>} : memref<1x22x22xf32, #tpu.memory_space<vmem>>, vector<1x1x16xf32>,
      %c0_97 = arith.constant 0 : index
      %c18_98 = arith.constant 18 : index
      %c3_99 = arith.constant 3 : index
      %113 = vector.load %arg8[%c0_97, %c18_98, %c3_99] : memref<1x22x22xf32, #tpu.memory_space<vmem>>, vector<1x1x16xf32>
      tpu.vector_store %arg8[%c0_97, %c18_98, %c3_99], %111 {strides = array<i32>} : memref<1x22x22xf32, #tpu.memory_space<vmem>>, vector<1x1x16xf32>,
      %c0_100 = arith.constant 0 : index
      %c0_101 = arith.constant 0 : index
      %c0_102 = arith.constant 0 : index
      %114 = vector.load %arg7[%c0_100, %c0_101, %c0_102] : memref<1x22x22xf32, #tpu.memory_space<vmem>>, vector<1x22x22xf32>
      %c0_103 = arith.constant 0 : index
      %c0_104 = arith.constant 0 : index
      %c0_105 = arith.constant 0 : index
      %115 = vector.load %arg8[%c0_103, %c0_104, %c0_105] : memref<1x22x22xf32, #tpu.memory_space<vmem>>, vector<1x22x22xf32>
      %cst_106 = arith.constant 0.000000e+00 : f32
      %116 = vector.broadcast %cst_106 : f32 to vector<1x16x16xf32>
      %cst_107 = arith.constant 0.000000e+00 : f32
      %117 = vector.broadcast %cst_107 : f32 to vector<1x16x16xf32>
      %cst_108 = arith.constant 0.000000e+00 : f32
      %118 = vector.broadcast %cst_108 : f32 to vector<1x16x16xf32>
      %cst_109 = arith.constant 0.000000e+00 : f32
      %119 = vector.broadcast %cst_109 : f32 to vector<1x16x16xf32>
      %120 = vector.extract_strided_slice %114 {offsets = [0, 0, 0], sizes = [1, 22, 16], strides = [1, 1, 1]} : vector<1x22x22xf32> to vector<1x22x16xf32>
      %c0_110 = arith.constant 0 : index
      %121 = memref.load %arg2[%c0_110] : memref<98xf32, #tpu.memory_space<smem>>
      %122 = vector.extract_strided_slice %120 {offsets = [0, 0, 0], sizes = [1, 16, 16], strides = [1, 1, 1]} : vector<1x22x16xf32> to vector<1x16x16xf32>
      %123 = vector.broadcast %121 : f32 to vector<1x16x16xf32>
      %124 = arith.mulf %123, %122 : vector<1x16x16xf32>
      %125 = arith.addf %116, %124 : vector<1x16x16xf32>
      %c7_111 = arith.constant 7 : index
      %126 = memref.load %arg2[%c7_111] : memref<98xf32, #tpu.memory_space<smem>>
      %127 = vector.extract_strided_slice %120 {offsets = [0, 1, 0], sizes = [1, 16, 16], strides = [1, 1, 1]} : vector<1x22x16xf32> to vector<1x16x16xf32>
      %128 = vector.broadcast %126 : f32 to vector<1x16x16xf32>
      %129 = arith.mulf %128, %127 : vector<1x16x16xf32>
      %130 = arith.addf %117, %129 : vector<1x16x16xf32>
      %c14_112 = arith.constant 14 : index
      %131 = memref.load %arg2[%c14_112] : memref<98xf32, #tpu.memory_space<smem>>
      %132 = vector.extract_strided_slice %120 {offsets = [0, 2, 0], sizes = [1, 16, 16], strides = [1, 1, 1]} : vector<1x22x16xf32> to vector<1x16x16xf32>
      %133 = vector.broadcast %131 : f32 to vector<1x16x16xf32>
      %134 = arith.mulf %133, %132 : vector<1x16x16xf32>
      %135 = arith.addf %118, %134 : vector<1x16x16xf32>
      %c21 = arith.constant 21 : index
      %136 = memref.load %arg2[%c21] : memref<98xf32, #tpu.memory_space<smem>>
      %137 = vector.extract_strided_slice %120 {offsets = [0, 3, 0], sizes = [1, 16, 16], strides = [1, 1, 1]} : vector<1x22x16xf32> to vector<1x16x16xf32>
      %138 = vector.broadcast %136 : f32 to vector<1x16x16xf32>
      %139 = arith.mulf %138, %137 : vector<1x16x16xf32>
      %140 = arith.addf %119, %139 : vector<1x16x16xf32>
      %c28 = arith.constant 28 : index
      %141 = memref.load %arg2[%c28] : memref<98xf32, #tpu.memory_space<smem>>
      %142 = vector.extract_strided_slice %120 {offsets = [0, 4, 0], sizes = [1, 16, 16], strides = [1, 1, 1]} : vector<1x22x16xf32> to vector<1x16x16xf32>
      %143 = vector.broadcast %141 : f32 to vector<1x16x16xf32>
      %144 = arith.mulf %143, %142 : vector<1x16x16xf32>
      %145 = arith.addf %125, %144 : vector<1x16x16xf32>
      %c35 = arith.constant 35 : index
      %146 = memref.load %arg2[%c35] : memref<98xf32, #tpu.memory_space<smem>>
      %147 = vector.extract_strided_slice %120 {offsets = [0, 5, 0], sizes = [1, 16, 16], strides = [1, 1, 1]} : vector<1x22x16xf32> to vector<1x16x16xf32>
      %148 = vector.broadcast %146 : f32 to vector<1x16x16xf32>
      %149 = arith.mulf %148, %147 : vector<1x16x16xf32>
      %150 = arith.addf %130, %149 : vector<1x16x16xf32>
      %c42 = arith.constant 42 : index
      %151 = memref.load %arg2[%c42] : memref<98xf32, #tpu.memory_space<smem>>
      %152 = vector.extract_strided_slice %120 {offsets = [0, 6, 0], sizes = [1, 16, 16], strides = [1, 1, 1]} : vector<1x22x16xf32> to vector<1x16x16xf32>
      %153 = vector.broadcast %151 : f32 to vector<1x16x16xf32>
      %154 = arith.mulf %153, %152 : vector<1x16x16xf32>
      %155 = arith.addf %135, %154 : vector<1x16x16xf32>
      %156 = vector.extract_strided_slice %114 {offsets = [0, 0, 1], sizes = [1, 22, 16], strides = [1, 1, 1]} : vector<1x22x22xf32> to vector<1x22x16xf32>
      %c1 = arith.constant 1 : index
      %157 = memref.load %arg2[%c1] : memref<98xf32, #tpu.memory_space<smem>>
      %158 = vector.extract_strided_slice %156 {offsets = [0, 0, 0], sizes = [1, 16, 16], strides = [1, 1, 1]} : vector<1x22x16xf32> to vector<1x16x16xf32>
      %159 = vector.broadcast %157 : f32 to vector<1x16x16xf32>
      %160 = arith.mulf %159, %158 : vector<1x16x16xf32>
      %161 = arith.addf %140, %160 : vector<1x16x16xf32>
      %c8_113 = arith.constant 8 : index
      %162 = memref.load %arg2[%c8_113] : memref<98xf32, #tpu.memory_space<smem>>
      %163 = vector.extract_strided_slice %156 {offsets = [0, 1, 0], sizes = [1, 16, 16], strides = [1, 1, 1]} : vector<1x22x16xf32> to vector<1x16x16xf32>
      %164 = vector.broadcast %162 : f32 to vector<1x16x16xf32>
      %165 = arith.mulf %164, %163 : vector<1x16x16xf32>
      %166 = arith.addf %145, %165 : vector<1x16x16xf32>
      %c15_114 = arith.constant 15 : index
      %167 = memref.load %arg2[%c15_114] : memref<98xf32, #tpu.memory_space<smem>>
      %168 = vector.extract_strided_slice %156 {offsets = [0, 2, 0], sizes = [1, 16, 16], strides = [1, 1, 1]} : vector<1x22x16xf32> to vector<1x16x16xf32>
      %169 = vector.broadcast %167 : f32 to vector<1x16x16xf32>
      %170 = arith.mulf %169, %168 : vector<1x16x16xf32>
      %171 = arith.addf %150, %170 : vector<1x16x16xf32>
      %c22 = arith.constant 22 : index
      %172 = memref.load %arg2[%c22] : memref<98xf32, #tpu.memory_space<smem>>
      %173 = vector.extract_strided_slice %156 {offsets = [0, 3, 0], sizes = [1, 16, 16], strides = [1, 1, 1]} : vector<1x22x16xf32> to vector<1x16x16xf32>
      %174 = vector.broadcast %172 : f32 to vector<1x16x16xf32>
      %175 = arith.mulf %174, %173 : vector<1x16x16xf32>
      %176 = arith.addf %155, %175 : vector<1x16x16xf32>
      %c29 = arith.constant 29 : index
      %177 = memref.load %arg2[%c29] : memref<98xf32, #tpu.memory_space<smem>>
      %178 = vector.extract_strided_slice %156 {offsets = [0, 4, 0], sizes = [1, 16, 16], strides = [1, 1, 1]} : vector<1x22x16xf32> to vector<1x16x16xf32>
      %179 = vector.broadcast %177 : f32 to vector<1x16x16xf32>
      %180 = arith.mulf %179, %178 : vector<1x16x16xf32>
      %181 = arith.addf %161, %180 : vector<1x16x16xf32>
      %c36 = arith.constant 36 : index
      %182 = memref.load %arg2[%c36] : memref<98xf32, #tpu.memory_space<smem>>
      %183 = vector.extract_strided_slice %156 {offsets = [0, 5, 0], sizes = [1, 16, 16], strides = [1, 1, 1]} : vector<1x22x16xf32> to vector<1x16x16xf32>
      %184 = vector.broadcast %182 : f32 to vector<1x16x16xf32>
      %185 = arith.mulf %184, %183 : vector<1x16x16xf32>
      %186 = arith.addf %166, %185 : vector<1x16x16xf32>
      %c43 = arith.constant 43 : index
      %187 = memref.load %arg2[%c43] : memref<98xf32, #tpu.memory_space<smem>>
      %188 = vector.extract_strided_slice %156 {offsets = [0, 6, 0], sizes = [1, 16, 16], strides = [1, 1, 1]} : vector<1x22x16xf32> to vector<1x16x16xf32>
      %189 = vector.broadcast %187 : f32 to vector<1x16x16xf32>
      %190 = arith.mulf %189, %188 : vector<1x16x16xf32>
      %191 = arith.addf %171, %190 : vector<1x16x16xf32>
      %192 = vector.extract_strided_slice %114 {offsets = [0, 0, 2], sizes = [1, 22, 16], strides = [1, 1, 1]} : vector<1x22x22xf32> to vector<1x22x16xf32>
      %c2 = arith.constant 2 : index
      %193 = memref.load %arg2[%c2] : memref<98xf32, #tpu.memory_space<smem>>
      %194 = vector.extract_strided_slice %192 {offsets = [0, 0, 0], sizes = [1, 16, 16], strides = [1, 1, 1]} : vector<1x22x16xf32> to vector<1x16x16xf32>
      %195 = vector.broadcast %193 : f32 to vector<1x16x16xf32>
      %196 = arith.mulf %195, %194 : vector<1x16x16xf32>
      %197 = arith.addf %176, %196 : vector<1x16x16xf32>
      %c9_115 = arith.constant 9 : index
      %198 = memref.load %arg2[%c9_115] : memref<98xf32, #tpu.memory_space<smem>>
      %199 = vector.extract_strided_slice %192 {offsets = [0, 1, 0], sizes = [1, 16, 16], strides = [1, 1, 1]} : vector<1x22x16xf32> to vector<1x16x16xf32>
      %200 = vector.broadcast %198 : f32 to vector<1x16x16xf32>
      %201 = arith.mulf %200, %199 : vector<1x16x16xf32>
      %202 = arith.addf %181, %201 : vector<1x16x16xf32>
      %c16_116 = arith.constant 16 : index
      %203 = memref.load %arg2[%c16_116] : memref<98xf32, #tpu.memory_space<smem>>
      %204 = vector.extract_strided_slice %192 {offsets = [0, 2, 0], sizes = [1, 16, 16], strides = [1, 1, 1]} : vector<1x22x16xf32> to vector<1x16x16xf32>
      %205 = vector.broadcast %203 : f32 to vector<1x16x16xf32>
      %206 = arith.mulf %205, %204 : vector<1x16x16xf32>
      %207 = arith.addf %186, %206 : vector<1x16x16xf32>
      %c23 = arith.constant 23 : index
      %208 = memref.load %arg2[%c23] : memref<98xf32, #tpu.memory_space<smem>>
      %209 = vector.extract_strided_slice %192 {offsets = [0, 3, 0], sizes = [1, 16, 16], strides = [1, 1, 1]} : vector<1x22x16xf32> to vector<1x16x16xf32>
      %210 = vector.broadcast %208 : f32 to vector<1x16x16xf32>
      %211 = arith.mulf %210, %209 : vector<1x16x16xf32>
      %212 = arith.addf %191, %211 : vector<1x16x16xf32>
      %c30 = arith.constant 30 : index
      %213 = memref.load %arg2[%c30] : memref<98xf32, #tpu.memory_space<smem>>
      %214 = vector.extract_strided_slice %192 {offsets = [0, 4, 0], sizes = [1, 16, 16], strides = [1, 1, 1]} : vector<1x22x16xf32> to vector<1x16x16xf32>
      %215 = vector.broadcast %213 : f32 to vector<1x16x16xf32>
      %216 = arith.mulf %215, %214 : vector<1x16x16xf32>
      %217 = arith.addf %197, %216 : vector<1x16x16xf32>
      %c37 = arith.constant 37 : index
      %218 = memref.load %arg2[%c37] : memref<98xf32, #tpu.memory_space<smem>>
      %219 = vector.extract_strided_slice %192 {offsets = [0, 5, 0], sizes = [1, 16, 16], strides = [1, 1, 1]} : vector<1x22x16xf32> to vector<1x16x16xf32>
      %220 = vector.broadcast %218 : f32 to vector<1x16x16xf32>
      %221 = arith.mulf %220, %219 : vector<1x16x16xf32>
      %222 = arith.addf %202, %221 : vector<1x16x16xf32>
      %c44 = arith.constant 44 : index
      %223 = memref.load %arg2[%c44] : memref<98xf32, #tpu.memory_space<smem>>
      %224 = vector.extract_strided_slice %192 {offsets = [0, 6, 0], sizes = [1, 16, 16], strides = [1, 1, 1]} : vector<1x22x16xf32> to vector<1x16x16xf32>
      %225 = vector.broadcast %223 : f32 to vector<1x16x16xf32>
      %226 = arith.mulf %225, %224 : vector<1x16x16xf32>
      %227 = arith.addf %207, %226 : vector<1x16x16xf32>
      %228 = vector.extract_strided_slice %114 {offsets = [0, 0, 3], sizes = [1, 22, 16], strides = [1, 1, 1]} : vector<1x22x22xf32> to vector<1x22x16xf32>
      %c3_117 = arith.constant 3 : index
      %229 = memref.load %arg2[%c3_117] : memref<98xf32, #tpu.memory_space<smem>>
      %230 = vector.extract_strided_slice %228 {offsets = [0, 0, 0], sizes = [1, 16, 16], strides = [1, 1, 1]} : vector<1x22x16xf32> to vector<1x16x16xf32>
      %231 = vector.broadcast %229 : f32 to vector<1x16x16xf32>
      %232 = arith.mulf %231, %230 : vector<1x16x16xf32>
      %233 = arith.addf %212, %232 : vector<1x16x16xf32>
      %c10_118 = arith.constant 10 : index
      %234 = memref.load %arg2[%c10_118] : memref<98xf32, #tpu.memory_space<smem>>
      %235 = vector.extract_strided_slice %228 {offsets = [0, 1, 0], sizes = [1, 16, 16], strides = [1, 1, 1]} : vector<1x22x16xf32> to vector<1x16x16xf32>
      %236 = vector.broadcast %234 : f32 to vector<1x16x16xf32>
      %237 = arith.mulf %236, %235 : vector<1x16x16xf32>
      %238 = arith.addf %217, %237 : vector<1x16x16xf32>
      %c17_119 = arith.constant 17 : index
      %239 = memref.load %arg2[%c17_119] : memref<98xf32, #tpu.memory_space<smem>>
      %240 = vector.extract_strided_slice %228 {offsets = [0, 2, 0], sizes = [1, 16, 16], strides = [1, 1, 1]} : vector<1x22x16xf32> to vector<1x16x16xf32>
      %241 = vector.broadcast %239 : f32 to vector<1x16x16xf32>
      %242 = arith.mulf %241, %240 : vector<1x16x16xf32>
      %243 = arith.addf %222, %242 : vector<1x16x16xf32>
      %c24 = arith.constant 24 : index
      %244 = memref.load %arg2[%c24] : memref<98xf32, #tpu.memory_space<smem>>
      %245 = vector.extract_strided_slice %228 {offsets = [0, 3, 0], sizes = [1, 16, 16], strides = [1, 1, 1]} : vector<1x22x16xf32> to vector<1x16x16xf32>
      %246 = vector.broadcast %244 : f32 to vector<1x16x16xf32>
      %247 = arith.mulf %246, %245 : vector<1x16x16xf32>
      %248 = arith.addf %227, %247 : vector<1x16x16xf32>
      %c31 = arith.constant 31 : index
      %249 = memref.load %arg2[%c31] : memref<98xf32, #tpu.memory_space<smem>>
      %250 = vector.extract_strided_slice %228 {offsets = [0, 4, 0], sizes = [1, 16, 16], strides = [1, 1, 1]} : vector<1x22x16xf32> to vector<1x16x16xf32>
      %251 = vector.broadcast %249 : f32 to vector<1x16x16xf32>
      %252 = arith.mulf %251, %250 : vector<1x16x16xf32>
      %253 = arith.addf %233, %252 : vector<1x16x16xf32>
      %c38 = arith.constant 38 : index
      %254 = memref.load %arg2[%c38] : memref<98xf32, #tpu.memory_space<smem>>
      %255 = vector.extract_strided_slice %228 {offsets = [0, 5, 0], sizes = [1, 16, 16], strides = [1, 1, 1]} : vector<1x22x16xf32> to vector<1x16x16xf32>
      %256 = vector.broadcast %254 : f32 to vector<1x16x16xf32>
      %257 = arith.mulf %256, %255 : vector<1x16x16xf32>
      %258 = arith.addf %238, %257 : vector<1x16x16xf32>
      %c45 = arith.constant 45 : index
      %259 = memref.load %arg2[%c45] : memref<98xf32, #tpu.memory_space<smem>>
      %260 = vector.extract_strided_slice %228 {offsets = [0, 6, 0], sizes = [1, 16, 16], strides = [1, 1, 1]} : vector<1x22x16xf32> to vector<1x16x16xf32>
      %261 = vector.broadcast %259 : f32 to vector<1x16x16xf32>
      %262 = arith.mulf %261, %260 : vector<1x16x16xf32>
      %263 = arith.addf %243, %262 : vector<1x16x16xf32>
      %264 = vector.extract_strided_slice %114 {offsets = [0, 0, 4], sizes = [1, 22, 16], strides = [1, 1, 1]} : vector<1x22x22xf32> to vector<1x22x16xf32>
      %c4_120 = arith.constant 4 : index
      %265 = memref.load %arg2[%c4_120] : memref<98xf32, #tpu.memory_space<smem>>
      %266 = vector.extract_strided_slice %264 {offsets = [0, 0, 0], sizes = [1, 16, 16], strides = [1, 1, 1]} : vector<1x22x16xf32> to vector<1x16x16xf32>
      %267 = vector.broadcast %265 : f32 to vector<1x16x16xf32>
      %268 = arith.mulf %267, %266 : vector<1x16x16xf32>
      %269 = arith.addf %248, %268 : vector<1x16x16xf32>
      %c11_121 = arith.constant 11 : index
      %270 = memref.load %arg2[%c11_121] : memref<98xf32, #tpu.memory_space<smem>>
      %271 = vector.extract_strided_slice %264 {offsets = [0, 1, 0], sizes = [1, 16, 16], strides = [1, 1, 1]} : vector<1x22x16xf32> to vector<1x16x16xf32>
      %272 = vector.broadcast %270 : f32 to vector<1x16x16xf32>
      %273 = arith.mulf %272, %271 : vector<1x16x16xf32>
      %274 = arith.addf %253, %273 : vector<1x16x16xf32>
      %c18_122 = arith.constant 18 : index
      %275 = memref.load %arg2[%c18_122] : memref<98xf32, #tpu.memory_space<smem>>
      %276 = vector.extract_strided_slice %264 {offsets = [0, 2, 0], sizes = [1, 16, 16], strides = [1, 1, 1]} : vector<1x22x16xf32> to vector<1x16x16xf32>
      %277 = vector.broadcast %275 : f32 to vector<1x16x16xf32>
      %278 = arith.mulf %277, %276 : vector<1x16x16xf32>
      %279 = arith.addf %258, %278 : vector<1x16x16xf32>
      %c25 = arith.constant 25 : index
      %280 = memref.load %arg2[%c25] : memref<98xf32, #tpu.memory_space<smem>>
      %281 = vector.extract_strided_slice %264 {offsets = [0, 3, 0], sizes = [1, 16, 16], strides = [1, 1, 1]} : vector<1x22x16xf32> to vector<1x16x16xf32>
      %282 = vector.broadcast %280 : f32 to vector<1x16x16xf32>
      %283 = arith.mulf %282, %281 : vector<1x16x16xf32>
      %284 = arith.addf %263, %283 : vector<1x16x16xf32>
      %c32 = arith.constant 32 : index
      %285 = memref.load %arg2[%c32] : memref<98xf32, #tpu.memory_space<smem>>
      %286 = vector.extract_strided_slice %264 {offsets = [0, 4, 0], sizes = [1, 16, 16], strides = [1, 1, 1]} : vector<1x22x16xf32> to vector<1x16x16xf32>
      %287 = vector.broadcast %285 : f32 to vector<1x16x16xf32>
      %288 = arith.mulf %287, %286 : vector<1x16x16xf32>
      %289 = arith.addf %269, %288 : vector<1x16x16xf32>
      %c39 = arith.constant 39 : index
      %290 = memref.load %arg2[%c39] : memref<98xf32, #tpu.memory_space<smem>>
      %291 = vector.extract_strided_slice %264 {offsets = [0, 5, 0], sizes = [1, 16, 16], strides = [1, 1, 1]} : vector<1x22x16xf32> to vector<1x16x16xf32>
      %292 = vector.broadcast %290 : f32 to vector<1x16x16xf32>
      %293 = arith.mulf %292, %291 : vector<1x16x16xf32>
      %294 = arith.addf %274, %293 : vector<1x16x16xf32>
      %c46 = arith.constant 46 : index
      %295 = memref.load %arg2[%c46] : memref<98xf32, #tpu.memory_space<smem>>
      %296 = vector.extract_strided_slice %264 {offsets = [0, 6, 0], sizes = [1, 16, 16], strides = [1, 1, 1]} : vector<1x22x16xf32> to vector<1x16x16xf32>
      %297 = vector.broadcast %295 : f32 to vector<1x16x16xf32>
      %298 = arith.mulf %297, %296 : vector<1x16x16xf32>
      %299 = arith.addf %279, %298 : vector<1x16x16xf32>
      %300 = vector.extract_strided_slice %114 {offsets = [0, 0, 5], sizes = [1, 22, 16], strides = [1, 1, 1]} : vector<1x22x22xf32> to vector<1x22x16xf32>
      %c5_123 = arith.constant 5 : index
      %301 = memref.load %arg2[%c5_123] : memref<98xf32, #tpu.memory_space<smem>>
      %302 = vector.extract_strided_slice %300 {offsets = [0, 0, 0], sizes = [1, 16, 16], strides = [1, 1, 1]} : vector<1x22x16xf32> to vector<1x16x16xf32>
      %303 = vector.broadcast %301 : f32 to vector<1x16x16xf32>
      %304 = arith.mulf %303, %302 : vector<1x16x16xf32>
      %305 = arith.addf %284, %304 : vector<1x16x16xf32>
      %c12_124 = arith.constant 12 : index
      %306 = memref.load %arg2[%c12_124] : memref<98xf32, #tpu.memory_space<smem>>
      %307 = vector.extract_strided_slice %300 {offsets = [0, 1, 0], sizes = [1, 16, 16], strides = [1, 1, 1]} : vector<1x22x16xf32> to vector<1x16x16xf32>
      %308 = vector.broadcast %306 : f32 to vector<1x16x16xf32>
      %309 = arith.mulf %308, %307 : vector<1x16x16xf32>
      %310 = arith.addf %289, %309 : vector<1x16x16xf32>
      %c19 = arith.constant 19 : index
      %311 = memref.load %arg2[%c19] : memref<98xf32, #tpu.memory_space<smem>>
      %312 = vector.extract_strided_slice %300 {offsets = [0, 2, 0], sizes = [1, 16, 16], strides = [1, 1, 1]} : vector<1x22x16xf32> to vector<1x16x16xf32>
      %313 = vector.broadcast %311 : f32 to vector<1x16x16xf32>
      %314 = arith.mulf %313, %312 : vector<1x16x16xf32>
      %315 = arith.addf %294, %314 : vector<1x16x16xf32>
      %c26 = arith.constant 26 : index
      %316 = memref.load %arg2[%c26] : memref<98xf32, #tpu.memory_space<smem>>
      %317 = vector.extract_strided_slice %300 {offsets = [0, 3, 0], sizes = [1, 16, 16], strides = [1, 1, 1]} : vector<1x22x16xf32> to vector<1x16x16xf32>
      %318 = vector.broadcast %316 : f32 to vector<1x16x16xf32>
      %319 = arith.mulf %318, %317 : vector<1x16x16xf32>
      %320 = arith.addf %299, %319 : vector<1x16x16xf32>
      %c33 = arith.constant 33 : index
      %321 = memref.load %arg2[%c33] : memref<98xf32, #tpu.memory_space<smem>>
      %322 = vector.extract_strided_slice %300 {offsets = [0, 4, 0], sizes = [1, 16, 16], strides = [1, 1, 1]} : vector<1x22x16xf32> to vector<1x16x16xf32>
      %323 = vector.broadcast %321 : f32 to vector<1x16x16xf32>
      %324 = arith.mulf %323, %322 : vector<1x16x16xf32>
      %325 = arith.addf %305, %324 : vector<1x16x16xf32>
      %c40 = arith.constant 40 : index
      %326 = memref.load %arg2[%c40] : memref<98xf32, #tpu.memory_space<smem>>
      %327 = vector.extract_strided_slice %300 {offsets = [0, 5, 0], sizes = [1, 16, 16], strides = [1, 1, 1]} : vector<1x22x16xf32> to vector<1x16x16xf32>
      %328 = vector.broadcast %326 : f32 to vector<1x16x16xf32>
      %329 = arith.mulf %328, %327 : vector<1x16x16xf32>
      %330 = arith.addf %310, %329 : vector<1x16x16xf32>
      %c47 = arith.constant 47 : index
      %331 = memref.load %arg2[%c47] : memref<98xf32, #tpu.memory_space<smem>>
      %332 = vector.extract_strided_slice %300 {offsets = [0, 6, 0], sizes = [1, 16, 16], strides = [1, 1, 1]} : vector<1x22x16xf32> to vector<1x16x16xf32>
      %333 = vector.broadcast %331 : f32 to vector<1x16x16xf32>
      %334 = arith.mulf %333, %332 : vector<1x16x16xf32>
      %335 = arith.addf %315, %334 : vector<1x16x16xf32>
      %336 = vector.extract_strided_slice %114 {offsets = [0, 0, 6], sizes = [1, 22, 16], strides = [1, 1, 1]} : vector<1x22x22xf32> to vector<1x22x16xf32>
      %c6_125 = arith.constant 6 : index
      %337 = memref.load %arg2[%c6_125] : memref<98xf32, #tpu.memory_space<smem>>
      %338 = vector.extract_strided_slice %336 {offsets = [0, 0, 0], sizes = [1, 16, 16], strides = [1, 1, 1]} : vector<1x22x16xf32> to vector<1x16x16xf32>
      %339 = vector.broadcast %337 : f32 to vector<1x16x16xf32>
      %340 = arith.mulf %339, %338 : vector<1x16x16xf32>
      %341 = arith.addf %320, %340 : vector<1x16x16xf32>
      %c13_126 = arith.constant 13 : index
      %342 = memref.load %arg2[%c13_126] : memref<98xf32, #tpu.memory_space<smem>>
      %343 = vector.extract_strided_slice %336 {offsets = [0, 1, 0], sizes = [1, 16, 16], strides = [1, 1, 1]} : vector<1x22x16xf32> to vector<1x16x16xf32>
      %344 = vector.broadcast %342 : f32 to vector<1x16x16xf32>
      %345 = arith.mulf %344, %343 : vector<1x16x16xf32>
      %346 = arith.addf %325, %345 : vector<1x16x16xf32>
      %c20 = arith.constant 20 : index
      %347 = memref.load %arg2[%c20] : memref<98xf32, #tpu.memory_space<smem>>
      %348 = vector.extract_strided_slice %336 {offsets = [0, 2, 0], sizes = [1, 16, 16], strides = [1, 1, 1]} : vector<1x22x16xf32> to vector<1x16x16xf32>
      %349 = vector.broadcast %347 : f32 to vector<1x16x16xf32>
      %350 = arith.mulf %349, %348 : vector<1x16x16xf32>
      %351 = arith.addf %330, %350 : vector<1x16x16xf32>
      %c27 = arith.constant 27 : index
      %352 = memref.load %arg2[%c27] : memref<98xf32, #tpu.memory_space<smem>>
      %353 = vector.extract_strided_slice %336 {offsets = [0, 3, 0], sizes = [1, 16, 16], strides = [1, 1, 1]} : vector<1x22x16xf32> to vector<1x16x16xf32>
      %354 = vector.broadcast %352 : f32 to vector<1x16x16xf32>
      %355 = arith.mulf %354, %353 : vector<1x16x16xf32>
      %356 = arith.addf %335, %355 : vector<1x16x16xf32>
      %c34 = arith.constant 34 : index
      %357 = memref.load %arg2[%c34] : memref<98xf32, #tpu.memory_space<smem>>
      %358 = vector.extract_strided_slice %336 {offsets = [0, 4, 0], sizes = [1, 16, 16], strides = [1, 1, 1]} : vector<1x22x16xf32> to vector<1x16x16xf32>
      %359 = vector.broadcast %357 : f32 to vector<1x16x16xf32>
      %360 = arith.mulf %359, %358 : vector<1x16x16xf32>
      %361 = arith.addf %341, %360 : vector<1x16x16xf32>
      %c41 = arith.constant 41 : index
      %362 = memref.load %arg2[%c41] : memref<98xf32, #tpu.memory_space<smem>>
      %363 = vector.extract_strided_slice %336 {offsets = [0, 5, 0], sizes = [1, 16, 16], strides = [1, 1, 1]} : vector<1x22x16xf32> to vector<1x16x16xf32>
      %364 = vector.broadcast %362 : f32 to vector<1x16x16xf32>
      %365 = arith.mulf %364, %363 : vector<1x16x16xf32>
      %366 = arith.addf %346, %365 : vector<1x16x16xf32>
      %c48 = arith.constant 48 : index
      %367 = memref.load %arg2[%c48] : memref<98xf32, #tpu.memory_space<smem>>
      %368 = vector.extract_strided_slice %336 {offsets = [0, 6, 0], sizes = [1, 16, 16], strides = [1, 1, 1]} : vector<1x22x16xf32> to vector<1x16x16xf32>
      %369 = vector.broadcast %367 : f32 to vector<1x16x16xf32>
      %370 = arith.mulf %369, %368 : vector<1x16x16xf32>
      %371 = arith.addf %351, %370 : vector<1x16x16xf32>
      %372 = vector.extract_strided_slice %115 {offsets = [0, 0, 0], sizes = [1, 22, 16], strides = [1, 1, 1]} : vector<1x22x22xf32> to vector<1x22x16xf32>
      %c49 = arith.constant 49 : index
      %373 = memref.load %arg2[%c49] : memref<98xf32, #tpu.memory_space<smem>>
      %374 = vector.extract_strided_slice %372 {offsets = [0, 0, 0], sizes = [1, 16, 16], strides = [1, 1, 1]} : vector<1x22x16xf32> to vector<1x16x16xf32>
      %375 = vector.broadcast %373 : f32 to vector<1x16x16xf32>
      %376 = arith.mulf %375, %374 : vector<1x16x16xf32>
      %377 = arith.addf %356, %376 : vector<1x16x16xf32>
      %c56 = arith.constant 56 : index
      %378 = memref.load %arg2[%c56] : memref<98xf32, #tpu.memory_space<smem>>
      %379 = vector.extract_strided_slice %372 {offsets = [0, 1, 0], sizes = [1, 16, 16], strides = [1, 1, 1]} : vector<1x22x16xf32> to vector<1x16x16xf32>
      %380 = vector.broadcast %378 : f32 to vector<1x16x16xf32>
      %381 = arith.mulf %380, %379 : vector<1x16x16xf32>
      %382 = arith.addf %361, %381 : vector<1x16x16xf32>
      %c63 = arith.constant 63 : index
      %383 = memref.load %arg2[%c63] : memref<98xf32, #tpu.memory_space<smem>>
      %384 = vector.extract_strided_slice %372 {offsets = [0, 2, 0], sizes = [1, 16, 16], strides = [1, 1, 1]} : vector<1x22x16xf32> to vector<1x16x16xf32>
      %385 = vector.broadcast %383 : f32 to vector<1x16x16xf32>
      %386 = arith.mulf %385, %384 : vector<1x16x16xf32>
      %387 = arith.addf %366, %386 : vector<1x16x16xf32>
      %c70 = arith.constant 70 : index
      %388 = memref.load %arg2[%c70] : memref<98xf32, #tpu.memory_space<smem>>
      %389 = vector.extract_strided_slice %372 {offsets = [0, 3, 0], sizes = [1, 16, 16], strides = [1, 1, 1]} : vector<1x22x16xf32> to vector<1x16x16xf32>
      %390 = vector.broadcast %388 : f32 to vector<1x16x16xf32>
      %391 = arith.mulf %390, %389 : vector<1x16x16xf32>
      %392 = arith.addf %371, %391 : vector<1x16x16xf32>
      %c77 = arith.constant 77 : index
      %393 = memref.load %arg2[%c77] : memref<98xf32, #tpu.memory_space<smem>>
      %394 = vector.extract_strided_slice %372 {offsets = [0, 4, 0], sizes = [1, 16, 16], strides = [1, 1, 1]} : vector<1x22x16xf32> to vector<1x16x16xf32>
      %395 = vector.broadcast %393 : f32 to vector<1x16x16xf32>
      %396 = arith.mulf %395, %394 : vector<1x16x16xf32>
      %397 = arith.addf %377, %396 : vector<1x16x16xf32>
      %c84 = arith.constant 84 : index
      %398 = memref.load %arg2[%c84] : memref<98xf32, #tpu.memory_space<smem>>
      %399 = vector.extract_strided_slice %372 {offsets = [0, 5, 0], sizes = [1, 16, 16], strides = [1, 1, 1]} : vector<1x22x16xf32> to vector<1x16x16xf32>
      %400 = vector.broadcast %398 : f32 to vector<1x16x16xf32>
      %401 = arith.mulf %400, %399 : vector<1x16x16xf32>
      %402 = arith.addf %382, %401 : vector<1x16x16xf32>
      %c91 = arith.constant 91 : index
      %403 = memref.load %arg2[%c91] : memref<98xf32, #tpu.memory_space<smem>>
      %404 = vector.extract_strided_slice %372 {offsets = [0, 6, 0], sizes = [1, 16, 16], strides = [1, 1, 1]} : vector<1x22x16xf32> to vector<1x16x16xf32>
      %405 = vector.broadcast %403 : f32 to vector<1x16x16xf32>
      %406 = arith.mulf %405, %404 : vector<1x16x16xf32>
      %407 = arith.addf %387, %406 : vector<1x16x16xf32>
      %408 = vector.extract_strided_slice %115 {offsets = [0, 0, 1], sizes = [1, 22, 16], strides = [1, 1, 1]} : vector<1x22x22xf32> to vector<1x22x16xf32>
      %c50 = arith.constant 50 : index
      %409 = memref.load %arg2[%c50] : memref<98xf32, #tpu.memory_space<smem>>
      %410 = vector.extract_strided_slice %408 {offsets = [0, 0, 0], sizes = [1, 16, 16], strides = [1, 1, 1]} : vector<1x22x16xf32> to vector<1x16x16xf32>
      %411 = vector.broadcast %409 : f32 to vector<1x16x16xf32>
      %412 = arith.mulf %411, %410 : vector<1x16x16xf32>
      %413 = arith.addf %392, %412 : vector<1x16x16xf32>
      %c57 = arith.constant 57 : index
      %414 = memref.load %arg2[%c57] : memref<98xf32, #tpu.memory_space<smem>>
      %415 = vector.extract_strided_slice %408 {offsets = [0, 1, 0], sizes = [1, 16, 16], strides = [1, 1, 1]} : vector<1x22x16xf32> to vector<1x16x16xf32>
      %416 = vector.broadcast %414 : f32 to vector<1x16x16xf32>
      %417 = arith.mulf %416, %415 : vector<1x16x16xf32>
      %418 = arith.addf %397, %417 : vector<1x16x16xf32>
      %c64 = arith.constant 64 : index
      %419 = memref.load %arg2[%c64] : memref<98xf32, #tpu.memory_space<smem>>
      %420 = vector.extract_strided_slice %408 {offsets = [0, 2, 0], sizes = [1, 16, 16], strides = [1, 1, 1]} : vector<1x22x16xf32> to vector<1x16x16xf32>
      %421 = vector.broadcast %419 : f32 to vector<1x16x16xf32>
      %422 = arith.mulf %421, %420 : vector<1x16x16xf32>
      %423 = arith.addf %402, %422 : vector<1x16x16xf32>
      %c71 = arith.constant 71 : index
      %424 = memref.load %arg2[%c71] : memref<98xf32, #tpu.memory_space<smem>>
      %425 = vector.extract_strided_slice %408 {offsets = [0, 3, 0], sizes = [1, 16, 16], strides = [1, 1, 1]} : vector<1x22x16xf32> to vector<1x16x16xf32>
      %426 = vector.broadcast %424 : f32 to vector<1x16x16xf32>
      %427 = arith.mulf %426, %425 : vector<1x16x16xf32>
      %428 = arith.addf %407, %427 : vector<1x16x16xf32>
      %c78 = arith.constant 78 : index
      %429 = memref.load %arg2[%c78] : memref<98xf32, #tpu.memory_space<smem>>
      %430 = vector.extract_strided_slice %408 {offsets = [0, 4, 0], sizes = [1, 16, 16], strides = [1, 1, 1]} : vector<1x22x16xf32> to vector<1x16x16xf32>
      %431 = vector.broadcast %429 : f32 to vector<1x16x16xf32>
      %432 = arith.mulf %431, %430 : vector<1x16x16xf32>
      %433 = arith.addf %413, %432 : vector<1x16x16xf32>
      %c85 = arith.constant 85 : index
      %434 = memref.load %arg2[%c85] : memref<98xf32, #tpu.memory_space<smem>>
      %435 = vector.extract_strided_slice %408 {offsets = [0, 5, 0], sizes = [1, 16, 16], strides = [1, 1, 1]} : vector<1x22x16xf32> to vector<1x16x16xf32>
      %436 = vector.broadcast %434 : f32 to vector<1x16x16xf32>
      %437 = arith.mulf %436, %435 : vector<1x16x16xf32>
      %438 = arith.addf %418, %437 : vector<1x16x16xf32>
      %c92 = arith.constant 92 : index
      %439 = memref.load %arg2[%c92] : memref<98xf32, #tpu.memory_space<smem>>
      %440 = vector.extract_strided_slice %408 {offsets = [0, 6, 0], sizes = [1, 16, 16], strides = [1, 1, 1]} : vector<1x22x16xf32> to vector<1x16x16xf32>
      %441 = vector.broadcast %439 : f32 to vector<1x16x16xf32>
      %442 = arith.mulf %441, %440 : vector<1x16x16xf32>
      %443 = arith.addf %423, %442 : vector<1x16x16xf32>
      %444 = vector.extract_strided_slice %115 {offsets = [0, 0, 2], sizes = [1, 22, 16], strides = [1, 1, 1]} : vector<1x22x22xf32> to vector<1x22x16xf32>
      %c51 = arith.constant 51 : index
      %445 = memref.load %arg2[%c51] : memref<98xf32, #tpu.memory_space<smem>>
      %446 = vector.extract_strided_slice %444 {offsets = [0, 0, 0], sizes = [1, 16, 16], strides = [1, 1, 1]} : vector<1x22x16xf32> to vector<1x16x16xf32>
      %447 = vector.broadcast %445 : f32 to vector<1x16x16xf32>
      %448 = arith.mulf %447, %446 : vector<1x16x16xf32>
      %449 = arith.addf %428, %448 : vector<1x16x16xf32>
      %c58 = arith.constant 58 : index
      %450 = memref.load %arg2[%c58] : memref<98xf32, #tpu.memory_space<smem>>
      %451 = vector.extract_strided_slice %444 {offsets = [0, 1, 0], sizes = [1, 16, 16], strides = [1, 1, 1]} : vector<1x22x16xf32> to vector<1x16x16xf32>
      %452 = vector.broadcast %450 : f32 to vector<1x16x16xf32>
      %453 = arith.mulf %452, %451 : vector<1x16x16xf32>
      %454 = arith.addf %433, %453 : vector<1x16x16xf32>
      %c65 = arith.constant 65 : index
      %455 = memref.load %arg2[%c65] : memref<98xf32, #tpu.memory_space<smem>>
      %456 = vector.extract_strided_slice %444 {offsets = [0, 2, 0], sizes = [1, 16, 16], strides = [1, 1, 1]} : vector<1x22x16xf32> to vector<1x16x16xf32>
      %457 = vector.broadcast %455 : f32 to vector<1x16x16xf32>
      %458 = arith.mulf %457, %456 : vector<1x16x16xf32>
      %459 = arith.addf %438, %458 : vector<1x16x16xf32>
      %c72 = arith.constant 72 : index
      %460 = memref.load %arg2[%c72] : memref<98xf32, #tpu.memory_space<smem>>
      %461 = vector.extract_strided_slice %444 {offsets = [0, 3, 0], sizes = [1, 16, 16], strides = [1, 1, 1]} : vector<1x22x16xf32> to vector<1x16x16xf32>
      %462 = vector.broadcast %460 : f32 to vector<1x16x16xf32>
      %463 = arith.mulf %462, %461 : vector<1x16x16xf32>
      %464 = arith.addf %443, %463 : vector<1x16x16xf32>
      %c79 = arith.constant 79 : index
      %465 = memref.load %arg2[%c79] : memref<98xf32, #tpu.memory_space<smem>>
      %466 = vector.extract_strided_slice %444 {offsets = [0, 4, 0], sizes = [1, 16, 16], strides = [1, 1, 1]} : vector<1x22x16xf32> to vector<1x16x16xf32>
      %467 = vector.broadcast %465 : f32 to vector<1x16x16xf32>
      %468 = arith.mulf %467, %466 : vector<1x16x16xf32>
      %469 = arith.addf %449, %468 : vector<1x16x16xf32>
      %c86 = arith.constant 86 : index
      %470 = memref.load %arg2[%c86] : memref<98xf32, #tpu.memory_space<smem>>
      %471 = vector.extract_strided_slice %444 {offsets = [0, 5, 0], sizes = [1, 16, 16], strides = [1, 1, 1]} : vector<1x22x16xf32> to vector<1x16x16xf32>
      %472 = vector.broadcast %470 : f32 to vector<1x16x16xf32>
      %473 = arith.mulf %472, %471 : vector<1x16x16xf32>
      %474 = arith.addf %454, %473 : vector<1x16x16xf32>
      %c93 = arith.constant 93 : index
      %475 = memref.load %arg2[%c93] : memref<98xf32, #tpu.memory_space<smem>>
      %476 = vector.extract_strided_slice %444 {offsets = [0, 6, 0], sizes = [1, 16, 16], strides = [1, 1, 1]} : vector<1x22x16xf32> to vector<1x16x16xf32>
      %477 = vector.broadcast %475 : f32 to vector<1x16x16xf32>
      %478 = arith.mulf %477, %476 : vector<1x16x16xf32>
      %479 = arith.addf %459, %478 : vector<1x16x16xf32>
      %480 = vector.extract_strided_slice %115 {offsets = [0, 0, 3], sizes = [1, 22, 16], strides = [1, 1, 1]} : vector<1x22x22xf32> to vector<1x22x16xf32>
      %c52 = arith.constant 52 : index
      %481 = memref.load %arg2[%c52] : memref<98xf32, #tpu.memory_space<smem>>
      %482 = vector.extract_strided_slice %480 {offsets = [0, 0, 0], sizes = [1, 16, 16], strides = [1, 1, 1]} : vector<1x22x16xf32> to vector<1x16x16xf32>
      %483 = vector.broadcast %481 : f32 to vector<1x16x16xf32>
      %484 = arith.mulf %483, %482 : vector<1x16x16xf32>
      %485 = arith.addf %464, %484 : vector<1x16x16xf32>
      %c59 = arith.constant 59 : index
      %486 = memref.load %arg2[%c59] : memref<98xf32, #tpu.memory_space<smem>>
      %487 = vector.extract_strided_slice %480 {offsets = [0, 1, 0], sizes = [1, 16, 16], strides = [1, 1, 1]} : vector<1x22x16xf32> to vector<1x16x16xf32>
      %488 = vector.broadcast %486 : f32 to vector<1x16x16xf32>
      %489 = arith.mulf %488, %487 : vector<1x16x16xf32>
      %490 = arith.addf %469, %489 : vector<1x16x16xf32>
      %c66 = arith.constant 66 : index
      %491 = memref.load %arg2[%c66] : memref<98xf32, #tpu.memory_space<smem>>
      %492 = vector.extract_strided_slice %480 {offsets = [0, 2, 0], sizes = [1, 16, 16], strides = [1, 1, 1]} : vector<1x22x16xf32> to vector<1x16x16xf32>
      %493 = vector.broadcast %491 : f32 to vector<1x16x16xf32>
      %494 = arith.mulf %493, %492 : vector<1x16x16xf32>
      %495 = arith.addf %474, %494 : vector<1x16x16xf32>
      %c73 = arith.constant 73 : index
      %496 = memref.load %arg2[%c73] : memref<98xf32, #tpu.memory_space<smem>>
      %497 = vector.extract_strided_slice %480 {offsets = [0, 3, 0], sizes = [1, 16, 16], strides = [1, 1, 1]} : vector<1x22x16xf32> to vector<1x16x16xf32>
      %498 = vector.broadcast %496 : f32 to vector<1x16x16xf32>
      %499 = arith.mulf %498, %497 : vector<1x16x16xf32>
      %500 = arith.addf %479, %499 : vector<1x16x16xf32>
      %c80 = arith.constant 80 : index
      %501 = memref.load %arg2[%c80] : memref<98xf32, #tpu.memory_space<smem>>
      %502 = vector.extract_strided_slice %480 {offsets = [0, 4, 0], sizes = [1, 16, 16], strides = [1, 1, 1]} : vector<1x22x16xf32> to vector<1x16x16xf32>
      %503 = vector.broadcast %501 : f32 to vector<1x16x16xf32>
      %504 = arith.mulf %503, %502 : vector<1x16x16xf32>
      %505 = arith.addf %485, %504 : vector<1x16x16xf32>
      %c87 = arith.constant 87 : index
      %506 = memref.load %arg2[%c87] : memref<98xf32, #tpu.memory_space<smem>>
      %507 = vector.extract_strided_slice %480 {offsets = [0, 5, 0], sizes = [1, 16, 16], strides = [1, 1, 1]} : vector<1x22x16xf32> to vector<1x16x16xf32>
      %508 = vector.broadcast %506 : f32 to vector<1x16x16xf32>
      %509 = arith.mulf %508, %507 : vector<1x16x16xf32>
      %510 = arith.addf %490, %509 : vector<1x16x16xf32>
      %c94 = arith.constant 94 : index
      %511 = memref.load %arg2[%c94] : memref<98xf32, #tpu.memory_space<smem>>
      %512 = vector.extract_strided_slice %480 {offsets = [0, 6, 0], sizes = [1, 16, 16], strides = [1, 1, 1]} : vector<1x22x16xf32> to vector<1x16x16xf32>
      %513 = vector.broadcast %511 : f32 to vector<1x16x16xf32>
      %514 = arith.mulf %513, %512 : vector<1x16x16xf32>
      %515 = arith.addf %495, %514 : vector<1x16x16xf32>
      %516 = vector.extract_strided_slice %115 {offsets = [0, 0, 4], sizes = [1, 22, 16], strides = [1, 1, 1]} : vector<1x22x22xf32> to vector<1x22x16xf32>
      %c53 = arith.constant 53 : index
      %517 = memref.load %arg2[%c53] : memref<98xf32, #tpu.memory_space<smem>>
      %518 = vector.extract_strided_slice %516 {offsets = [0, 0, 0], sizes = [1, 16, 16], strides = [1, 1, 1]} : vector<1x22x16xf32> to vector<1x16x16xf32>
      %519 = vector.broadcast %517 : f32 to vector<1x16x16xf32>
      %520 = arith.mulf %519, %518 : vector<1x16x16xf32>
      %521 = arith.addf %500, %520 : vector<1x16x16xf32>
      %c60 = arith.constant 60 : index
      %522 = memref.load %arg2[%c60] : memref<98xf32, #tpu.memory_space<smem>>
      %523 = vector.extract_strided_slice %516 {offsets = [0, 1, 0], sizes = [1, 16, 16], strides = [1, 1, 1]} : vector<1x22x16xf32> to vector<1x16x16xf32>
      %524 = vector.broadcast %522 : f32 to vector<1x16x16xf32>
      %525 = arith.mulf %524, %523 : vector<1x16x16xf32>
      %526 = arith.addf %505, %525 : vector<1x16x16xf32>
      %c67 = arith.constant 67 : index
      %527 = memref.load %arg2[%c67] : memref<98xf32, #tpu.memory_space<smem>>
      %528 = vector.extract_strided_slice %516 {offsets = [0, 2, 0], sizes = [1, 16, 16], strides = [1, 1, 1]} : vector<1x22x16xf32> to vector<1x16x16xf32>
      %529 = vector.broadcast %527 : f32 to vector<1x16x16xf32>
      %530 = arith.mulf %529, %528 : vector<1x16x16xf32>
      %531 = arith.addf %510, %530 : vector<1x16x16xf32>
      %c74 = arith.constant 74 : index
      %532 = memref.load %arg2[%c74] : memref<98xf32, #tpu.memory_space<smem>>
      %533 = vector.extract_strided_slice %516 {offsets = [0, 3, 0], sizes = [1, 16, 16], strides = [1, 1, 1]} : vector<1x22x16xf32> to vector<1x16x16xf32>
      %534 = vector.broadcast %532 : f32 to vector<1x16x16xf32>
      %535 = arith.mulf %534, %533 : vector<1x16x16xf32>
      %536 = arith.addf %515, %535 : vector<1x16x16xf32>
      %c81 = arith.constant 81 : index
      %537 = memref.load %arg2[%c81] : memref<98xf32, #tpu.memory_space<smem>>
      %538 = vector.extract_strided_slice %516 {offsets = [0, 4, 0], sizes = [1, 16, 16], strides = [1, 1, 1]} : vector<1x22x16xf32> to vector<1x16x16xf32>
      %539 = vector.broadcast %537 : f32 to vector<1x16x16xf32>
      %540 = arith.mulf %539, %538 : vector<1x16x16xf32>
      %541 = arith.addf %521, %540 : vector<1x16x16xf32>
      %c88 = arith.constant 88 : index
      %542 = memref.load %arg2[%c88] : memref<98xf32, #tpu.memory_space<smem>>
      %543 = vector.extract_strided_slice %516 {offsets = [0, 5, 0], sizes = [1, 16, 16], strides = [1, 1, 1]} : vector<1x22x16xf32> to vector<1x16x16xf32>
      %544 = vector.broadcast %542 : f32 to vector<1x16x16xf32>
      %545 = arith.mulf %544, %543 : vector<1x16x16xf32>
      %546 = arith.addf %526, %545 : vector<1x16x16xf32>
      %c95 = arith.constant 95 : index
      %547 = memref.load %arg2[%c95] : memref<98xf32, #tpu.memory_space<smem>>
      %548 = vector.extract_strided_slice %516 {offsets = [0, 6, 0], sizes = [1, 16, 16], strides = [1, 1, 1]} : vector<1x22x16xf32> to vector<1x16x16xf32>
      %549 = vector.broadcast %547 : f32 to vector<1x16x16xf32>
      %550 = arith.mulf %549, %548 : vector<1x16x16xf32>
      %551 = arith.addf %531, %550 : vector<1x16x16xf32>
      %552 = vector.extract_strided_slice %115 {offsets = [0, 0, 5], sizes = [1, 22, 16], strides = [1, 1, 1]} : vector<1x22x22xf32> to vector<1x22x16xf32>
      %c54 = arith.constant 54 : index
      %553 = memref.load %arg2[%c54] : memref<98xf32, #tpu.memory_space<smem>>
      %554 = vector.extract_strided_slice %552 {offsets = [0, 0, 0], sizes = [1, 16, 16], strides = [1, 1, 1]} : vector<1x22x16xf32> to vector<1x16x16xf32>
      %555 = vector.broadcast %553 : f32 to vector<1x16x16xf32>
      %556 = arith.mulf %555, %554 : vector<1x16x16xf32>
      %557 = arith.addf %536, %556 : vector<1x16x16xf32>
      %c61 = arith.constant 61 : index
      %558 = memref.load %arg2[%c61] : memref<98xf32, #tpu.memory_space<smem>>
      %559 = vector.extract_strided_slice %552 {offsets = [0, 1, 0], sizes = [1, 16, 16], strides = [1, 1, 1]} : vector<1x22x16xf32> to vector<1x16x16xf32>
      %560 = vector.broadcast %558 : f32 to vector<1x16x16xf32>
      %561 = arith.mulf %560, %559 : vector<1x16x16xf32>
      %562 = arith.addf %541, %561 : vector<1x16x16xf32>
      %c68 = arith.constant 68 : index
      %563 = memref.load %arg2[%c68] : memref<98xf32, #tpu.memory_space<smem>>
      %564 = vector.extract_strided_slice %552 {offsets = [0, 2, 0], sizes = [1, 16, 16], strides = [1, 1, 1]} : vector<1x22x16xf32> to vector<1x16x16xf32>
      %565 = vector.broadcast %563 : f32 to vector<1x16x16xf32>
      %566 = arith.mulf %565, %564 : vector<1x16x16xf32>
      %567 = arith.addf %546, %566 : vector<1x16x16xf32>
      %c75 = arith.constant 75 : index
      %568 = memref.load %arg2[%c75] : memref<98xf32, #tpu.memory_space<smem>>
      %569 = vector.extract_strided_slice %552 {offsets = [0, 3, 0], sizes = [1, 16, 16], strides = [1, 1, 1]} : vector<1x22x16xf32> to vector<1x16x16xf32>
      %570 = vector.broadcast %568 : f32 to vector<1x16x16xf32>
      %571 = arith.mulf %570, %569 : vector<1x16x16xf32>
      %572 = arith.addf %551, %571 : vector<1x16x16xf32>
      %c82 = arith.constant 82 : index
      %573 = memref.load %arg2[%c82] : memref<98xf32, #tpu.memory_space<smem>>
      %574 = vector.extract_strided_slice %552 {offsets = [0, 4, 0], sizes = [1, 16, 16], strides = [1, 1, 1]} : vector<1x22x16xf32> to vector<1x16x16xf32>
      %575 = vector.broadcast %573 : f32 to vector<1x16x16xf32>
      %576 = arith.mulf %575, %574 : vector<1x16x16xf32>
      %577 = arith.addf %557, %576 : vector<1x16x16xf32>
      %c89 = arith.constant 89 : index
      %578 = memref.load %arg2[%c89] : memref<98xf32, #tpu.memory_space<smem>>
      %579 = vector.extract_strided_slice %552 {offsets = [0, 5, 0], sizes = [1, 16, 16], strides = [1, 1, 1]} : vector<1x22x16xf32> to vector<1x16x16xf32>
      %580 = vector.broadcast %578 : f32 to vector<1x16x16xf32>
      %581 = arith.mulf %580, %579 : vector<1x16x16xf32>
      %582 = arith.addf %562, %581 : vector<1x16x16xf32>
      %c96 = arith.constant 96 : index
      %583 = memref.load %arg2[%c96] : memref<98xf32, #tpu.memory_space<smem>>
      %584 = vector.extract_strided_slice %552 {offsets = [0, 6, 0], sizes = [1, 16, 16], strides = [1, 1, 1]} : vector<1x22x16xf32> to vector<1x16x16xf32>
      %585 = vector.broadcast %583 : f32 to vector<1x16x16xf32>
      %586 = arith.mulf %585, %584 : vector<1x16x16xf32>
      %587 = arith.addf %567, %586 : vector<1x16x16xf32>
      %588 = vector.extract_strided_slice %115 {offsets = [0, 0, 6], sizes = [1, 22, 16], strides = [1, 1, 1]} : vector<1x22x22xf32> to vector<1x22x16xf32>
      %c55 = arith.constant 55 : index
      %589 = memref.load %arg2[%c55] : memref<98xf32, #tpu.memory_space<smem>>
      %590 = vector.extract_strided_slice %588 {offsets = [0, 0, 0], sizes = [1, 16, 16], strides = [1, 1, 1]} : vector<1x22x16xf32> to vector<1x16x16xf32>
      %591 = vector.broadcast %589 : f32 to vector<1x16x16xf32>
      %592 = arith.mulf %591, %590 : vector<1x16x16xf32>
      %593 = arith.addf %572, %592 : vector<1x16x16xf32>
      %c62 = arith.constant 62 : index
      %594 = memref.load %arg2[%c62] : memref<98xf32, #tpu.memory_space<smem>>
      %595 = vector.extract_strided_slice %588 {offsets = [0, 1, 0], sizes = [1, 16, 16], strides = [1, 1, 1]} : vector<1x22x16xf32> to vector<1x16x16xf32>
      %596 = vector.broadcast %594 : f32 to vector<1x16x16xf32>
      %597 = arith.mulf %596, %595 : vector<1x16x16xf32>
      %598 = arith.addf %577, %597 : vector<1x16x16xf32>
      %c69 = arith.constant 69 : index
      %599 = memref.load %arg2[%c69] : memref<98xf32, #tpu.memory_space<smem>>
      %600 = vector.extract_strided_slice %588 {offsets = [0, 2, 0], sizes = [1, 16, 16], strides = [1, 1, 1]} : vector<1x22x16xf32> to vector<1x16x16xf32>
      %601 = vector.broadcast %599 : f32 to vector<1x16x16xf32>
      %602 = arith.mulf %601, %600 : vector<1x16x16xf32>
      %603 = arith.addf %582, %602 : vector<1x16x16xf32>
      %c76 = arith.constant 76 : index
      %604 = memref.load %arg2[%c76] : memref<98xf32, #tpu.memory_space<smem>>
      %605 = vector.extract_strided_slice %588 {offsets = [0, 3, 0], sizes = [1, 16, 16], strides = [1, 1, 1]} : vector<1x22x16xf32> to vector<1x16x16xf32>
      %606 = vector.broadcast %604 : f32 to vector<1x16x16xf32>
      %607 = arith.mulf %606, %605 : vector<1x16x16xf32>
      %608 = arith.addf %587, %607 : vector<1x16x16xf32>
      %c83 = arith.constant 83 : index
      %609 = memref.load %arg2[%c83] : memref<98xf32, #tpu.memory_space<smem>>
      %610 = vector.extract_strided_slice %588 {offsets = [0, 4, 0], sizes = [1, 16, 16], strides = [1, 1, 1]} : vector<1x22x16xf32> to vector<1x16x16xf32>
      %611 = vector.broadcast %609 : f32 to vector<1x16x16xf32>
      %612 = arith.mulf %611, %610 : vector<1x16x16xf32>
      %613 = arith.addf %593, %612 : vector<1x16x16xf32>
      %c90 = arith.constant 90 : index
      %614 = memref.load %arg2[%c90] : memref<98xf32, #tpu.memory_space<smem>>
      %615 = vector.extract_strided_slice %588 {offsets = [0, 5, 0], sizes = [1, 16, 16], strides = [1, 1, 1]} : vector<1x22x16xf32> to vector<1x16x16xf32>
      %616 = vector.broadcast %614 : f32 to vector<1x16x16xf32>
      %617 = arith.mulf %616, %615 : vector<1x16x16xf32>
      %618 = arith.addf %598, %617 : vector<1x16x16xf32>
      %c97 = arith.constant 97 : index
      %619 = memref.load %arg2[%c97] : memref<98xf32, #tpu.memory_space<smem>>
      %620 = vector.extract_strided_slice %588 {offsets = [0, 6, 0], sizes = [1, 16, 16], strides = [1, 1, 1]} : vector<1x22x16xf32> to vector<1x16x16xf32>
      %621 = vector.broadcast %619 : f32 to vector<1x16x16xf32>
      %622 = arith.mulf %621, %620 : vector<1x16x16xf32>
      %623 = arith.addf %603, %622 : vector<1x16x16xf32>
      %624 = arith.addf %618, %623 : vector<1x16x16xf32>
      %625 = arith.addf %608, %613 : vector<1x16x16xf32>
      %626 = arith.addf %624, %625 : vector<1x16x16xf32>
      %627 = arith.negf %626 : vector<1x16x16xf32>
      %628 = math.exp %627 : vector<1x16x16xf32>
      %cst_127 = arith.constant 1.000000e+00 : f32
      %629 = vector.broadcast %cst_127 : f32 to vector<1x16x16xf32>
      %630 = arith.addf %629, %628 : vector<1x16x16xf32>
      %631 = arith.divf %629, %630 : vector<1x16x16xf32>
      %632 = vector.extract_strided_slice %631 {offsets = [0, 0, 0], sizes = [1, 1, 16], strides = [1, 1, 1]} : vector<1x16x16xf32> to vector<1x1x16xf32>
      %c0_128 = arith.constant 0 : index
      %c0_129 = arith.constant 0 : index
      %c0_130 = arith.constant 0 : index
      %633 = vector.load %arg4[%c0_128, %c0_129, %c0_130] : memref<1x1x256xf32, #tpu.memory_space<vmem>>, vector<1x1x16xf32>
      tpu.vector_store %arg4[%c0_128, %c0_129, %c0_130], %632 {strides = array<i32>} : memref<1x1x256xf32, #tpu.memory_space<vmem>>, vector<1x1x16xf32>,
      %634 = vector.extract_strided_slice %631 {offsets = [0, 1, 0], sizes = [1, 1, 16], strides = [1, 1, 1]} : vector<1x16x16xf32> to vector<1x1x16xf32>
      %c0_131 = arith.constant 0 : index
      %c0_132 = arith.constant 0 : index
      %c16_133 = arith.constant 16 : index
      %635 = vector.load %arg4[%c0_131, %c0_132, %c16_133] : memref<1x1x256xf32, #tpu.memory_space<vmem>>, vector<1x1x16xf32>
      tpu.vector_store %arg4[%c0_131, %c0_132, %c16_133], %634 {strides = array<i32>} : memref<1x1x256xf32, #tpu.memory_space<vmem>>, vector<1x1x16xf32>,
      %636 = vector.extract_strided_slice %631 {offsets = [0, 2, 0], sizes = [1, 1, 16], strides = [1, 1, 1]} : vector<1x16x16xf32> to vector<1x1x16xf32>
      %c0_134 = arith.constant 0 : index
      %c0_135 = arith.constant 0 : index
      %c32_136 = arith.constant 32 : index
      %637 = vector.load %arg4[%c0_134, %c0_135, %c32_136] : memref<1x1x256xf32, #tpu.memory_space<vmem>>, vector<1x1x16xf32>
      tpu.vector_store %arg4[%c0_134, %c0_135, %c32_136], %636 {strides = array<i32>} : memref<1x1x256xf32, #tpu.memory_space<vmem>>, vector<1x1x16xf32>,
      %638 = vector.extract_strided_slice %631 {offsets = [0, 3, 0], sizes = [1, 1, 16], strides = [1, 1, 1]} : vector<1x16x16xf32> to vector<1x1x16xf32>
      %c0_137 = arith.constant 0 : index
      %c0_138 = arith.constant 0 : index
      %c48_139 = arith.constant 48 : index
      %639 = vector.load %arg4[%c0_137, %c0_138, %c48_139] : memref<1x1x256xf32, #tpu.memory_space<vmem>>, vector<1x1x16xf32>
      tpu.vector_store %arg4[%c0_137, %c0_138, %c48_139], %638 {strides = array<i32>} : memref<1x1x256xf32, #tpu.memory_space<vmem>>, vector<1x1x16xf32>,
      %640 = vector.extract_strided_slice %631 {offsets = [0, 4, 0], sizes = [1, 1, 16], strides = [1, 1, 1]} : vector<1x16x16xf32> to vector<1x1x16xf32>
      %c0_140 = arith.constant 0 : index
      %c0_141 = arith.constant 0 : index
      %c64_142 = arith.constant 64 : index
      %641 = vector.load %arg4[%c0_140, %c0_141, %c64_142] : memref<1x1x256xf32, #tpu.memory_space<vmem>>, vector<1x1x16xf32>
      tpu.vector_store %arg4[%c0_140, %c0_141, %c64_142], %640 {strides = array<i32>} : memref<1x1x256xf32, #tpu.memory_space<vmem>>, vector<1x1x16xf32>,
      %642 = vector.extract_strided_slice %631 {offsets = [0, 5, 0], sizes = [1, 1, 16], strides = [1, 1, 1]} : vector<1x16x16xf32> to vector<1x1x16xf32>
      %c0_143 = arith.constant 0 : index
      %c0_144 = arith.constant 0 : index
      %c80_145 = arith.constant 80 : index
      %643 = vector.load %arg4[%c0_143, %c0_144, %c80_145] : memref<1x1x256xf32, #tpu.memory_space<vmem>>, vector<1x1x16xf32>
      tpu.vector_store %arg4[%c0_143, %c0_144, %c80_145], %642 {strides = array<i32>} : memref<1x1x256xf32, #tpu.memory_space<vmem>>, vector<1x1x16xf32>,
      %644 = vector.extract_strided_slice %631 {offsets = [0, 6, 0], sizes = [1, 1, 16], strides = [1, 1, 1]} : vector<1x16x16xf32> to vector<1x1x16xf32>
      %c0_146 = arith.constant 0 : index
      %c0_147 = arith.constant 0 : index
      %c96_148 = arith.constant 96 : index
      %645 = vector.load %arg4[%c0_146, %c0_147, %c96_148] : memref<1x1x256xf32, #tpu.memory_space<vmem>>, vector<1x1x16xf32>
      tpu.vector_store %arg4[%c0_146, %c0_147, %c96_148], %644 {strides = array<i32>} : memref<1x1x256xf32, #tpu.memory_space<vmem>>, vector<1x1x16xf32>,
      %646 = vector.extract_strided_slice %631 {offsets = [0, 7, 0], sizes = [1, 1, 16], strides = [1, 1, 1]} : vector<1x16x16xf32> to vector<1x1x16xf32>
      %c0_149 = arith.constant 0 : index
      %c0_150 = arith.constant 0 : index
      %c112 = arith.constant 112 : index
      %647 = vector.load %arg4[%c0_149, %c0_150, %c112] : memref<1x1x256xf32, #tpu.memory_space<vmem>>, vector<1x1x16xf32>
      tpu.vector_store %arg4[%c0_149, %c0_150, %c112], %646 {strides = array<i32>} : memref<1x1x256xf32, #tpu.memory_space<vmem>>, vector<1x1x16xf32>,
      %648 = vector.extract_strided_slice %631 {offsets = [0, 8, 0], sizes = [1, 1, 16], strides = [1, 1, 1]} : vector<1x16x16xf32> to vector<1x1x16xf32>
      %c0_151 = arith.constant 0 : index
      %c0_152 = arith.constant 0 : index
      %c128 = arith.constant 128 : index
      %649 = vector.load %arg4[%c0_151, %c0_152, %c128] : memref<1x1x256xf32, #tpu.memory_space<vmem>>, vector<1x1x16xf32>
      tpu.vector_store %arg4[%c0_151, %c0_152, %c128], %648 {strides = array<i32>} : memref<1x1x256xf32, #tpu.memory_space<vmem>>, vector<1x1x16xf32>,
      %650 = vector.extract_strided_slice %631 {offsets = [0, 9, 0], sizes = [1, 1, 16], strides = [1, 1, 1]} : vector<1x16x16xf32> to vector<1x1x16xf32>
      %c0_153 = arith.constant 0 : index
      %c0_154 = arith.constant 0 : index
      %c144 = arith.constant 144 : index
      %651 = vector.load %arg4[%c0_153, %c0_154, %c144] : memref<1x1x256xf32, #tpu.memory_space<vmem>>, vector<1x1x16xf32>
      tpu.vector_store %arg4[%c0_153, %c0_154, %c144], %650 {strides = array<i32>} : memref<1x1x256xf32, #tpu.memory_space<vmem>>, vector<1x1x16xf32>,
      %652 = vector.extract_strided_slice %631 {offsets = [0, 10, 0], sizes = [1, 1, 16], strides = [1, 1, 1]} : vector<1x16x16xf32> to vector<1x1x16xf32>
      %c0_155 = arith.constant 0 : index
      %c0_156 = arith.constant 0 : index
      %c160 = arith.constant 160 : index
      %653 = vector.load %arg4[%c0_155, %c0_156, %c160] : memref<1x1x256xf32, #tpu.memory_space<vmem>>, vector<1x1x16xf32>
      tpu.vector_store %arg4[%c0_155, %c0_156, %c160], %652 {strides = array<i32>} : memref<1x1x256xf32, #tpu.memory_space<vmem>>, vector<1x1x16xf32>,
      %654 = vector.extract_strided_slice %631 {offsets = [0, 11, 0], sizes = [1, 1, 16], strides = [1, 1, 1]} : vector<1x16x16xf32> to vector<1x1x16xf32>
      %c0_157 = arith.constant 0 : index
      %c0_158 = arith.constant 0 : index
      %c176 = arith.constant 176 : index
      %655 = vector.load %arg4[%c0_157, %c0_158, %c176] : memref<1x1x256xf32, #tpu.memory_space<vmem>>, vector<1x1x16xf32>
      tpu.vector_store %arg4[%c0_157, %c0_158, %c176], %654 {strides = array<i32>} : memref<1x1x256xf32, #tpu.memory_space<vmem>>, vector<1x1x16xf32>,
      %656 = vector.extract_strided_slice %631 {offsets = [0, 12, 0], sizes = [1, 1, 16], strides = [1, 1, 1]} : vector<1x16x16xf32> to vector<1x1x16xf32>
      %c0_159 = arith.constant 0 : index
      %c0_160 = arith.constant 0 : index
      %c192 = arith.constant 192 : index
      %657 = vector.load %arg4[%c0_159, %c0_160, %c192] : memref<1x1x256xf32, #tpu.memory_space<vmem>>, vector<1x1x16xf32>
      tpu.vector_store %arg4[%c0_159, %c0_160, %c192], %656 {strides = array<i32>} : memref<1x1x256xf32, #tpu.memory_space<vmem>>, vector<1x1x16xf32>,
      %658 = vector.extract_strided_slice %631 {offsets = [0, 13, 0], sizes = [1, 1, 16], strides = [1, 1, 1]} : vector<1x16x16xf32> to vector<1x1x16xf32>
      %c0_161 = arith.constant 0 : index
      %c0_162 = arith.constant 0 : index
      %c208 = arith.constant 208 : index
      %659 = vector.load %arg4[%c0_161, %c0_162, %c208] : memref<1x1x256xf32, #tpu.memory_space<vmem>>, vector<1x1x16xf32>
      tpu.vector_store %arg4[%c0_161, %c0_162, %c208], %658 {strides = array<i32>} : memref<1x1x256xf32, #tpu.memory_space<vmem>>, vector<1x1x16xf32>,
      %660 = vector.extract_strided_slice %631 {offsets = [0, 14, 0], sizes = [1, 1, 16], strides = [1, 1, 1]} : vector<1x16x16xf32> to vector<1x1x16xf32>
      %c0_163 = arith.constant 0 : index
      %c0_164 = arith.constant 0 : index
      %c224 = arith.constant 224 : index
      %661 = vector.load %arg4[%c0_163, %c0_164, %c224] : memref<1x1x256xf32, #tpu.memory_space<vmem>>, vector<1x1x16xf32>
      tpu.vector_store %arg4[%c0_163, %c0_164, %c224], %660 {strides = array<i32>} : memref<1x1x256xf32, #tpu.memory_space<vmem>>, vector<1x1x16xf32>,
      %662 = vector.extract_strided_slice %631 {offsets = [0, 15, 0], sizes = [1, 1, 16], strides = [1, 1, 1]} : vector<1x16x16xf32> to vector<1x1x16xf32>
      %c0_165 = arith.constant 0 : index
      %c0_166 = arith.constant 0 : index
      %c240 = arith.constant 240 : index
      %663 = vector.load %arg4[%c0_165, %c0_166, %c240] : memref<1x1x256xf32, #tpu.memory_space<vmem>>, vector<1x1x16xf32>
      tpu.vector_store %arg4[%c0_165, %c0_166, %c240], %662 {strides = array<i32>} : memref<1x1x256xf32, #tpu.memory_space<vmem>>, vector<1x1x16xf32>,
    } else {
    }
    return
  }
  func.func @transform_0(%arg0: i32, %arg1: i32) -> i32 {
    %c0_i32 = arith.constant 0 : i32
    %c0_i32_0 = arith.constant 0 : i32
    return %c0_i32 : i32
  }
  func.func @transform_1(%arg0: i32, %arg1: i32) -> (i32, i32, i32) {
    %c0_i32 = arith.constant 0 : i32
    %c0_i32_0 = arith.constant 0 : i32
    return %arg0, %arg1, %c0_i32 : i32, i32, i32
  }
  func.func @transform_2(%arg0: i32, %arg1: i32) -> (i32, i32, i32) {
    %c0_i32 = arith.constant 0 : i32
    %c0_i32_0 = arith.constant 0 : i32
    %c0_i32_1 = arith.constant 0 : i32
    return %arg0, %c0_i32, %c0_i32_0 : i32, i32, i32
  }
}

</mosaic_0001>

<bundles_post_ra>
// kernel: tpu_custom_call.1
= control target key start
LH: loop header
LB: loop body
LE: loop exit
PB: predicated region body
PF: predicated region fallthrough
CT: control target
= control target key end

     0   :  { %s6796_s0 = inlined_call_operand.hbm [shape: f32[98], index: 0, kind: input, shape index: {}]   ;;  %s6797_s1 = inlined_call_operand.hbm [shape: f32[2,4,256], index: 1, kind: input, shape index: {}]   ;;  %s6798_s2 = inlined_call_operand.hbm [shape: f32[2,1,256], index: 2, kind: output, shape index: {}]  }
   0x1   :  { %7029 = sst [smem:[#allocation197_spill]] %s6796_s0 }
   0x2   :  { %7030 = sst [smem:[#allocation198_spill]] %s6797_s1 }
   0x3   :  { %7031 = sst [smem:[#allocation199_spill]] %s6798_s2 }
   0x4   :  { %7 = vsyncpa [#allocation9], 0 }
   0x5   :  { %8 = vsyncpa [#allocation7], 0 }
   0x6   :  { %10 = vsyncpa [#allocation7 + $0x1], 0 }
   0x7   :  { %11 = vsyncpa [#allocation8], 0 }
   0x8   :  { %13 = vsyncpa [#allocation8 + $0x1], 0  ;;  %s3453_s9 = smov 0   ;;  %s3455_s10 = smov 0  }
   0x9   :  { %s3457_s11 = smov 0   ;;  %s3459_s12 = smov 0  }
   0xa   :  { %s3461_s13 = smov 0   ;;  %s3463_s14 = smov 0  }
   0xb LB: > { %7032 = sst [smem:[#allocation15_spill]] %s3390_s9  ;;  %s3052_s15 = sadd.s32 4294967295, %s3410_s14   ;;  %s3410_s14 = sphi %s3463_s14, %s19_s14   ;;  %s3406_s13 = sphi %s3461_s13, %s7948_s13   ;;  %s3402_s12 = sphi %s3459_s12, %s7947_s12   ;;  %s3398_s11 = sphi %s3457_s11, %s7946_s11   ;;  %s3394_s10 = sphi %s3455_s10, %s7945_s10   ;;  %s3390_s9 = sphi %s3453_s9, %s7944_s9  }
   0xc   : > { %7033 = sst [smem:[#allocation16_spill]] %s3394_s10  ;;  %s3053_s16 = sadd.s32 4294967294, %s3410_s14  }
   0xd   : > { %7034 = sst [smem:[#allocation17_spill]] %s3398_s11  ;;  %p74_p0 = scmp.ne.s32.totalorder %s3394_s10, %s3390_s9 }
   0xe   : > { %7035 = sst [smem:[#allocation18_spill]] %s3402_s12  ;;  %p3487_p1 = scmp.eq.s32.totalorder %s3052_s15, 0 }
   0xf   : > { %7036 = sst [smem:[#allocation19_spill]] %s3406_s13  ;;  %p3491_p2 = scmp.eq.s32.totalorder %s3052_s15, 1 }
  0x10   : > { %7037 = sst [smem:[#allocation20_spill]] %s3410_s14  ;;  %p104_p3 = scmp.eq.s32.totalorder %s3053_s16, 1 }
  0x11   : > { %s7038_s17 = scalar_select %p3487_p1, 1, 0 }
  0x12   : > { %p3497_p4 = por %p3487_p1, %p74_p0  ;;  %p3054_p5 = scmp.ge.s32.totalorder %s3410_s14, 1 }
  0x13   : > { %p3502_p6 = por %p104_p3, %p74_p0  ;;  %p111_p7 = scmp.lt.s32.totalorder %s3410_s14, 3 }
  0x14   : > { %s7040_s19 = scalar_select %p3497_p4, 1, 0 }
  0x15   : > { %s7041_s20 = scalar_select %p3502_p6, 1, 0 }
  0x16   : > { %p3507_p8 = pnand %p3054_p5, %p111_p7  ;;  %s31_s22 = sadd.s32 1, %s3406_s13 }
  0x17   : > { %7042 = sst [smem:[#allocation21_spill]] %s7041_s20  ;;  %p3521_p12 = scmp.ge.s32.totalorder %s31_s22, 2 }
  0x18   : > { %p3178_p10 = pneg %p3507_p8  ;;  %s61_s25 = sadd.s32 1, %s3398_s11 }
  0x19   : > { %p68_p13 = scmp.ne.s32.totalorder %s3398_s11, %s3394_s10  ;;  %p69_p0 = scmp.eq.s32.totalorder %s3410_s14, 0 }
  0x1a   : > { %p3517_p11 = pnand %p3178_p10, %p3487_p1  ;;  %s7046_s0 = sld [smem:[#allocation197_spill]] }
  0x1c   : > { %p3283_p5 = pneg %p3517_p11 }
  0x20   : > { %s3281_s28 = scalar_lea.hbm %s7046_s0, 16 }
  0x21   : > { %p3282_p3 = scmp.ne.s32.totalorder %s7046_s0, %s3281_s28  ;;  %p3288_p9 = scmp.lt.u32.totalorder %s3281_s28, %s7046_s0 }
  0x23   : > { %p3284_p7 = pnand %p3283_p5, %p3282_p3 }
  0x25   : > { %p3285_p10 = pneg %p3284_p7 }
  0x27   : > { %p3290_p6 = pnand %p3288_p9, %p3285_p10 }
  0x29   : > { %3293 = shalt.err (!%p3290_p6)
}
  0x2a   : > { %s3412_s5 = smov [#allocation6]   ;;  %s7950_s22 = smov (%p3521_p12, %s31_s22), 0 }
  0x2b   : > { %3181 = dma.hbm_to_smem (!%p3517_p11), %s7046_s0, 16, %s3412_s5, [#allocation9]  }
  0x2c   : > { %7047 = sst [smem:[#allocation22_spill]] %s7950_s22  ;;  %p3552_p6 = por %p69_p0, %p68_p13 }
  0x2d   : > { %p3561_p9 = por %p3491_p2, %p68_p13  ;;  %s56_s16 = ssub.s32 %s3406_s13, %s7950_s22 }
  0x2e   : > { %p3191_p3 = scmp.lt.s32.totalorder %s3410_s14, 2  ;;  %p59_p5 = scmp.eq.s32.totalorder %s56_s16, 0 }
  0x2f   : > { %s7049_s15 = scalar_select %p3561_p9, 1, 0 }
  0x30   : > { %s133_s23 = sand.u32 1, %s3398_s11   ;;  %s3168_s27 = sshll.u32 %s3406_s13, 7 }
  0x31   : > { %7050 = sst [smem:[#allocation23_spill]] %s7049_s15  ;;  %s3057_s24 = sshll.u32 %s133_s23, 3 }
  0x32   : > { %s3570_s26 = scalar_select %p59_p5, %s3398_s11, %s61_s25  }
  0x33   : > { %s7052_s1 = sld [smem:[#allocation198_spill]]  ;;  %s137_s18 = scalar_lea.vmem [#allocation10], %s3057_s24 }
  0x34   : > { %7051 = sst [smem:[#allocation24_spill]] %s3570_s26  ;;  %s147_s3 = sshll.u32 %s137_s18, 4  ;;  %s3578_s3 = int_to_ptr.vmem [resolvable:$true] %s147_s3 }
  0x35   : > { %p3582_p2 = pnand %p3191_p3, %p3552_p6  ;;  %s134_s25 = scalar_lea.sflag [#allocation7], %s133_s23 }
  0x37   : > { %p3296_p12 = pneg %p3582_p2 }
  0x39   : > { %s3576_s30 = scalar_lea.hbm %s7052_s1, %s3168_s27  ;;  %s3299_s16 = scalar_lea.hbm %s7052_s1, 256 }
  0x3a   : > { %s3294_s5 = scalar_lea.hbm %s3576_s30, 128  ;;  %p3300_p7 = scmp.lt.u32.totalorder %s3576_s30, %s7052_s1 }
  0x3b   : > { %p3295_p11 = scmp.ne.s32.totalorder %s3576_s30, %s3294_s5  ;;  %p3301_p10 = scmp.lt.u32.totalorder %s3299_s16, %s3294_s5 }
  0x3c   : > { %p3303_p3 = scmp.lt.u32.totalorder %s3294_s5, %s3576_s30 }
  0x3d   : > { %p3297_p13 = pnand %p3296_p12, %p3295_p11  ;;  %p3302_p6 = por %p3301_p10, %p3300_p7 }
  0x3f   : > { %p3298_p0 = pneg %p3297_p13  ;;  %p3304_p5 = por %p3303_p3, %p3302_p6 }
  0x41   : > { %p3305_p9 = pnand %p3304_p5, %p3298_p0 }
  0x43   : > { %3308 = shalt.err (!%p3305_p9)
}
  0x44   : > { %s3309_s23 = scalar_lea.vmem %s3578_s3, 128  ;;  %s3413_s27 = smov [#allocation10]  }
  0x45   : > { %p3310_p11 = scmp.ne.s32.totalorder %s3578_s3, %s3309_s23  ;;  %s3314_s28 = sshll.u32 %s3413_s27, 4  ;;  %s3315_s28 = int_to_ptr.vmem [resolvable:$false] %s3314_s28 }
  0x46   : > { %s3316_s29 = scalar_lea.vmem %s3315_s28, 256  ;;  %p3317_p1 = scmp.lt.s32.totalorder %s3578_s3, %s3315_s28 }
  0x47   : > { %p3312_p13 = pnand %p3310_p11, %p3296_p12  ;;  %p3318_p7 = scmp.lt.s32.totalorder %s3316_s29, %s3309_s23 }
  0x49   : > { %p3313_p4 = pneg %p3312_p13  ;;  %p3319_p10 = por %p3318_p7, %p3317_p1 }
  0x4b   : > { %p3320_p6 = pnand %p3319_p10, %p3313_p4 }
  0x4d   : > { %3323 = shalt.err (!%p3320_p6)
}
  0x4e   : > { %3185 = dma.hbm_to_vmem [thread:$0]  (!%p3582_p2), %s3576_s30, 128, %s3578_s3, %s134_s25  }
  0x4f   : > { %156 = sbr.rel (%p3507_p8) target bundleno = 1193 (0x4a9), region = 28 }
  0x56   : > { %p7054_p9 = scmp.ne.s32.totalorder %s7038_s17, 0 }
  0x58   : > { %3377 = dma.done.wait (%p7054_p9), [#allocation9], 16  }
  0x59   : > { %3379 = vsyncadd (%p7054_p9), [#allocation9], 4294967280  ;;  %s3618_s18 = sand.u32 1, %s3394_s10   ;;  %p7056_p1 = scmp.ne.s32.totalorder %s7040_s19, 0 }
  0x5a   : > { %7055 = sst [smem:[#allocation25_spill]] %s3618_s18  ;;  %s3062_s5 = sshll.u32 %s3618_s18, 3 }
  0x5b   : > { %s163_s4 = scalar_lea.sflag [#allocation7], %s3618_s18  ;;  %s166_s6 = scalar_lea.vmem [#allocation10], %s3062_s5 }
  0x5c   : > { %3381 = dma.done.wait (%p7056_p1), %s163_s4, 128  }
  0x5d   : > { %3383 = vsyncadd (%p7056_p1), %s163_s4, 4294967168 }
  0x5e   : > { %171 = sfence }
  0x5f   : > { %v188_v0 = vld [vmem:[%s166_s6] sm:$0xff]  ;;  %vm192_vm0 = vcmask 1043456   ;;  %vm322_vm1 = vcmask 179200   ;;  %v6847_v11 = vlaneseq  ;;  %v3414_v15 = vmov 1966171168   ;;  %s3416_s17 = smov 115  }
  0x60   : > { %v190_v1 = vcombine.high %v188_v0, %v188_v0  ;;  %v193_v2 = vsel %vm192_vm0, %v188_v0, 0.0  ;;  %v207_v3 = vsel %vm192_vm0, %v188_v0, -inf  ;;  %v229_v16 = vunpack.c.l.s4 %v3414_v15  ;;  %s3417_s19 = smov 3   ;;  %s3418_s21 = smov 99  }
  0x61   : > { %v194_v4 = vrot.slane %v193_v2, 4  ;;  %v208_v5 = vrot.slane %v207_v3, 4  ;;  %v3415_v18 = vmov 0.0   ;;  %v232_v23 = vshrl.u32 %v6847_v11, 7  ;;  %s3419_s30 = smov 83   ;;  %s3420_s3 = smov 67  }
  0x62   : > { %v200_v6 = vsel %vm192_vm0, %v190_v1, 0.0  ;;  %v214_v7 = vsel %vm192_vm0, %v190_v1, -inf  ;;  %323 = vst.msk [vmem:[#allocation4] sm:$0xff] %vm322_vm1, %v3415_v18  ;;  %324 = vst.msk [vmem:[#allocation4 + $0x8] sm:$0xff] %vm322_vm1, %v3415_v18  ;;  %v230_v27 = vunpack.c.0.s8 %v229_v16  ;;  %vm245_vm2 = vcmp.lt.s32.totalorder %v6847_v11, 256  ;;  %s3421_s25 = smov 51  }
  0x63   : > { %v195_v8 = vadd.f32 %v194_v4, %v193_v2  ;;  %v201_v9 = vrot.slane %v200_v6, 4  ;;  %v209_v10 = vmax.f32 %v207_v3, %v208_v5  ;;  %v215_v12 = vrot.slane %v214_v7, 4  ;;  %327 = vst.msk [vmem:[#allocation5] sm:$0xff] %vm322_vm1, %v3415_v18  ;;  %328 = vst.msk [vmem:[#allocation5 + $0x8] sm:$0xff] %vm322_vm1, %v3415_v18  ;;  %s3422_s7 = smov 35   ;;  %s3423_s16 = smov 19  }
  0x64   : > { %v3635_v35 = vsub.s32 %v230_v27, %v232_v23  ;;  %v3642_v43 = vsub.s32 0, %v232_v23  ;;  %s6803_s8 = smov 112   ;;  %s6805_s24 = smov 96   ;;  %vm338_vm3 = vcmask 147480   ;;  %vm325_vm4 = vcmask 177152  }
  0x65   : > { %v196_v13 = vrot.slane %v195_v8, 2  ;;  %v202_v14 = vadd.f32 %v201_v9, %v200_v6  ;;  %v210_v17 = vrot.slane %v209_v10, 2  ;;  %v216_v19 = vmax.f32 %v214_v7, %v215_v12  ;;  %s6807_s23 = smov 80   ;;  %s6809_s27 = smov 64   ;;  %329 = vst.msk [vmem:[#allocation5 + $0x10] sm:$0x3f] %vm325_vm4, %v3415_v18 }
  0x66   : > { %7057 = vst [vmem:[#allocation26_spill] sm:$0xff] %v3635_v35  ;;  %s6811_s28 = smov 48   ;;  %s6813_s29 = smov 32   ;;  %326 = vst.msk [vmem:[#allocation4 + $0x10] sm:$0x3f] %vm325_vm4, %v3415_v18  ;;  %vm698_vm5 = vcmask 1046528  }
  0x67   : > { %v197_v20 = vadd.f32 %v196_v13, %v195_v8  ;;  %v203_v21 = vrot.slane %v202_v14, 2  ;;  %v211_v22 = vmax.f32 %v209_v10, %v210_v17  ;;  %v217_v24 = vrot.slane %v216_v19, 2  ;;  %s6815_s5 = smov 16   ;;  %s3093_s4 = sld [smem:[#allocation6 + $0x12]] }
  0x68   : > { %s3704_s6 = sld [smem:[#allocation6 + $0x4]]  ;;  %s3840_s0 = sld [smem:[#allocation6 + $0x13]]  ;;  %vm674_vm6 = vcmask 1042432   ;;  %vm888_vm7 = vcmask 1045504   ;;  %vm839_vm8 = vcmask 1041408   ;;  %vm1078_vm9 = vcmask 1044480  }
  0x69   : > { %v198_v25 = vrot.slane %v197_v20, 1  ;;  %v204_v26 = vadd.f32 %v203_v21, %v202_v14  ;;  %v212_v28 = vrot.slane %v211_v22, 1  ;;  %v218_v29 = vmax.f32 %v216_v19, %v217_v24  ;;  %s3842_s1 = sld [smem:[#allocation6 + $0x21]]  ;;  %s3844_s22 = sld [smem:[#allocation6 + $0x1a]] }
  0x6a   : > { %s3846_s13 = sld [smem:[#allocation6 + $0x8]]  ;;  %s3848_s26 = sld [smem:[#allocation6 + $0x24]]  ;;  %vm1004_vm10 = vcmask 1040384  }
  0x6b   : > { %v199_v30 = vadd.f32 %v198_v25, %v197_v20  ;;  %v205_v31 = vrot.slane %v204_v26, 1  ;;  %v213_v32 = vmax.f32 %v211_v22, %v212_v28  ;;  %v219_v33 = vrot.slane %v218_v29, 1  ;;  %s3850_s11 = sld [smem:[#allocation6 + $0x10]]  ;;  %s3852_s10 = sld [smem:[#allocation6 + $0x2c]] }
  0x6c   : > { %s3854_s14 = sld [smem:[#allocation6 + $0x18]]  ;;  %s3856_s20 = sld [smem:[#allocation6 + $0x7]] }
  0x6d   : > { %v206_v34 = vadd.f32 %v205_v31, %v204_v26  ;;  %v220_v36 = vmax.f32 %v218_v29, %v219_v33  ;;  %s3858_s9 = sld [smem:[#allocation6 + $0x23]]  ;;  %s3860_s2 = sld [smem:[#allocation6 + $0x20]] }
  0x6e   : > { %7058 = sst [smem:[#allocation27_spill]] %s3704_s6  ;;  %s3862_s15 = sld [smem:[#allocation6 + $0xe]] }
  0x6f   : > { %v227_v37 = vcombine.low %v199_v30, %v206_v34  ;;  %v250_v38 = vcombine.low %v213_v32, %v220_v36  ;;  %s3864_s12 = sld [smem:[#allocation6 + $0x2a]]  ;;  %s3866_s18 = sld [smem:[#allocation6 + $0xc]] }
  0x71   : > { %v234_v39 = vrot.slane %v227_v37, %v3635_v35  ;;  %v257_v40 = vrot.slane %v250_v38, %v3635_v35 }
  0x73   : > { %v241_v41 = vrot.slane %v234_v39, %v3635_v35  ;;  %v264_v42 = vrot.slane %v257_v40, %v3635_v35  ;;  %7071 = sst [smem:[#allocation40_spill]] %s3858_s9  ;;  %s3878_s9 = sld [smem:[#allocation6 + $0xd]] }
  0x74   : > { %7072 = sst [smem:[#allocation41_spill]] %s3860_s2  ;;  %s3880_s2 = sld [smem:[#allocation6 + $0x14]] }
  0x75   : > { %247 = vst.msk [vmem:[#allocation2] sm:$0x3] %vm245_vm2, %v241_v41  ;;  %266 = vst.msk [vmem:[#allocation3] sm:$0x3] %vm245_vm2, %v264_v42  ;;  %7073 = sst [smem:[#allocation42_spill]] %s3864_s12  ;;  %s3882_s12 = sld [smem:[#allocation6 + $0x1b]] }
  0x76   : > { %7074 = sst [smem:[#allocation43_spill]] %s3866_s18  ;;  %s3884_s18 = sld [smem:[#allocation6 + $0x22]] }
  0x79   : > { %7080 = sst [smem:[#allocation49_spill]] %s3878_s9  ;;  %s3894_s9 = sld [smem:[#allocation6 + $0x3b]] }
  0x7a   : > { %7081 = sst [smem:[#allocation50_spill]] %s3880_s2  ;;  %s3896_s2 = sld [smem:[#allocation6 + $0x57]] }
  0x7b   : > { %7082 = sst [smem:[#allocation51_spill]] %s3882_s12  ;;  %s3898_s12 = sld [smem:[#allocation6 + $0x31]] }
  0x7c   : > { %v320_v44 = vld [vmem:[#allocation2] sm:$0x3]  ;;  %v321_v46 = vld [vmem:[#allocation3] sm:$0x3] }
  0x7d   : > { %v334_v45 = vrot.slane %v320_v44, %v3642_v43  ;;  %v344_v47 = vrot.slane %v321_v46, %v3642_v43  ;;  %v406_v48 = vrot.slane %v321_v46, 1  ;;  %v405_v49 = vrot.slane %v320_v44, 1 }
  0x7f   : > { %349 = vrot.lane.b32.xlu1 %v334_v45, %s3416_s17  ;;  %335 = vrot.lane.b32.xlu0 %v334_v45, %s3417_s19  ;;  %v418_v50 = vrot.slane %v406_v48, %v3642_v43  ;;  %v410_v51 = vrot.slane %v405_v49, %v3642_v43 }
  0x83   : > { %353 = vrot.lane.b32.xlu1 %v344_v47, %s3416_s17  ;;  %345 = vrot.lane.b32.xlu0 %v344_v47, %s3417_s19  ;;  %s3706_s17 = sld [smem:[#allocation6 + $0x2]] }
  0x87   : > { %361 = vrot.lane.b32.xlu1 %v344_v47, %s3418_s21  ;;  %357 = vrot.lane.b32.xlu0 %v334_v45, %s3418_s21  ;;  %s3092_s21 = sld [smem:[#allocation6 + $0xb]] }
  0x89   : > { %7059 = sst [smem:[#allocation28_spill]] %s3706_s17 }
  0x8b   : > { %369 = vrot.lane.b32.xlu1 %v344_v47, %s3419_s30  ;;  %365 = vrot.lane.b32.xlu0 %v334_v45, %s3419_s30  ;;  %s3085_s30 = sld [smem:[#allocation6 + $0xa]] }
  0x8f   : > { %377 = vrot.lane.b32.xlu1 %v344_v47, %s3420_s3  ;;  %373 = vrot.lane.b32.xlu0 %v334_v45, %s3420_s3  ;;  %s3094_s3 = sld [smem:[#allocation6 + $0x19]] }
  0x93   : > { %385 = vrot.lane.b32.xlu1 %v344_v47, %s3421_s25  ;;  %381 = vrot.lane.b32.xlu0 %v334_v45, %s3421_s25  ;;  %s3722_s25 = sld [smem:[#allocation6 + $0x5]] }
  0x97   : > { %393 = vrot.lane.b32.xlu1 %v344_v47, %s3422_s7  ;;  %389 = vrot.lane.b32.xlu0 %v334_v45, %s3422_s7  ;;  %s3724_s7 = sld [smem:[#allocation6 + $0x1]] }
  0x99   : > { %7060 = sst [smem:[#allocation29_spill]] %s3722_s25 }
  0x9b   : > { %401 = vrot.lane.b32.xlu1 %v344_v47, %s3423_s16  ;;  %397 = vrot.lane.b32.xlu0 %v334_v45, %s3423_s16  ;;  %s3078_s16 = sld [smem:[#allocation6 + $0x9]] }
  0x9d   : > { %7061 = sst [smem:[#allocation30_spill]] %s3724_s7 }
  0x9f   : > { %419 = vrot.lane.b32.xlu1 %v418_v50, %s3417_s19  ;;  %411 = vrot.lane.b32.xlu0 %v410_v51, %s3417_s19 }
  0xa3   : > { %426 = vrot.lane.b32.xlu1 %v321_v46, %s6803_s8  ;;  %423 = vrot.lane.b32.xlu0 %v320_v44, %s6803_s8  ;;  %s6817_s8 = smov 123  }
  0xa7   : > { %448 = vrot.lane.b32.xlu1 %v321_v46, %s6805_s24  ;;  %445 = vrot.lane.b32.xlu0 %v320_v44, %s6805_s24  ;;  %s3818_s24 = sld [smem:[#allocation6 + $0x1d]] }
  0xab   : > { %470 = vrot.lane.b32.xlu1 %v321_v46, %s6807_s23  ;;  %467 = vrot.lane.b32.xlu0 %v320_v44, %s6807_s23  ;;  %s3820_s23 = sld [smem:[#allocation6 + $0x16]] }
  0xaf   : > { %492 = vrot.lane.b32.xlu1 %v321_v46, %s6809_s27  ;;  %489 = vrot.lane.b32.xlu0 %v320_v44, %s6809_s27  ;;  %s3822_s27 = sld [smem:[#allocation6 + $0x2b]] }
  0xb3   : > { %514 = vrot.lane.b32.xlu1 %v321_v46, %s6811_s28  ;;  %511 = vrot.lane.b32.xlu0 %v320_v44, %s6811_s28  ;;  %s3824_s28 = sld [smem:[#allocation6 + $0x17]] }
  0xb7   : > { %536 = vrot.lane.b32.xlu1 %v321_v46, %s6813_s29  ;;  %533 = vrot.lane.b32.xlu0 %v320_v44, %s6813_s29  ;;  %s3826_s29 = sld [smem:[#allocation6 + $0x1e]] }
  0xbb   : > { %558 = vrot.lane.b32.xlu1 %v321_v46, %s6815_s5  ;;  %555 = vrot.lane.b32.xlu0 %v320_v44, %s6815_s5  ;;  %s3828_s5 = sld [smem:[#allocation6 + $0x25]] }
  0xf1   : > { %v350_v52 = vpop.permute.xlu1 %349  ;;  %v336_v53 = vpop.permute.xlu0 %335 }
  0xf2   : > { %352 = vst.msk [vmem:[#allocation4 + $0x4] sm:$0x1] %vm338_vm3, %v350_v52  ;;  %339 = vst.msk [vmem:[#allocation4 + $0x3] sm:$0x1] %vm338_vm3, %v336_v53  ;;  %v3718_v52 = vstv %s3093_s4  ;;  %v6860_v53 = vstv %s3704_s6  ;;  %s6825_s4 = smov 124   ;;  %s3876_s6 = sld [smem:[#allocation6 + $0x6]] }
  0xf5   : > { %v354_v54 = vpop.permute.xlu1 %353  ;;  %v346_v55 = vpop.permute.xlu0 %345 }
  0xf6   : > { %356 = vst.msk [vmem:[#allocation5 + $0x4] sm:$0x1] %vm338_vm3, %v354_v54  ;;  %348 = vst.msk [vmem:[#allocation5 + $0x3] sm:$0x1] %vm338_vm3, %v346_v55  ;;  %v6858_v54 = vstv %s3706_s17  ;;  %s3872_s17 = sld [smem:[#allocation6]] }
  0xf8   : > { %7079 = sst [smem:[#allocation48_spill]] %s3876_s6  ;;  %s3892_s6 = sld [smem:[#allocation6 + $0x34]] }
  0xf9   : > { %v362_v56 = vpop.permute.xlu1 %361  ;;  %v358_v57 = vpop.permute.xlu0 %357 }
  0xfa   : > { %364 = vst.msk [vmem:[#allocation5 + $0x5] sm:$0x1] %vm338_vm3, %v362_v56  ;;  %360 = vst.msk [vmem:[#allocation4 + $0x5] sm:$0x1] %vm338_vm3, %v358_v57  ;;  %v3738_v57 = vstv %s3092_s21  ;;  %s6819_s21 = smov 126  }
  0xfc   : > { %7077 = sst [smem:[#allocation46_spill]] %s3872_s17  ;;  %s3900_s17 = sld [smem:[#allocation6 + $0x49]] }
  0xfd   : > { %v370_v58 = vpop.permute.xlu1 %369  ;;  %v366_v59 = vpop.permute.xlu0 %365 }
  0xfe   : > { %372 = vst.msk [vmem:[#allocation5 + $0x6] sm:$0x1] %vm338_vm3, %v370_v58  ;;  %368 = vst.msk [vmem:[#allocation4 + $0x6] sm:$0x1] %vm338_vm3, %v366_v59  ;;  %v3740_v58 = vstv %s3085_s30  ;;  %s3086_s30 = sld [smem:[#allocation6 + $0x11]] }
 0x101   : > { %v378_v60 = vpop.permute.xlu1 %377  ;;  %v374_v61 = vpop.permute.xlu0 %373 }
 0x102   : > { %380 = vst.msk [vmem:[#allocation5 + $0x7] sm:$0x1] %vm338_vm3, %v378_v60  ;;  %376 = vst.msk [vmem:[#allocation4 + $0x7] sm:$0x1] %vm338_vm3, %v374_v61  ;;  %7086 = sst [smem:[#allocation55_spill]] %s3900_s17  ;;  %s3920_s17 = sld [smem:[#allocation6 + $0x50]] }
 0x105   : > { %v386_v62 = vpop.permute.xlu1 %385  ;;  %v382_v63 = vpop.permute.xlu0 %381 }
 0x106   : > { %388 = vst.msk [vmem:[#allocation5 + $0x8] sm:$0x1] %vm338_vm3, %v386_v62  ;;  %384 = vst.msk [vmem:[#allocation4 + $0x8] sm:$0x1] %vm338_vm3, %v382_v63  ;;  %v3751_v62 = vstv %s3094_s3  ;;  %v6856_v63 = vstv %s3722_s25  ;;  %s6823_s3 = smov 125   ;;  %s3868_s25 = sld [smem:[#allocation6 + $0x28]] }
 0x109   : > { %v394_v0 = vpop.permute.xlu1 %393  ;;  %v390_v1 = vpop.permute.xlu0 %389  ;;  %v3716_v51 = vld [vmem:[#allocation4] sm:$0xff] }
 0x10a   : > { %396 = vst.msk [vmem:[#allocation5 + $0x9] sm:$0x1] %vm338_vm3, %v394_v0  ;;  %392 = vst.msk [vmem:[#allocation4 + $0x9] sm:$0x1] %vm338_vm3, %v390_v1  ;;  %v1169_v55 = vmul.f32 %v6860_v53, %v3716_v51  ;;  %v3736_v56 = vmul.f32 %v6858_v54, %v3716_v51  ;;  %v1183_v60 = vmul.f32 %v3738_v57, %v3716_v51  ;;  %v6859_v0 = vstv %s3724_s7  ;;  %s3874_s7 = sld [smem:[#allocation6 + $0x1c]] }
 0x10b   : > { %v3749_v61 = vmul.f32 %v3740_v58, %v3716_v51 }
 0x10c   : > { %7062 = vst [vmem:[#allocation31_spill] sm:$0xff] %v3736_v56  ;;  %v6854_v59 = vrot.slane %v3736_v56, 6  ;;  %7075 = sst [smem:[#allocation44_spill]] %s3868_s25  ;;  %s3886_s25 = sld [smem:[#allocation6 + $0x29]] }
 0x10d   : > { %v402_v2 = vpop.permute.xlu1 %401  ;;  %v398_v3 = vpop.permute.xlu0 %397  ;;  %7063 = vst [vmem:[#allocation32_spill] sm:$0xff] %v3749_v61  ;;  %v6851_v1 = vrot.slane %v3749_v61, 7 }
 0x10e   : > { %404 = vst.msk [vmem:[#allocation5 + $0xa] sm:$0x1] %vm338_vm3, %v402_v2  ;;  %400 = vst.msk [vmem:[#allocation4 + $0xa] sm:$0x1] %vm338_vm3, %v398_v3  ;;  %v1223_v2 = vmul.f32 %v3751_v62, %v3716_v51  ;;  %v3767_v3 = vmul.f32 %v6856_v63, %v3716_v51 }
 0x110   : > { %7065 = vst [vmem:[#allocation34_spill] sm:$0xff] %v3767_v3  ;;  %7078 = sst [smem:[#allocation47_spill]] %s3874_s7  ;;  %s3890_s7 = sld [smem:[#allocation6 + $0x5d]] }
 0x111   : > { %v420_v4 = vpop.permute.xlu1 %419  ;;  %v412_v5 = vpop.permute.xlu0 %411 }
 0x112   : > { %422 = vst.msk [vmem:[#allocation5 + $0xb] sm:$0x1] %vm338_vm3, %v420_v4  ;;  %414 = vst.msk [vmem:[#allocation4 + $0xb] sm:$0x1] %vm338_vm3, %v412_v5  ;;  %v3772_v4 = vmul.f32 %v6859_v0, %v3716_v51  ;;  %v3774_v5 = vstv %s3078_s16  ;;  %s6821_s16 = smov 127   ;;  %7083 = sst [smem:[#allocation52_spill]] %s3886_s25 }
 0x113   : > { %s3902_s25 = sld [smem:[#allocation6 + $0x38]] }
 0x114   : > { %7066 = vst [vmem:[#allocation35_spill] sm:$0xff] %v3772_v4 }
 0x115   : > { %v427_v6 = vpop.permute.xlu1 %426  ;;  %v424_v7 = vpop.permute.xlu0 %423 }
 0x116   : > { %v428_v8 = vrot.slane %v427_v6, 1  ;;  %v425_v9 = vrot.slane %v424_v7, 1  ;;  %v6849_v6 = vrot.slane %v3767_v3, 5  ;;  %v6855_v7 = vrot.slane %v3772_v4, 5  ;;  %7085 = sst [smem:[#allocation54_spill]] %s3890_s7  ;;  %s3906_s7 = sld [smem:[#allocation6 + $0x3f]] }
 0x118   : > { %v440_v10 = vrot.slane %v428_v8, %v3642_v43  ;;  %v432_v12 = vrot.slane %v425_v9, %v3642_v43  ;;  %v3784_v8 = vmul.f32 %v3774_v5, %v3716_v51 }
 0x119   : > { %v449_v13 = vpop.permute.xlu1 %448  ;;  %v446_v14 = vpop.permute.xlu0 %445  ;;  %7087 = sst [smem:[#allocation56_spill]] %s3902_s25  ;;  %s3922_s25 = sld [smem:[#allocation6 + $0x35]] }
 0x11a   : > { %v450_v15 = vrot.slane %v449_v13, 1  ;;  %v447_v16 = vrot.slane %v446_v14, 1  ;;  %441 = vrot.lane.b32.xlu1 %v440_v10, %s3417_s19  ;;  %433 = vrot.lane.b32.xlu0 %v432_v12, %s3417_s19  ;;  %7067 = vst [vmem:[#allocation36_spill] sm:$0xff] %v3784_v8  ;;  %v6853_v10 = vrot.slane %v3784_v8, 6  ;;  %v3799_v13 = vstv %s3086_s30  ;;  %s3816_s30 = sld [smem:[#allocation6 + $0xf]] }
 0x11b   : > { %7069 = vst [vmem:[#allocation38_spill] sm:$0xff] %v3799_v13 }
 0x11c   : > { %v462_v17 = vrot.slane %v450_v15, %v3642_v43  ;;  %v454_v19 = vrot.slane %v447_v16, %v3642_v43  ;;  %v3807_v15 = vmul.f32 %v3799_v13, %v3716_v51 }
 0x11d   : > { %v471_v20 = vpop.permute.xlu1 %470  ;;  %v468_v21 = vpop.permute.xlu0 %467 }
 0x11e   : > { %v472_v22 = vrot.slane %v471_v20, 1  ;;  %v469_v23 = vrot.slane %v468_v21, 1  ;;  %463 = vrot.lane.b32.xlu1 %v462_v17, %s3417_s19  ;;  %455 = vrot.lane.b32.xlu0 %v454_v19, %s3417_s19  ;;  %7070 = vst [vmem:[#allocation39_spill] sm:$0xff] %v3807_v15  ;;  %v6850_v16 = vrot.slane %v3807_v15, 7  ;;  %v3912_v19 = vstv %s3818_s24  ;;  %s3936_s24 = sld [smem:[#allocation6 + $0x46]] }
 0x11f   : > { %v3915_v20 = vstv %s3820_s23  ;;  %v3918_v21 = vstv %s3822_s27  ;;  %s3938_s23 = sld [smem:[#allocation6 + $0x42]]  ;;  %s7088_s27 = sld [smem:[#allocation40_spill]] }
 0x120   : > { %v484_v24 = vrot.slane %v472_v22, %v3642_v43  ;;  %v476_v25 = vrot.slane %v469_v23, %v3642_v43  ;;  %v3909_v17 = vstv %s3816_s30  ;;  %v3925_v22 = vstv %s3824_s28  ;;  %s3952_s28 = sld [smem:[#allocation6 + $0x4d]] }
 0x121   : > { %v493_v26 = vpop.permute.xlu1 %492  ;;  %v490_v27 = vpop.permute.xlu0 %489  ;;  %v3928_v23 = vstv %s3826_s29  ;;  %s3954_s29 = sld [smem:[#allocation6 + $0x5f]] }
 0x122   : > { %v494_v28 = vrot.slane %v493_v26, 1  ;;  %v491_v29 = vrot.slane %v490_v27, 1  ;;  %485 = vrot.lane.b32.xlu1 %v484_v24, %s3417_s19  ;;  %477 = vrot.lane.b32.xlu0 %v476_v25, %s3417_s19  ;;  %v3931_v24 = vstv %s3828_s5  ;;  %s7091_s5 = sld [smem:[#allocation42_spill]] }
 0x124   : > { %v506_v30 = vrot.slane %v494_v28, %v3642_v43  ;;  %v498_v31 = vrot.slane %v491_v29, %v3642_v43 }
 0x125   : > { %v515_v32 = vpop.permute.xlu1 %514  ;;  %v512_v33 = vpop.permute.xlu0 %511  ;;  %v4092_v0 = vstv %s3938_s23  ;;  %s7194_s23 = sld [smem:[#allocation29_spill]] }
 0x126   : > { %v516_v34 = vrot.slane %v515_v32, 1  ;;  %v513_v18 = vrot.slane %v512_v33, 1  ;;  %507 = vrot.lane.b32.xlu1 %v506_v30, %s3417_s19  ;;  %499 = vrot.lane.b32.xlu0 %v498_v31, %s3417_s19  ;;  %v3957_v30 = vstv %s3840_s0  ;;  %v3960_v31 = vstv %s3842_s1  ;;  %s7096_s0 = sld [smem:[#allocation46_spill]]  ;;  %s7098_s1 = sld [smem:[#allocation47_spill]]  ;;  %7134 = vst [vmem:[#allocation80_spill] sm:$0xff] %v4092_v0 }
 0x127   : > { %7090 = sst [smem:[#allocation40_spill]] %s3954_s29  ;;  %v3963_v32 = vstv %s3844_s22  ;;  %v3966_v33 = vstv %s3846_s13  ;;  %s3984_s22 = sld [smem:[#allocation6 + $0x5b]]  ;;  %v4095_v53 = vstv %s3952_s28 }
 0x128   : > { %v528_v36 = vrot.slane %v516_v34, %v3642_v43  ;;  %v520_v37 = vrot.slane %v513_v18, %v3642_v43  ;;  %v3973_v34 = vstv %s3848_s26  ;;  %v3976_v18 = vstv %s3850_s11  ;;  %s7100_s13 = sld [smem:[#allocation48_spill]]  ;;  %s3986_s29 = sld [smem:[#allocation6 + $0x51]]  ;;  %7135 = vst [vmem:[#allocation81_spill] sm:$0xff] %v4095_v53 }
 0x129   : > { %v537_v38 = vpop.permute.xlu1 %536  ;;  %v534_v39 = vpop.permute.xlu0 %533  ;;  %s7104_s11 = sld [smem:[#allocation50_spill]]  ;;  %s4000_s26 = sld [smem:[#allocation6 + $0x5e]] }
 0x12a   : > { %v538_v40 = vrot.slane %v537_v38, 1  ;;  %v535_v41 = vrot.slane %v534_v39, 1  ;;  %529 = vrot.lane.b32.xlu1 %v528_v36, %s3417_s19  ;;  %521 = vrot.lane.b32.xlu0 %v520_v37, %s3417_s19  ;;  %v3979_v36 = vstv %s3852_s10  ;;  %v3982_v37 = vstv %s3854_s14  ;;  %s7106_s10 = sld [smem:[#allocation51_spill]]  ;;  %s4002_s14 = sld [smem:[#allocation6 + $0x58]] }
 0x12b   : > { %7097 = vst [vmem:[#allocation57_spill] sm:$0xff] %v3982_v37  ;;  %v3989_v38 = vstv %s3856_s20  ;;  %v3992_v39 = vstv %s7088_s27  ;;  %s4016_s20 = sld [smem:[#allocation6 + $0x4a]]  ;;  %s7216_s28 = smov 127  }
 0x12c   : > { %v550_v42 = vrot.slane %v538_v40, %v3642_v43  ;;  %v542_v44 = vrot.slane %v535_v41, %v3642_v43  ;;  %7102 = vst [vmem:[#allocation58_spill] sm:$0xff] %v3989_v38  ;;  %v3998_v41 = vstv %s3862_s15  ;;  %s4018_s15 = sld [smem:[#allocation6 + $0x37]] }
 0x12d   : > { %v559_v45 = vpop.permute.xlu1 %558  ;;  %v556_v46 = vpop.permute.xlu0 %555  ;;  %7099 = sst [smem:[#allocation42_spill]] %s3984_s22  ;;  %7105 = vst [vmem:[#allocation60_spill] sm:$0xff] %v3998_v41  ;;  %s7107_s22 = sld [smem:[#allocation52_spill]] }
 0x12e   : > { %v560_v47 = vrot.slane %v559_v45, 1  ;;  %v557_v48 = vrot.slane %v556_v46, 1  ;;  %551 = vrot.lane.b32.xlu1 %v550_v42, %s3417_s19  ;;  %543 = vrot.lane.b32.xlu0 %v542_v44, %s3417_s19  ;;  %v4005_v42 = vstv %s7091_s5  ;;  %s4028_s5 = sld [smem:[#allocation6 + $0x59]] }
 0x130   : > { %v572_v49 = vrot.slane %v560_v47, %v3642_v43  ;;  %v564_v50 = vrot.slane %v557_v48, %v3642_v43  ;;  %v1203_v43 = vmul.f32 %v3718_v52, %v3716_v51  ;;  %v4022_v48 = vstv %s7098_s1  ;;  %s4044_s1 = sld [smem:[#allocation6 + $0x60]] }
 0x131   : > { %7113 = vst [vmem:[#allocation64_spill] sm:$0xff] %v4022_v48  ;;  %v4118_v8 = vstv %s4002_s14  ;;  %v4121_v56 = vstv %s4016_s20  ;;  %s3123_s14 = sld [smem:[#allocation6 + $0x4e]]  ;;  %s3122_s20 = sld [smem:[#allocation6 + $0x47]] }
 0x132   : > { %573 = vrot.lane.b32.xlu1 %v572_v49, %s3417_s19  ;;  %565 = vrot.lane.b32.xlu0 %v564_v50, %s3417_s19  ;;  %s3755_s19 = sld [smem:[#allocation6 + $0x3]]  ;;  %7142 = vst [vmem:[#allocation88_spill] sm:$0xff] %v4118_v8  ;;  %7143 = vst [vmem:[#allocation89_spill] sm:$0xff] %v4121_v56  ;;  %v4140_v8 = vmul.f32 %v3912_v19, %v3716_v51  ;;  %v4148_v56 = vmul.f32 %v3918_v21, %v3716_v51 }
 0x136   : > { %1209 = vrot.lane.b32.xlu1 %v1203_v43, %s6825_s4  ;;  %1173 = vrot.lane.b32.xlu0 %v1169_v55, %s6825_s4  ;;  %v4033_v43 = vstv %s7104_s11  ;;  %v4036_v55 = vstv %s7106_s10  ;;  %s7124_s11 = sld [smem:[#allocation40_spill]] }
 0x137   : > { %7115 = vst [vmem:[#allocation66_spill] sm:$0xff] %v4033_v43  ;;  %7116 = vst [vmem:[#allocation67_spill] sm:$0xff] %v4036_v55 }
 0x138   : > { %7064 = sst [smem:[#allocation33_spill]] %s3755_s19  ;;  %v6857_v9 = vstv %s3755_s19 }
 0x139   : > { %v3797_v12 = vmul.f32 %v6857_v9, %v3716_v51  ;;  %s3870_s19 = sld [smem:[#allocation6 + $0x2f]] }
 0x13a   : > { %843 = vrot.lane.b32.xlu1 %v6854_v59, %s6819_s21  ;;  %1189 = vrot.lane.b32.xlu0 %v1183_v60, %s6825_s4  ;;  %v4039_v60 = vstv %s3884_s18  ;;  %s4058_s18 = sld [smem:[#allocation6 + $0x52]]  ;;  %v4065_v59 = vstv %s3896_s2  ;;  %s7165_s2 = sld [smem:[#allocation27_spill]] }
 0x13b   : > { %7068 = vst [vmem:[#allocation37_spill] sm:$0xff] %v3797_v12  ;;  %v6852_v14 = vrot.slane %v3797_v12, 7  ;;  %7117 = vst [vmem:[#allocation68_spill] sm:$0xff] %v4039_v60  ;;  %v4115_v12 = vstv %s4000_s26  ;;  %s3121_s26 = sld [smem:[#allocation6 + $0x40]] }
 0x13c   : > { %7125 = vst [vmem:[#allocation73_spill] sm:$0xff] %v4065_v59  ;;  %v4098_v47 = vstv %s7124_s11  ;;  %7141 = vst [vmem:[#allocation87_spill] sm:$0xff] %v4115_v12  ;;  %v4151_v12 = vstv %s4044_s1  ;;  %v4244_v59 = vmul.f32 %v3963_v32, %v3716_v51  ;;  %s3129_s1 = sld [smem:[#allocation6 + $0x48]]  ;;  %s3150_s11 = sld [smem:[#allocation6 + $0x4b]] }
 0x13d   : > { %7136 = vst [vmem:[#allocation82_spill] sm:$0xff] %v4098_v47  ;;  %7147 = vst [vmem:[#allocation93_spill] sm:$0xff] %v4151_v12  ;;  %v4174_v12 = vmul.f32 %v3928_v23, %v3716_v51 }
 0x13e   : > { %1033 = vrot.lane.b32.xlu1 %v6851_v1, %s6823_s3  ;;  %1229 = vrot.lane.b32.xlu0 %v1223_v2, %s6825_s4  ;;  %s3838_s4 = sld [smem:[#allocation6 + $0x27]]  ;;  %v4042_v2 = vstv %s7107_s22  ;;  %s4060_s22 = sld [smem:[#allocation6 + $0x4c]] }
 0x13f   : > { %7076 = sst [smem:[#allocation45_spill]] %s3870_s19  ;;  %s3888_s19 = sld [smem:[#allocation6 + $0x30]]  ;;  %7119 = vst [vmem:[#allocation69_spill] sm:$0xff] %v4042_v2  ;;  %7152 = vst [vmem:[#allocation98_spill] sm:$0xff] %v4174_v12 }
 0x140   : > { %s7095_s30 = sld [smem:[#allocation45_spill]]  ;;  %v4161_v53 = vstv %s4058_s18  ;;  %v7172_v12 = vstv %s7165_s2  ;;  %s3131_s18 = sld [smem:[#allocation6 + $0x56]] }
 0x141   : > { %7149 = vst [vmem:[#allocation95_spill] sm:$0xff] %v4161_v53 }
 0x142   : > { %1321 = vrot.lane.b32.xlu1 %v6849_v6, %s6817_s8  ;;  %678 = vrot.lane.b32.xlu0 %v6855_v7, %s6821_s16  ;;  %s3830_s8 = sld [smem:[#allocation6 + $0x1f]]  ;;  %s3834_s16 = sld [smem:[#allocation6 + $0x2d]]  ;;  %v4110_v7 = vstv %s3986_s29 }
 0x143   : > { %7140 = vst [vmem:[#allocation86_spill] sm:$0xff] %v4110_v7  ;;  %v4130_v7 = vmul.f32 %v3915_v20, %v3716_v51  ;;  %s7243_s29 = smov 126  }
 0x144   : > { %v3950_v29 = vstv %s3838_s4  ;;  %s7094_s4 = sld [smem:[#allocation44_spill]]  ;;  %v4164_v0 = vstv %s4060_s22  ;;  %s3066_s22 = sld [smem:[#allocation6 + $0x15]] }
 0x145   : > { %7084 = sst [smem:[#allocation53_spill]] %s3888_s19  ;;  %s3904_s19 = sld [smem:[#allocation6 + $0x43]]  ;;  %7150 = vst [vmem:[#allocation96_spill] sm:$0xff] %v4164_v0  ;;  %v4185_v0 = vmul.f32 %v3909_v17, %v3716_v51  ;;  %v4227_v4 = vmul.f32 %v3950_v29, %v3716_v51 }
 0x146   : > { %868 = vrot.lane.b32.xlu0 %v6853_v10, %s6819_s21  ;;  %s3832_s21 = sld [smem:[#allocation6 + $0x26]]  ;;  %v4014_v46 = vstv %s7095_s30  ;;  %s7111_s27 = sld [smem:[#allocation53_spill]]  ;;  %v4056_v10 = vstv %s3894_s9 }
 0x147   : > { %7110 = vst [vmem:[#allocation63_spill] sm:$0xff] %v4014_v46  ;;  %s7120_s30 = sld [smem:[#allocation56_spill]]  ;;  %7123 = vst [vmem:[#allocation72_spill] sm:$0xff] %v4056_v10  ;;  %s7128_s9 = sld [smem:[#allocation42_spill]] }
 0x148   : > { %v3934_v25 = vstv %s3830_s8  ;;  %v3944_v27 = vstv %s3834_s16  ;;  %s7089_s8 = sld [smem:[#allocation41_spill]]  ;;  %s3970_s16 = sld [smem:[#allocation6 + $0x3c]]  ;;  %7155 = vst [vmem:[#allocation101_spill] sm:$0xff] %v4185_v0 }
 0x14a   : > { %1008 = vrot.lane.b32.xlu0 %v6852_v14, %s6823_s3  ;;  %v4011_v45 = vstv %s7094_s4  ;;  %s7118_s4 = sld [smem:[#allocation55_spill]]  ;;  %v4089_v14 = vstv %s3936_s24 }
 0x14b   : > { %7109 = vst [vmem:[#allocation62_spill] sm:$0xff] %v4011_v45  ;;  %v4079_v54 = vstv %s3904_s19  ;;  %7133 = vst [vmem:[#allocation79_spill] sm:$0xff] %v4089_v14  ;;  %v4170_v14 = vmul.f32 %v3925_v22, %v3716_v51  ;;  %s7190_s19 = sld [smem:[#allocation28_spill]]  ;;  %s7192_s24 = sld [smem:[#allocation33_spill]] }
 0x14c   : > { %v3941_v26 = vstv %s3832_s21  ;;  %s7092_s21 = sld [smem:[#allocation43_spill]]  ;;  %7130 = vst [vmem:[#allocation76_spill] sm:$0xff] %v4079_v54 }
 0x14d   : > { %v4072_v9 = vstv %s7120_s30  ;;  %v4107_v61 = vstv %s7128_s9  ;;  %7151 = vst [vmem:[#allocation97_spill] sm:$0xff] %v4170_v14  ;;  %v4210_v54 = vmul.f32 %v3941_v26, %v3716_v51  ;;  %v4294_v14 = vmul.f32 %v4005_v42, %v3716_v51  ;;  %s3128_s30 = sld [smem:[#allocation6 + $0x41]]  ;;  %s3149_s9 = sld [smem:[#allocation6 + $0x44]] }
 0x14e   : > { %1058 = vrot.lane.b32.xlu0 %v6850_v16, %s6823_s3  ;;  %s3836_s3 = sld [smem:[#allocation6 + $0x2e]]  ;;  %v3995_v40 = vstv %s7089_s8  ;;  %v4049_v16 = vstv %s7111_s27  ;;  %7129 = vst [vmem:[#allocation75_spill] sm:$0xff] %v4072_v9  ;;  %s4074_s27 = sld [smem:[#allocation6 + $0x61]]  ;;  %v4104_v15 = vstv %s3970_s16  ;;  %7139 = vst [vmem:[#allocation85_spill] sm:$0xff] %v4107_v61  ;;  %v4206_v9 = vmul.f32 %v3934_v25, %v3716_v51 }
 0x14f   : > { %7103 = vst [vmem:[#allocation59_spill] sm:$0xff] %v3995_v40  ;;  %s7112_s8 = sld [smem:[#allocation54_spill]]  ;;  %7121 = vst [vmem:[#allocation70_spill] sm:$0xff] %v4049_v16  ;;  %s7287_s16 = smov 125  }
 0x150   : > { %v4069_v63 = vstv %s7118_s4  ;;  %7138 = vst [vmem:[#allocation84_spill] sm:$0xff] %v4104_v15  ;;  %v4126_v15 = vmul.f32 %v3966_v33, %v3716_v51  ;;  %7158 = vst [vmem:[#allocation104_spill] sm:$0xff] %v4210_v54  ;;  %s3127_s4 = sld [smem:[#allocation6 + $0x3a]] }
 0x151   : > { %7127 = vst [vmem:[#allocation74_spill] sm:$0xff] %v4069_v63  ;;  %v4222_v63 = vmul.f32 %v3995_v40, %v3716_v51  ;;  %v4248_v40 = vmul.f32 %v3960_v31, %v3716_v51  ;;  %7170 = vst [vmem:[#allocation113_spill] sm:$0xff] %v4294_v14  ;;  %v4351_v14 = vld [vmem:[#allocation5] sm:$0xff] }
 0x152   : > { %v4008_v44 = vstv %s7092_s21  ;;  %s4030_s21 = sld [smem:[#allocation6 + $0x53]]  ;;  %7144 = vst [vmem:[#allocation90_spill] sm:$0xff] %v4126_v15  ;;  %7183 = vst [vmem:[#allocation123_spill] sm:$0xff] %v4351_v14 }
 0x153   : > { %7108 = vst [vmem:[#allocation61_spill] sm:$0xff] %v4008_v44  ;;  %7161 = vst [vmem:[#allocation107_spill] sm:$0xff] %v4248_v40 }
 0x154   : > { %v3947_v28 = vstv %s3836_s3  ;;  %s3968_s3 = sld [smem:[#allocation6 + $0x54]] }
 0x155   : > { %v4052_v1 = vstv %s7112_s8  ;;  %s4076_s8 = sld [smem:[#allocation6 + $0x3e]] }
 0x156   : > { %7122 = vst [vmem:[#allocation71_spill] sm:$0xff] %v4052_v1 }
 0x15a   : > { %7093 = sst [smem:[#allocation41_spill]] %s3968_s3 }
 0x15b   : > { %s7101_s3 = sld [smem:[#allocation49_spill]] }
 0x15c   : > { %s7126_s10 = sld [smem:[#allocation41_spill]] }
 0x161   : > { %v4026_v50 = vstv %s7101_s3  ;;  %s4046_s3 = sld [smem:[#allocation6 + $0x45]] }
 0x162   : > { %7114 = vst [vmem:[#allocation65_spill] sm:$0xff] %v4026_v50  ;;  %v4101_v3 = vstv %s7126_s10  ;;  %s3148_s10 = sld [smem:[#allocation6 + $0x3d]] }
 0x163   : > { %7137 = vst [vmem:[#allocation83_spill] sm:$0xff] %v4101_v3  ;;  %v4144_v3 = vmul.f32 %v3973_v34, %v3716_v51 }
 0x167   : > { %v4158_v47 = vstv %s4046_s3  ;;  %s3130_s3 = sld [smem:[#allocation6 + $0x4f]] }
 0x168   : > { %7148 = vst [vmem:[#allocation94_spill] sm:$0xff] %v4158_v47  ;;  %v4218_v47 = vmul.f32 %v3944_v27, %v3716_v51 }
 0x18c   : > { %v442_v11 = vpop.permute.xlu1 %441  ;;  %v434_v6 = vpop.permute.xlu0 %433 }
 0x18d   : > { %444 = vst.msk [vmem:[#allocation5 + $0xc] sm:$0x1] %vm338_vm3, %v442_v11  ;;  %436 = vst.msk [vmem:[#allocation4 + $0xc] sm:$0x1] %vm338_vm3, %v434_v6  ;;  %v4082_v11 = vstv %s3906_s7  ;;  %v4085_v6 = vstv %s3920_s17  ;;  %s7177_s17 = smov 124   ;;  %s7182_s7 = sld [smem:[#allocation30_spill]] }
 0x18e   : > { %7131 = vst [vmem:[#allocation77_spill] sm:$0xff] %v4082_v11  ;;  %7132 = vst [vmem:[#allocation78_spill] sm:$0xff] %v4085_v6  ;;  %v4177_v6 = vstv %s4074_s27  ;;  %v4180_v11 = vstv %s4076_s8  ;;  %s6484_s27 = sld [smem:[#allocation6 + $0x36]]  ;;  %s7900_s8 = sld [smem:[#allocation25_spill]] }
 0x18f   : > { %7153 = vst [vmem:[#allocation99_spill] sm:$0xff] %v4177_v6  ;;  %7154 = vst [vmem:[#allocation100_spill] sm:$0xff] %v4180_v11  ;;  %v4197_v11 = vmul.f32 %v3979_v36, %v3716_v51  ;;  %v4240_v6 = vmul.f32 %v3957_v30, %v3716_v51 }
 0x190   : > { %v464_v49 = vpop.permute.xlu1 %463  ;;  %v456_v35 = vpop.permute.xlu0 %455 }
 0x191   : > { %466 = vst.msk [vmem:[#allocation5 + $0xd] sm:$0x1] %vm338_vm3, %v464_v49  ;;  %458 = vst.msk [vmem:[#allocation4 + $0xd] sm:$0x1] %vm338_vm3, %v456_v35  ;;  %v4133_v49 = vstv %s4028_s5  ;;  %v4136_v35 = vstv %s4030_s21  ;;  %s3125_s5 = sld [smem:[#allocation6 + $0x5c]]  ;;  %s6027_s21 = sld [smem:[#allocation6 + $0x33]] }
 0x192   : > { %7145 = vst [vmem:[#allocation91_spill] sm:$0xff] %v4133_v49  ;;  %7146 = vst [vmem:[#allocation92_spill] sm:$0xff] %v4136_v35  ;;  %v4155_v35 = vmul.f32 %v3976_v18, %v3716_v51 }
 0x193   : > { %7157 = vst [vmem:[#allocation103_spill] sm:$0xff] %v4197_v11  ;;  %v4255_v11 = vmul.f32 %v4011_v45, %v3716_v51 }
 0x194   : > { %v486_v61 = vpop.permute.xlu1 %485  ;;  %v478_v49 = vpop.permute.xlu0 %477  ;;  %s3063_s2 = sshll.u32 %s7900_s8, 1 }
 0x195   : > { %488 = vst.msk [vmem:[#allocation5 + $0xe] sm:$0x1] %vm338_vm3, %v486_v61  ;;  %480 = vst.msk [vmem:[#allocation4 + $0xe] sm:$0x1] %vm338_vm3, %v478_v49  ;;  %v4190_v49 = vmul.f32 %v3931_v24, %v3716_v51  ;;  %v4202_v61 = vmul.f32 %v3982_v37, %v3716_v51 }
 0x196   : > { %7162 = vst [vmem:[#allocation108_spill] sm:$0xff] %v4255_v11 }
 0x197   : > { %7156 = vst [vmem:[#allocation102_spill] sm:$0xff] %v4190_v49  ;;  %v7163_v49 = vstv %s7100_s13 }
 0x198   : > { %v508_v53 = vpop.permute.xlu1 %507  ;;  %v500_v15 = vpop.permute.xlu0 %499  ;;  %v4268_v0 = vmul.f32 %v7163_v49, %v3716_v51  ;;  %v4282_v49 = vmul.f32 %v3992_v39, %v3716_v51 }
 0x199   : > { %510 = vst.msk [vmem:[#allocation5 + $0xf] sm:$0x1] %vm338_vm3, %v508_v53  ;;  %502 = vst.msk [vmem:[#allocation4 + $0xf] sm:$0x1] %vm338_vm3, %v500_v15  ;;  %v4231_v53 = vmul.f32 %v3947_v28, %v3716_v51  ;;  %v4235_v15 = vmul.f32 %v4008_v44, %v3716_v51  ;;  %v4263_v44 = vmul.f32 %v4014_v46, %v3716_v51 }
 0x19a   : > { %7164 = vst [vmem:[#allocation109_spill] sm:$0xff] %v4268_v0  ;;  %7167 = vst [vmem:[#allocation111_spill] sm:$0xff] %v4282_v49  ;;  %v4298_v46 = vmul.f32 %v4026_v50, %v3716_v51  ;;  %v4314_v50 = vmul.f32 %v3989_v38, %v3716_v51  ;;  %v7186_v49 = vrot.slane %v4130_v7, 1  ;;  %v7199_v7 = vrot.slane %v4144_v3, 5 }
 0x19b   : > { %7159 = vst [vmem:[#allocation105_spill] sm:$0xff] %v4231_v53  ;;  %7160 = vst [vmem:[#allocation106_spill] sm:$0xff] %v4235_v15  ;;  %v7168_v15 = vstv %s7096_s0  ;;  %v7205_v3 = vstv %s7190_s19  ;;  %s7904_s19 = smov 32  }
 0x19c   : > { %v530_v37 = vpop.permute.xlu1 %529  ;;  %v522_v13 = vpop.permute.xlu0 %521  ;;  %7171 = vst [vmem:[#allocation114_spill] sm:$0xff] %v4298_v46  ;;  %7174 = vst [vmem:[#allocation116_spill] sm:$0xff] %v4314_v50  ;;  %v4342_v50 = vmul.f32 %v4042_v2, %v3716_v51  ;;  %v7189_v46 = vrot.slane %v4140_v8, 1 }
 0x19d   : > { %532 = vst.msk [vmem:[#allocation5 + $0x10] sm:$0x1] %vm338_vm3, %v530_v37  ;;  %524 = vst.msk [vmem:[#allocation4 + $0x10] sm:$0x1] %vm338_vm3, %v522_v13  ;;  %v4275_v37 = vmul.f32 %v4022_v48, %v3716_v51  ;;  %v4290_v48 = vmul.f32 %v7168_v15, %v3716_v51  ;;  %v4336_v13 = vmul.f32 %v3998_v41, %v3716_v51 }
 0x19e   : > { %7181 = vst [vmem:[#allocation122_spill] sm:$0xff] %v4342_v50 }
 0x19f   : > { %7166 = vst [vmem:[#allocation110_spill] sm:$0xff] %v4275_v37  ;;  %7169 = vst [vmem:[#allocation112_spill] sm:$0xff] %v4290_v48  ;;  %v4309_v48 = vmul.f32 %v4033_v43, %v3716_v51 }
 0x1a0   : > { %v4284_v45 = vld [vmem:[#allocation4 + $0x8] sm:$0xff]  ;;  %v552_v54 = vpop.permute.xlu1 %551  ;;  %v544_v53 = vpop.permute.xlu0 %543  ;;  %7180 = vst [vmem:[#allocation121_spill] sm:$0xff] %v4336_v13 }
 0x1a1   : > { %554 = vst.msk [vmem:[#allocation5 + $0x11] sm:$0x1] %vm338_vm3, %v552_v54  ;;  %546 = vst.msk [vmem:[#allocation4 + $0x11] sm:$0x1] %vm338_vm3, %v544_v53  ;;  %v1170_v40 = vmul.f32 %v7172_v12, %v4284_v45  ;;  %v4318_v54 = vmul.f32 %v4036_v55, %v3716_v51  ;;  %v4322_v12 = vmul.f32 %v4039_v60, %v3716_v51 }
 0x1a2   : > { %7173 = vst [vmem:[#allocation115_spill] sm:$0xff] %v4309_v48  ;;  %v4327_v53 = vmul.f32 %v3915_v20, %v4284_v45  ;;  %v4331_v15 = vmul.f32 %v3912_v19, %v4284_v45  ;;  %v1184_v11 = vmul.f32 %v3738_v57, %v4284_v45 }
 0x1a3   : > { %7175 = vst [vmem:[#allocation117_spill] sm:$0xff] %v4318_v54  ;;  %7176 = vst [vmem:[#allocation118_spill] sm:$0xff] %v4322_v12  ;;  %1175 = vrot.lane.b32.xlu1 %v1170_v40, %s7177_s17  ;;  %v4355_v40 = vmul.f32 %v3973_v34, %v4284_v45 }
 0x1a4   : > { %7178 = vst [vmem:[#allocation119_spill] sm:$0xff] %v4327_v53  ;;  %7179 = vst [vmem:[#allocation120_spill] sm:$0xff] %v4331_v15  ;;  %v574_v55 = vpop.permute.xlu1 %573  ;;  %v566_v43 = vpop.permute.xlu0 %565  ;;  %v7185_v60 = vrot.slane %v4327_v53, 1  ;;  %v7188_v2 = vrot.slane %v4331_v15, 1  ;;  %v1224_v53 = vmul.f32 %v3751_v62, %v4284_v45 }
 0x1a5   : > { %576 = vst.msk [vmem:[#allocation5 + $0x12] sm:$0x1] %vm338_vm3, %v574_v55  ;;  %568 = vst.msk [vmem:[#allocation4 + $0x12] sm:$0x1] %vm338_vm3, %v566_v43  ;;  %v4359_v43 = vmul.f32 %v3918_v21, %v4284_v45  ;;  %v6940_v13 = vrot.slane %v4355_v40, 5 }
 0x1a6   : > { %v4369_v48 = vsel %vm698_vm5, %v7186_v49, %v7185_v60  ;;  %v4376_v0 = vsel %vm698_vm5, %v7189_v46, %v7188_v2  ;;  %v4386_v60 = vmul.f32 %v3976_v18, %v4284_v45  ;;  %v7195_v49 = vstv %s7182_s7  ;;  %s7903_s7 = smov 16  }
 0x1a7   : > { %7184 = vst [vmem:[#allocation124_spill] sm:$0xff] %v4359_v43  ;;  %1191 = vrot.lane.b32.xlu1 %v1184_v11, %s7177_s17  ;;  %7187 = vst [vmem:[#allocation125_spill] sm:$0xff] %v4369_v48  ;;  %v4380_v11 = vmul.f32 %v4049_v16, %v3716_v51  ;;  %v4392_v46 = vmul.f32 %v7195_v49, %v4284_v45  ;;  %v4396_v51 = vmul.f32 %v4052_v1, %v4351_v14 }
 0x1a8   : > { %7191 = vst [vmem:[#allocation126_spill] sm:$0xff] %v4376_v0  ;;  %v7197_v2 = vstv %s3892_s6  ;;  %v4408_v0 = vsel %vm674_vm6, %v7199_v7, %v6940_v13  ;;  %v7201_v8 = vrot.slane %v4359_v43, 5  ;;  %v7202_v49 = vrot.slane %v4148_v56, 5 }
 0x1a9   : > { %7193 = vst [vmem:[#allocation127_spill] sm:$0xff] %v4380_v11  ;;  %7196 = vst [vmem:[#allocation128_spill] sm:$0xff] %v4396_v51  ;;  %v4401_v55 = vmul.f32 %v7197_v2, %v4351_v14  ;;  %v4420_v2 = vmul.f32 %v4056_v10, %v4351_v14  ;;  %v4427_v7 = vmul.f32 %v7205_v3, %v4284_v45  ;;  %v7206_v13 = vstv %s7192_s24  ;;  %s7905_s24 = smov 48  }
 0x1aa   : > { %7200 = vst [vmem:[#allocation130_spill] sm:$0xff] %v4408_v0  ;;  %v4415_v15 = vsel %vm674_vm6, %v7202_v49, %v7201_v8  ;;  %v4432_v43 = vmul.f32 %v7206_v13, %v4284_v45  ;;  %v7208_v56 = vstv %s7194_s23  ;;  %v1204_v1 = vmul.f32 %v3718_v52, %v4284_v45  ;;  %s7906_s23 = smov 64  }
 0x1ab   : > { %7198 = vst [vmem:[#allocation129_spill] sm:$0xff] %v4401_v55  ;;  %7203 = vst [vmem:[#allocation131_spill] sm:$0xff] %v4415_v15  ;;  %v4437_v8 = vmul.f32 %v7208_v56, %v4284_v45  ;;  %v4445_v15 = vmul.f32 %v3966_v33, %v4284_v45  ;;  %v4449_v3 = vmul.f32 %v3909_v17, %v4284_v45  ;;  %v7211_v13 = vrot.slane %v4386_v60, 2 }
 0x1ac   : > { %7204 = vst [vmem:[#allocation132_spill] sm:$0xff] %v4420_v2  ;;  %7207 = vst [vmem:[#allocation133_spill] sm:$0xff] %v4432_v43  ;;  %v4439_v49 = vld [vmem:[#allocation4 + $0x10] sm:$0x3f]  ;;  %v7212_v10 = vrot.slane %v4155_v35, 2  ;;  %v4465_v55 = vmul.f32 %v3774_v5, %v4284_v45  ;;  %v905_v51 = vmul.f32 %v3925_v22, %v4284_v45  ;;  %v930_v35 = vmul.f32 %v3928_v23, %v4284_v45 }
 0x1ad   : > { %7209 = vst [vmem:[#allocation134_spill] sm:$0xff] %v4437_v8  ;;  %7210 = vst [vmem:[#allocation135_spill] sm:$0xff] %v4449_v3  ;;  %v1205_v0 = vmul.f32 %v3718_v52, %v4439_v49  ;;  %v1185_v48 = vmul.f32 %v3738_v57, %v4439_v49  ;;  %v4475_v52 = vmul.f32 %v3979_v36, %v4284_v45 }
 0x1ae   : > { %v4456_v56 = vsel %vm888_vm7, %v7212_v10, %v7211_v13  ;;  %v955_v10 = vmul.f32 %v3931_v24, %v4284_v45  ;;  %v4481_v57 = vmul.f32 %v3909_v17, %v4439_v49  ;;  %v4488_v14 = vmul.f32 %v3912_v19, %v4439_v49 }
 0x1af   : > { %7213 = vst [vmem:[#allocation136_spill] sm:$0xff] %v4456_v56  ;;  %1213 = vrot.lane.b32.xlu1 %v1205_v0, %s7177_s17  ;;  %1193 = vrot.lane.b32.xlu0 %v1185_v48, %s7177_s17  ;;  %v4492_v16 = vmul.f32 %v3915_v20, %v4439_v49  ;;  %v4496_v0 = vmul.f32 %v3918_v21, %v4439_v49  ;;  %v911_v56 = vrot.slane %v905_v51, 2  ;;  %v936_v2 = vrot.slane %v930_v35, 2 }
 0x1b0   : > { %7214 = vst [vmem:[#allocation137_spill] sm:$0xff] %v4481_v57  ;;  %v4500_v17 = vmul.f32 %v3925_v22, %v4439_v49  ;;  %v4504_v48 = vmul.f32 %v3928_v23, %v4439_v49  ;;  %v4508_v19 = vmul.f32 %v3931_v24, %v4439_v49  ;;  %v4512_v20 = vmul.f32 %v3934_v25, %v4439_v49 }
 0x1b1   : > { %v961_v13 = vrot.slane %v955_v10, 2  ;;  %v986_v22 = vrot.slane %v4475_v52, 6  ;;  %v1225_v23 = vmul.f32 %v3751_v62, %v4439_v49  ;;  %v4523_v3 = vmul.f32 %v3941_v26, %v4439_v49 }
 0x1b2   : > { %v4527_v51 = vmul.f32 %v3740_v58, %v4284_v45  ;;  %v4538_v24 = vmul.f32 %v3944_v27, %v4439_v49  ;;  %v4542_v11 = vmul.f32 %v3947_v28, %v4439_v49  ;;  %v4546_v10 = vmul.f32 %v3950_v29, %v4439_v49 }
 0x1b3   : > { %1231 = vrot.lane.b32.xlu1 %v1224_v53, %s7177_s17  ;;  %1211 = vrot.lane.b32.xlu0 %v1204_v1, %s7177_s17  ;;  %v4550_v53 = vmul.f32 %v3957_v30, %v4439_v49  ;;  %v791_v35 = vmul.f32 %v3973_v34, %v4439_v49  ;;  %v7217_v21 = vrot.slane %v4481_v57, 1  ;;  %v4561_v62 = vmul.f32 %v3960_v31, %v4439_v49  ;;  %v7218_v57 = vld [vmem:[#allocation97_spill] sm:$0xff] }
 0x1b4   : > { %7215 = vst [vmem:[#allocation138_spill] sm:$0xff] %v4527_v51  ;;  %v4565_v1 = vmul.f32 %v3963_v32, %v4439_v49  ;;  %v859_v34 = vmul.f32 %v3774_v5, %v4439_v49  ;;  %v7221_v12 = vrot.slane %v4500_v17, 2  ;;  %v7222_v37 = vrot.slane %v4504_v48, 2 }
 0x1b5   : > { %v798_v50 = vrot.slane %v791_v35, 5  ;;  %v7223_v35 = vld [vmem:[#allocation98_spill] sm:$0xff] }
 0x1b6   : > { %v4579_v54 = vsel %vm888_vm7, %v911_v56, %v7221_v12  ;;  %v866_v8 = vrot.slane %v859_v34, 6  ;;  %v4584_v5 = vsel %vm888_vm7, %v936_v2, %v7222_v37  ;;  %v7224_v41 = vrot.slane %v7223_v35, 2 }
 0x1b7   : > { %1233 = vrot.lane.b32.xlu0 %v1225_v23, %s7177_s17  ;;  %729 = vrot.lane.b32.xlu1 %v7217_v21, %s7216_s28  ;;  %v884_v23 = vmul.f32 %v3976_v18, %v4439_v49  ;;  %v7219_v21 = vrot.slane %v7218_v57, 2  ;;  %v7225_v57 = vld [vmem:[#allocation102_spill] sm:$0xff]  ;;  %v7229_v34 = vrot.slane %v4508_v19, 2  ;;  %v1120_v35 = vmul.f32 %v3941_v26, %v4284_v45 }
 0x1b8   : > { %v4589_v18 = vsel %vm888_vm7, %v7224_v41, %v936_v2  ;;  %v7226_v38 = vrot.slane %v7225_v57, 2  ;;  %v981_v41 = vmul.f32 %v3979_v36, %v4439_v49  ;;  %v7231_v2 = vrot.slane %v4392_v46, 5 }
 0x1b9   : > { %v4574_v52 = vsel %vm888_vm7, %v7219_v21, %v911_v56  ;;  %v892_v56 = vrot.slane %v884_v23, 2  ;;  %v4604_v37 = vsel %vm888_vm7, %v961_v13, %v7229_v34  ;;  %v7237_v57 = vrot.slane %v4386_v60, 2 }
 0x1ba   : > { %7220 = vst [vmem:[#allocation97_spill] sm:$0xff] %v4574_v52  ;;  %v4594_v21 = vsel %vm888_vm7, %v7226_v38, %v961_v13  ;;  %v7228_v52 = vrot.slane %v4355_v40, 5  ;;  %7230 = vst [vmem:[#allocation102_spill] sm:$0xff] %v4604_v37  ;;  %v7232_v38 = vrot.slane %v4488_v14, 1  ;;  %v7233_v40 = vrot.slane %v4465_v55, 6  ;;  %v7234_v13 = vld [vmem:[#allocation103_spill] sm:$0xff] }
 0x1bb   : > { %7227 = vst [vmem:[#allocation98_spill] sm:$0xff] %v4594_v21  ;;  %682 = vrot.lane.b32.xlu0 %v7231_v2, %s7216_s28  ;;  %v7235_v23 = vrot.slane %v7234_v13, 6  ;;  %v4630_v34 = vsel %vm888_vm7, %v7237_v57, %v892_v56  ;;  %v988_v2 = vrot.slane %v981_v41, 6  ;;  %v7240_v13 = vld [vmem:[#allocation57_spill] sm:$0xff]  ;;  %v1095_v56 = vmul.f32 %v3934_v25, %v4284_v45 }
 0x1bc   : > { %v4599_v12 = vsel %vm674_vm6, %v7228_v52, %v798_v50  ;;  %779 = vrot.lane.b32.xlu1 %v7232_v38, %s7216_s28  ;;  %v694_v50 = vmul.f32 %v3966_v33, %v4439_v49  ;;  %v4619_v52 = vsel %vm839_vm8, %v7233_v40, %v866_v8  ;;  %v1024_v33 = vmul.f32 %v3740_v58, %v4439_v49  ;;  %v7238_v38 = vld [vmem:[#allocation38_spill] sm:$0xff] }
 0x1bd   : > { %v4624_v36 = vsel %vm839_vm8, %v7235_v23, %v986_v22  ;;  %v4636_v8 = vmul.f32 %v7238_v38, %v4284_v45  ;;  %v1049_v40 = vmul.f32 %v7238_v38, %v4439_v49  ;;  %v1073_v23 = vmul.f32 %v7240_v13, %v4284_v45 }
 0x1be   : > { %7236 = vst [vmem:[#allocation103_spill] sm:$0xff] %v4624_v36  ;;  %v1074_v60 = vmul.f32 %v7240_v13, %v4439_v49  ;;  %v4647_v41 = vsel %vm839_vm8, %v986_v22, %v988_v2  ;;  %v1031_v58 = vrot.slane %v1024_v33, 7  ;;  %v7242_v38 = vrot.slane %v4492_v16, 1 }
 0x1bf   : > { %7239 = vst [vmem:[#allocation38_spill] sm:$0xff] %v4636_v8  ;;  %7241 = vst [vmem:[#allocation57_spill] sm:$0xff] %v4647_v41  ;;  %v7244_v36 = vrot.slane %v4427_v7, 6  ;;  %v1056_v13 = vrot.slane %v1049_v40, 7  ;;  %v1080_v37 = vrot.slane %v1073_v23, 3  ;;  %v1101_v21 = vrot.slane %v1095_v56, 3 }
 0x1c0   : > { %754 = vrot.lane.b32.xlu0 %v7242_v38, %s7216_s28  ;;  %v1082_v25 = vrot.slane %v1074_v60, 3  ;;  %v6962_v22 = vrot.slane %v4538_v24, 3  ;;  %v7245_v2 = vrot.slane %v4527_v51, 7  ;;  %v1126_v26 = vrot.slane %v1120_v35, 3  ;;  %v5183_v51 = vld [vmem:[#allocation5 + $0x10] sm:$0x3f] }
 0x1c1   : > { %847 = vrot.lane.b32.xlu1 %v7244_v36, %s7243_s29  ;;  %v1145_v57 = vmul.f32 %v3944_v27, %v4284_v45  ;;  %v7247_v38 = vrot.slane %v4636_v8, 7  ;;  %v7250_v40 = vrot.slane %v4202_v61, 3  ;;  %v7252_v60 = vrot.slane %v4512_v20, 3 }
 0x1c2   : > { %v4662_v33 = vsel %vm1004_vm10, %v7245_v2, %v1031_v58  ;;  %v4672_v36 = vsel %vm1078_vm9, %v1080_v37, %v1082_v25  ;;  %v7254_v27 = vrot.slane %v4206_v9, 3  ;;  %v7256_v58 = vld [vmem:[#allocation104_spill] sm:$0xff]  ;;  %v7259_v61 = vrot.slane %v4523_v3, 3 }
 0x1c3   : > { %7246 = vst [vmem:[#allocation139_spill] sm:$0xff] %v4662_v33  ;;  %v4669_v41 = vsel %vm1004_vm10, %v7247_v38, %v1056_v13  ;;  %7249 = vst [vmem:[#allocation141_spill] sm:$0xff] %v4672_v36  ;;  %v4677_v23 = vsel %vm1078_vm9, %v7250_v40, %v1080_v37  ;;  %v4682_v35 = vsel %vm1078_vm9, %v1101_v21, %v7252_v60  ;;  %v7257_v13 = vrot.slane %v7256_v58, 3  ;;  %v7264_v40 = vld [vmem:[#allocation35_spill] sm:$0xff]  ;;  %v7430_v36 = vld [vmem:[#allocation89_spill] sm:$0xff] }
 0x1c4   : > { %7248 = vst [vmem:[#allocation140_spill] sm:$0xff] %v4669_v41  ;;  %7251 = vst [vmem:[#allocation142_spill] sm:$0xff] %v4677_v23  ;;  %v4687_v56 = vsel %vm1078_vm9, %v7254_v27, %v1101_v21  ;;  %v4697_v37 = vsel %vm1078_vm9, %v1126_v26, %v7259_v61  ;;  %v1151_v2 = vrot.slane %v1145_v57, 3  ;;  %v7261_v38 = vrot.slane %v4496_v0, 5  ;;  %v7266_v57 = vld [vmem:[#allocation59_spill] sm:$0xff] }
 0x1c5   : > { %7253 = vst [vmem:[#allocation143_spill] sm:$0xff] %v4682_v35  ;;  %7255 = vst [vmem:[#allocation144_spill] sm:$0xff] %v4687_v56  ;;  %v4692_v25 = vsel %vm1078_vm9, %v7257_v13, %v1126_v26  ;;  %v7262_v9 = vrot.slane %v4500_v17, 2  ;;  %v7263_v21 = vrot.slane %v4392_v46, 5  ;;  %v7265_v60 = vrot.slane %v7264_v40, 5  ;;  %v7428_v56 = vld [vmem:[#allocation120_spill] sm:$0xff] }
 0x1c6   : > { %7258 = vst [vmem:[#allocation104_spill] sm:$0xff] %v4692_v25  ;;  %7260 = vst [vmem:[#allocation145_spill] sm:$0xff] %v4697_v37  ;;  %825 = vrot.lane.b32.xlu0 %v7261_v38, %s7216_s28  ;;  %v702_v26 = vrot.slane %v694_v50, 1  ;;  %v1244_v13 = vmul.f32 %v7266_v57, %v4284_v45  ;;  %v4719_v17 = vsel %vm1078_vm9, %v1151_v2, %v6962_v22  ;;  %v7268_v46 = vrot.slane %v4218_v47, 3 }
 0x1c7   : > { %919 = vrot.lane.b32.xlu1 %v7262_v9, %s7243_s29  ;;  %v4710_v27 = vsel %vm674_vm6, %v7265_v60, %v7263_v21  ;;  %7267 = vst [vmem:[#allocation35_spill] sm:$0xff] %v4719_v17  ;;  %v1245_v9 = vmul.f32 %v7266_v57, %v4439_v49  ;;  %v1273_v50 = vrot.slane %v4546_v10, 4  ;;  %v1265_v60 = vmul.f32 %v3950_v29, %v4284_v45 }
 0x1c8   : > { %v4724_v38 = vsel %vm1078_vm9, %v7268_v46, %v1151_v2  ;;  %v1250_v40 = vrot.slane %v1244_v13, 4  ;;  %v1290_v47 = vmul.f32 %v3947_v28, %v4284_v45  ;;  %v7270_v2 = vrot.slane %v4504_v48, 2  ;;  %v7275_v28 = vld [vmem:[#allocation61_spill] sm:$0xff] }
 0x1c9   : > { %7269 = vst [vmem:[#allocation59_spill] sm:$0xff] %v4724_v38  ;;  %v1252_v58 = vrot.slane %v1245_v9, 4  ;;  %v7271_v10 = vrot.slane %v4508_v19, 2  ;;  %v7272_v57 = vrot.slane %v4445_v15, 1  ;;  %v7273_v13 = vrot.slane %v4222_v63, 4  ;;  %v7425_v38 = vld [vmem:[#allocation119_spill] sm:$0xff] }
 0x1ca   : > { %944 = vrot.lane.b32.xlu0 %v7270_v2, %s7243_s29  ;;  %v1271_v9 = vrot.slane %v1265_v60, 4  ;;  %v1336_v61 = vmul.f32 %v7275_v28, %v4284_v45  ;;  %v4756_v48 = vmul.f32 %v3992_v39, %v4439_v49  ;;  %v1296_v2 = vrot.slane %v1290_v47, 4 }
 0x1cb   : > { %969 = vrot.lane.b32.xlu1 %v7271_v10, %s7243_s29  ;;  %v4745_v29 = vsel %vm698_vm5, %v7272_v57, %v702_v26  ;;  %v4750_v46 = vsel %vm192_vm0, %v7273_v13, %v1250_v40  ;;  %v4759_v19 = vsel %vm192_vm0, %v1250_v40, %v1252_v58  ;;  %v1337_v26 = vmul.f32 %v7275_v28, %v4439_v49  ;;  %v7282_v40 = vld [vmem:[#allocation105_spill] sm:$0xff] }
 0x1cc   : > { %7274 = vst [vmem:[#allocation146_spill] sm:$0xff] %v4750_v46  ;;  %7276 = vst [vmem:[#allocation61_spill] sm:$0xff] %v4756_v48  ;;  %v4764_v63 = vsel %vm192_vm0, %v1271_v9, %v1273_v50  ;;  %v7279_v10 = vrot.slane %v4227_v4, 4  ;;  %v1342_v57 = vrot.slane %v1336_v61, 1  ;;  %v1357_v13 = vmul.f32 %v3957_v30, %v4284_v45 }
 0x1cd   : > { %7277 = vst [vmem:[#allocation147_spill] sm:$0xff] %v4759_v19  ;;  %7278 = vst [vmem:[#allocation148_spill] sm:$0xff] %v4764_v63  ;;  %v4775_v58 = vmul.f32 %v4005_v42, %v4439_v49  ;;  %v7283_v47 = vrot.slane %v7282_v40, 4  ;;  %v7285_v22 = vrot.slane %v4542_v11, 4  ;;  %v7288_v61 = vrot.slane %v4432_v43, 7  ;;  %v7422_v63 = vld [vmem:[#allocation88_spill] sm:$0xff] }
 0x1ce   : > { %v4769_v60 = vsel %vm192_vm0, %v7279_v10, %v1271_v9  ;;  %v1344_v9 = vrot.slane %v1337_v26, 1  ;;  %v7289_v30 = vrot.slane %v4512_v20, 3  ;;  %v7290_v10 = vld [vmem:[#allocation106_spill] sm:$0xff]  ;;  %v7424_v19 = vrot.slane %v4492_v16, 1 }
 0x1cf   : > { %7280 = vst [vmem:[#allocation149_spill] sm:$0xff] %v4769_v60  ;;  %7281 = vst [vmem:[#allocation150_spill] sm:$0xff] %v4775_v58  ;;  %v4780_v28 = vsel %vm192_vm0, %v7283_v47, %v1296_v2  ;;  %v4785_v4 = vsel %vm192_vm0, %v1296_v2, %v7285_v22  ;;  %1012 = vrot.lane.b32.xlu0 %v7288_v61, %s7287_s16  ;;  %v7291_v21 = vrot.slane %v7290_v10, 1  ;;  %v1363_v47 = vrot.slane %v1357_v13, 1  ;;  %v7294_v26 = vld [vmem:[#allocation62_spill] sm:$0xff] }
 0x1d0   : > { %7284 = vst [vmem:[#allocation105_spill] sm:$0xff] %v4780_v28  ;;  %7286 = vst [vmem:[#allocation151_spill] sm:$0xff] %v4785_v4  ;;  %1109 = vrot.lane.b32.xlu1 %v7289_v30, %s7287_s16  ;;  %v1382_v28 = vmul.f32 %v3963_v32, %v4284_v45  ;;  %v1407_v22 = vmul.f32 %v3960_v31, %v4284_v45  ;;  %v4803_v2 = vsel %vm698_vm5, %v1342_v57, %v1344_v9  ;;  %v7295_v30 = vld [vmem:[#allocation63_spill] sm:$0xff] }
 0x1d1   : > { %v4796_v40 = vsel %vm698_vm5, %v7291_v21, %v1342_v57  ;;  %7293 = vst [vmem:[#allocation152_spill] sm:$0xff] %v4803_v2  ;;  %v1432_v61 = vmul.f32 %v7294_v26, %v4284_v45  ;;  %v1433_v20 = vmul.f32 %v7294_v26, %v4439_v49  ;;  %v1453_v21 = vmul.f32 %v7295_v30, %v4284_v45 }
 0x1d2   : > { %7292 = vst [vmem:[#allocation106_spill] sm:$0xff] %v4796_v40  ;;  %v7296_v13 = vrot.slane %v4550_v53, 1  ;;  %v7298_v32 = vrot.slane %v4240_v6, 1  ;;  %v1388_v57 = vrot.slane %v1382_v28, 1  ;;  %v1413_v9 = vrot.slane %v1407_v22, 1 }
 0x1d3   : > { %v1438_v40 = vrot.slane %v1432_v61, 5  ;;  %v1440_v2 = vrot.slane %v1433_v20, 5  ;;  %v1459_v4 = vrot.slane %v1453_v21, 5  ;;  %v4823_v26 = vmul.f32 %v7295_v30, %v4439_v49 }
 0x1d4   : > { %v4814_v10 = vsel %vm698_vm5, %v1363_v47, %v7296_v13  ;;  %v4819_v31 = vsel %vm698_vm5, %v7298_v32, %v1363_v47  ;;  %v7301_v60 = vrot.slane %v4523_v3, 3  ;;  %v7302_v6 = vrot.slane %v4538_v24, 3  ;;  %v7309_v24 = vld [vmem:[#allocation107_spill] sm:$0xff]  ;;  %v7312_v13 = vld [vmem:[#allocation108_spill] sm:$0xff] }
 0x1d5   : > { %7297 = vst [vmem:[#allocation62_spill] sm:$0xff] %v4814_v10  ;;  %7299 = vst [vmem:[#allocation63_spill] sm:$0xff] %v4819_v31  ;;  %v7303_v47 = vrot.slane %v4244_v59, 1  ;;  %v7305_v61 = vrot.slane %v4565_v1, 1  ;;  %v7307_v3 = vrot.slane %v4561_v62, 1  ;;  %v7310_v30 = vrot.slane %v7309_v24, 1 }
 0x1d6   : > { %7300 = vst [vmem:[#allocation153_spill] sm:$0xff] %v4823_v26  ;;  %1134 = vrot.lane.b32.xlu0 %v7301_v60, %s7287_s16  ;;  %1159 = vrot.lane.b32.xlu1 %v7302_v6, %s7287_s16  ;;  %v7313_v59 = vrot.slane %v7312_v13, 5  ;;  %v4858_v6 = vsel %vm674_vm6, %v1438_v40, %v1440_v2  ;;  %v7323_v28 = vrot.slane %v4542_v11, 4  ;;  %v7326_v11 = vld [vmem:[#allocation60_spill] sm:$0xff]  ;;  %v7418_v31 = vld [vmem:[#allocation86_spill] sm:$0xff]  ;;  %v7426_v17 = vrot.slane %v7425_v38, 1 }
 0x1d7   : > { %v4835_v22 = vsel %vm698_vm5, %v7303_v47, %v1388_v57  ;;  %v4840_v20 = vsel %vm698_vm5, %v1388_v57, %v7305_v61  ;;  %v4845_v60 = vsel %vm698_vm5, %v1413_v9, %v7307_v3  ;;  %v4850_v21 = vsel %vm698_vm5, %v7310_v30, %v1413_v9  ;;  %7315 = vst [vmem:[#allocation157_spill] sm:$0xff] %v4858_v6  ;;  %v7319_v30 = vld [vmem:[#allocation64_spill] sm:$0xff]  ;;  %v7448_v38 = vld [vmem:[#allocation99_spill] sm:$0xff] }
 0x1d8   : > { %7304 = vst [vmem:[#allocation154_spill] sm:$0xff] %v4835_v22  ;;  %7306 = vst [vmem:[#allocation155_spill] sm:$0xff] %v4840_v20  ;;  %v4855_v32 = vsel %vm674_vm6, %v7313_v59, %v1438_v40  ;;  %v7316_v57 = vrot.slane %v4263_v44, 5  ;;  %v6964_v3 = vrot.slane %v4823_v26, 5  ;;  %v7318_v9 = vstv %s7096_s0  ;;  %v7320_v40 = vld [vmem:[#allocation58_spill] sm:$0xff]  ;;  %s7335_s0 = smov 123  }
 0x1d9   : > { %7308 = vst [vmem:[#allocation156_spill] sm:$0xff] %v4845_v60  ;;  %7311 = vst [vmem:[#allocation107_spill] sm:$0xff] %v4850_v21  ;;  %v586_v24 = vmul.f32 %v7318_v9, %v4284_v45  ;;  %v616_v13 = vmul.f32 %v7319_v30, %v4284_v45  ;;  %v617_v59 = vmul.f32 %v7319_v30, %v4439_v49  ;;  %v7417_v20 = vld [vmem:[#allocation85_spill] sm:$0xff]  ;;  %v7427_v25 = vrot.slane %v4488_v14, 1  ;;  %v7439_v14 = vld [vmem:[#allocation126_spill] sm:$0xff] }
 0x1da   : > { %7314 = vst [vmem:[#allocation108_spill] sm:$0xff] %v4855_v32  ;;  %v4863_v47 = vsel %vm674_vm6, %v7316_v57, %v1459_v4  ;;  %v592_v2 = vmul.f32 %v7320_v40, %v4284_v45  ;;  %v633_v44 = vmul.f32 %v3992_v39, %v4284_v45  ;;  %v7321_v57 = vstv %s7100_s13  ;;  %1304 = vrot.lane.b32.xlu0 %v7323_v28, %s7177_s17  ;;  %v7325_v39 = vld [vmem:[#allocation65_spill] sm:$0xff]  ;;  %s4981_s13 = sld [smem:[#allocation6 + $0x5a]] }
 0x1db   : > { %7317 = vst [vmem:[#allocation158_spill] sm:$0xff] %v4863_v47  ;;  %v4881_v61 = vmul.f32 %v7321_v57, %v4284_v45  ;;  %1279 = vrot.lane.b32.xlu1 %v1273_v50, %s7177_s17  ;;  %v4890_v9 = vsel %vm674_vm6, %v1459_v4, %v6964_v3  ;;  %v622_v30 = vrot.slane %v616_v13, 4  ;;  %v652_v40 = vmul.f32 %v4005_v42, %v4284_v45  ;;  %v7327_v50 = vld [vmem:[#allocation110_spill] sm:$0xff] }
 0x1dc   : > { %7324 = vst [vmem:[#allocation159_spill] sm:$0xff] %v4890_v9  ;;  %v1499_v47 = vmul.f32 %v7325_v39, %v4284_v45  ;;  %v624_v57 = vrot.slane %v617_v59, 4  ;;  %v639_v6 = vrot.slane %v633_v44, 4  ;;  %v600_v28 = vmul.f32 %v7326_v11, %v4284_v45  ;;  %v7329_v9 = vld [vmem:[#allocation112_spill] sm:$0xff]  ;;  %v7332_v11 = vld [vmem:[#allocation109_spill] sm:$0xff] }
 0x1dd   : > { %7322 = vst [vmem:[#allocation64_spill] sm:$0xff] %v4881_v61  ;;  %v6966_v32 = vrot.slane %v4881_v61, 6  ;;  %v7328_v21 = vrot.slane %v7327_v50, 4  ;;  %v658_v4 = vrot.slane %v652_v40, 4  ;;  %v1500_v13 = vmul.f32 %v7325_v39, %v4439_v49  ;;  %v7337_v40 = vld [vmem:[#allocation134_spill] sm:$0xff]  ;;  %v7341_v39 = vld [vmem:[#allocation111_spill] sm:$0xff] }
 0x1de   : > { %v1505_v3 = vrot.slane %v1499_v47, 6  ;;  %v625_v42 = vsel %vm192_vm0, %v622_v30, %v624_v57  ;;  %v7331_v59 = vrot.slane %v4756_v48, 4  ;;  %v7333_v50 = vrot.slane %v7332_v11, 6  ;;  %v7343_v48 = vld [vmem:[#allocation116_spill] sm:$0xff] }
 0x1df   : > { %v623_v26 = vsel %vm192_vm0, %v7328_v21, %v622_v30  ;;  %v7336_v47 = vrot.slane %v4550_v53, 1  ;;  %v7338_v30 = vrot.slane %v7337_v40, 5  ;;  %v7342_v57 = vrot.slane %v7341_v39, 4 }
 0x1e0   : > { %v4906_v60 = vadd.f32 %v623_v26, %v7329_v9  ;;  %v642_v44 = vsel %vm192_vm0, %v639_v6, %v7331_v59  ;;  %v4916_v21 = vsel %vm839_vm8, %v7333_v50, %v6966_v32  ;;  %v4924_v26 = vadd.f32 %v625_v42, %v586_v24  ;;  %v7345_v32 = vld [vmem:[#allocation113_spill] sm:$0xff] }
 0x1e1   : > { %7334 = vst [vmem:[#allocation110_spill] sm:$0xff] %v4916_v21  ;;  %1371 = vrot.lane.b32.xlu0 %v7336_v47, %s7335_s0  ;;  %1325 = vrot.lane.b32.xlu1 %v7338_v30, %s7335_s0  ;;  %v4926_v9 = vadd.f32 %v642_v44, %v592_v2  ;;  %v640_v59 = vsel %vm192_vm0, %v7342_v57, %v639_v6  ;;  %v7346_v61 = vrot.slane %v7345_v32, 4  ;;  %v7347_v47 = vld [vmem:[#allocation114_spill] sm:$0xff]  ;;  %v7350_v24 = vrot.slane %v4775_v58, 4  ;;  %v7351_v42 = vld [vmem:[#allocation121_spill] sm:$0xff]  ;;  %v7358_v57 = vld [vmem:[#allocation68_spill] sm:$0xff] }
 0x1e2   : > { %7330 = vst [vmem:[#allocation65_spill] sm:$0xff] %v4906_v60  ;;  %7339 = vst [vmem:[#allocation112_spill] sm:$0xff] %v4924_v26  ;;  %v1507_v60 = vrot.slane %v1500_v13, 6  ;;  %v4932_v50 = vadd.f32 %v640_v59, %v7343_v48  ;;  %v7348_v21 = vrot.slane %v7347_v47, 6  ;;  %v7355_v32 = vld [vmem:[#allocation66_spill] sm:$0xff]  ;;  %v7385_v58 = vstv %s3898_s12  ;;  %v7415_v47 = vld [vmem:[#allocation84_spill] sm:$0xff] }
 0x1e3   : > { %7340 = vst [vmem:[#allocation160_spill] sm:$0xff] %v4926_v9  ;;  %v659_v53 = vsel %vm192_vm0, %v7346_v61, %v658_v4  ;;  %v661_v2 = vsel %vm192_vm0, %v658_v4, %v7350_v24  ;;  %v1524_v61 = vmul.f32 %v7355_v32, %v4284_v45  ;;  %v1525_v13 = vmul.f32 %v7355_v32, %v4439_v49  ;;  %v7362_v24 = vld [vmem:[#allocation69_spill] sm:$0xff] }
 0x1e4   : > { %7344 = vst [vmem:[#allocation111_spill] sm:$0xff] %v4932_v50  ;;  %v4940_v30 = vsel %vm839_vm8, %v7348_v21, %v1505_v3  ;;  %v4946_v44 = vadd.f32 %v659_v53, %v7351_v42  ;;  %v4948_v6 = vadd.f32 %v661_v2, %v600_v28  ;;  %v4951_v48 = vsel %vm839_vm8, %v1505_v3, %v1507_v60  ;;  %v7356_v21 = vld [vmem:[#allocation67_spill] sm:$0xff]  ;;  %v7368_v9 = vld [vmem:[#allocation117_spill] sm:$0xff] }
 0x1e5   : > { %7349 = vst [vmem:[#allocation116_spill] sm:$0xff] %v4940_v30  ;;  %7354 = vst [vmem:[#allocation161_spill] sm:$0xff] %v4951_v48  ;;  %v1545_v39 = vmul.f32 %v7356_v21, %v4284_v45  ;;  %v4961_v4 = vmul.f32 %v7356_v21, %v4439_v49  ;;  %v1570_v28 = vmul.f32 %v7358_v57, %v4284_v45  ;;  %v7359_v60 = vrot.slane %v4561_v62, 1  ;;  %v7410_v30 = vld [vmem:[#allocation79_spill] sm:$0xff] }
 0x1e6   : > { %7352 = vst [vmem:[#allocation113_spill] sm:$0xff] %v4946_v44  ;;  %7353 = vst [vmem:[#allocation121_spill] sm:$0xff] %v4948_v6  ;;  %v7360_v3 = vrot.slane %v4565_v1, 1  ;;  %v1530_v59 = vrot.slane %v1524_v61, 2  ;;  %v4973_v53 = vmul.f32 %v7358_v57, %v4439_v49  ;;  %v1595_v2 = vmul.f32 %v7362_v24, %v4284_v45  ;;  %v7414_v48 = vld [vmem:[#allocation83_spill] sm:$0xff] }
 0x1e7   : > { %7357 = vst [vmem:[#allocation66_spill] sm:$0xff] %v4961_v4  ;;  %1421 = vrot.lane.b32.xlu0 %v7359_v60, %s7335_s0  ;;  %v4979_v42 = vmul.f32 %v7362_v24, %v4439_v49  ;;  %v1532_v62 = vrot.slane %v1525_v13, 2  ;;  %v1551_v32 = vrot.slane %v1545_v39, 2  ;;  %v6968_v21 = vrot.slane %v4961_v4, 2  ;;  %v7364_v60 = vld [vmem:[#allocation115_spill] sm:$0xff] }
 0x1e8   : > { %1396 = vrot.lane.b32.xlu1 %v7360_v3, %s7335_s0  ;;  %7361 = vst [vmem:[#allocation67_spill] sm:$0xff] %v4973_v53  ;;  %v1576_v1 = vrot.slane %v1570_v28, 2  ;;  %v7365_v61 = vrot.slane %v7364_v60, 2  ;;  %v6969_v57 = vrot.slane %v4973_v53, 2  ;;  %v1601_v26 = vrot.slane %v1595_v2, 2  ;;  %v7372_v60 = vld [vmem:[#allocation118_spill] sm:$0xff] }
 0x1e9   : > { %7363 = vst [vmem:[#allocation68_spill] sm:$0xff] %v4979_v42  ;;  %v6971_v6 = vrot.slane %v4979_v42, 2  ;;  %v4992_v24 = vsel %vm888_vm7, %v1530_v59, %v1532_v62  ;;  %v7369_v13 = vrot.slane %v7368_v9, 2  ;;  %v5002_v28 = vsel %vm888_vm7, %v1551_v32, %v6968_v21 }
 0x1ea   : > { %v4987_v3 = vsel %vm888_vm7, %v7365_v61, %v1530_v59  ;;  %7367 = vst [vmem:[#allocation115_spill] sm:$0xff] %v4992_v24  ;;  %7371 = vst [vmem:[#allocation162_spill] sm:$0xff] %v5002_v28  ;;  %v7373_v61 = vrot.slane %v7372_v60, 2  ;;  %v5016_v9 = vsel %vm888_vm7, %v1576_v1, %v6969_v57  ;;  %v7376_v59 = vld [vmem:[#allocation122_spill] sm:$0xff]  ;;  %v7380_v60 = vld [vmem:[#allocation127_spill] sm:$0xff]  ;;  %v749_v37 = vsel %vm698_vm5, %v7426_v17, %v7424_v19 }
 0x1eb   : > { %7366 = vst [vmem:[#allocation69_spill] sm:$0xff] %v4987_v3  ;;  %v4997_v39 = vsel %vm888_vm7, %v7369_v13, %v1551_v32  ;;  %706 = vrot.lane.b32.xlu0 %v4745_v29, %s7216_s28  ;;  %7375 = vst [vmem:[#allocation163_spill] sm:$0xff] %v5016_v9  ;;  %v7377_v62 = vrot.slane %v7376_v59, 2  ;;  %v5026_v13 = vsel %vm888_vm7, %v1601_v26, %v6971_v6  ;;  %v7382_v29 = vld [vmem:[#allocation70_spill] sm:$0xff]  ;;  %v7383_v59 = vld [vmem:[#allocation123_spill] sm:$0xff]  ;;  %v7429_v35 = vrot.slane %v7428_v56, 1 }
 0x1ec   : > { %7370 = vst [vmem:[#allocation117_spill] sm:$0xff] %v4997_v39  ;;  %v5007_v2 = vsel %vm888_vm7, %v7373_v61, %v1576_v1  ;;  %680 = vrot.lane.b32.xlu1 %v4710_v27, %s7216_s28  ;;  %7379 = vst [vmem:[#allocation164_spill] sm:$0xff] %v5026_v13  ;;  %v1625_v27 = vrot.slane %v7380_v60, 6  ;;  %v7381_v61 = vld [vmem:[#allocation135_spill] sm:$0xff]  ;;  %v1620_v44 = vmul.f32 %v7382_v29, %v4284_v45  ;;  %v7384_v57 = vld [vmem:[#allocation73_spill] sm:$0xff]  ;;  %v7432_v33 = vstv %s4018_s15 }
 0x1ed   : > { %7374 = vst [vmem:[#allocation118_spill] sm:$0xff] %v5007_v2  ;;  %v5021_v32 = vsel %vm888_vm7, %v7377_v62, %v1601_v26  ;;  %v721_v21 = vrot.slane %v7381_v61, 1  ;;  %v1621_v1 = vmul.f32 %v7382_v29, %v4439_v49  ;;  %v5036_v62 = vmul.f32 %v7384_v57, %v7383_v59  ;;  %v7387_v26 = vld [vmem:[#allocation74_spill] sm:$0xff]  ;;  %v7388_v61 = vld [vmem:[#allocation75_spill] sm:$0xff]  ;;  %v7390_v45 = vld [vmem:[#allocation76_spill] sm:$0xff] }
 0x1ee   : > { %7378 = vst [vmem:[#allocation122_spill] sm:$0xff] %v5021_v32  ;;  %v5041_v50 = vmul.f32 %v7385_v58, %v7383_v59  ;;  %v5045_v60 = vmul.f32 %v7387_v26, %v7383_v59  ;;  %v5049_v6 = vmul.f32 %v7388_v61, %v7383_v59  ;;  %v5053_v42 = vmul.f32 %v7390_v45, %v7383_v59  ;;  %v7393_v29 = vld [vmem:[#allocation90_spill] sm:$0xff]  ;;  %v7395_v58 = vld [vmem:[#allocation137_spill] sm:$0xff]  ;;  %v7398_v24 = vld [vmem:[#allocation128_spill] sm:$0xff] }
 0x1ef   : > { %v7392_v49 = vrot.slane %v4445_v15, 1  ;;  %v7394_v13 = vrot.slane %v7393_v29, 1  ;;  %v7396_v53 = vrot.slane %v7395_v58, 1  ;;  %v1626_v2 = vrot.slane %v1620_v44, 6  ;;  %v7397_v28 = vld [vmem:[#allocation101_spill] sm:$0xff]  ;;  %v5170_v17 = vld [vmem:[#allocation5 + $0x8] sm:$0xff] }
 0x1f0   : > { %7386 = vst [vmem:[#allocation127_spill] sm:$0xff] %v5041_v50  ;;  %7389 = vst [vmem:[#allocation135_spill] sm:$0xff] %v5049_v6  ;;  %v1628_v4 = vrot.slane %v1621_v1, 6  ;;  %v720_v39 = vrot.slane %v7397_v28, 1  ;;  %v7399_v15 = vld [vmem:[#allocation77_spill] sm:$0xff]  ;;  %v7406_v28 = vld [vmem:[#allocation132_spill] sm:$0xff]  ;;  %v5103_v3 = vmul.f32 %v7410_v30, %v7383_v59  ;;  %v5124_v11 = vmul.f32 %v7415_v47, %v7383_v59 }
 0x1f1   : > { %7391 = vst [vmem:[#allocation70_spill] sm:$0xff] %v5053_v42  ;;  %v701_v32 = vsel %vm698_vm5, %v7394_v13, %v7392_v49  ;;  %v724_v9 = vsel %vm698_vm5, %v721_v21, %v7396_v53  ;;  %v5069_v29 = vmul.f32 %v7399_v15, %v7383_v59  ;;  %v5072_v13 = vstv %s4981_s13  ;;  %v7404_v53 = vld [vmem:[#allocation129_spill] sm:$0xff]  ;;  %v7440_v56 = vld [vmem:[#allocation130_spill] sm:$0xff]  ;;  %s7935_s13 = sld [smem:[#allocation23_spill]] }
 0x1f2   : > { %704 = vrot.lane.b32.xlu1 %v701_v32, %s7216_s28  ;;  %727 = vrot.lane.b32.xlu0 %v724_v9, %s7216_s28  ;;  %7401 = vst [vmem:[#allocation73_spill] sm:$0xff] %v5072_v13  ;;  %v5075_v49 = vsel %vm839_vm8, %v1625_v27, %v1626_v2  ;;  %v5078_v44 = vsel %vm839_vm8, %v1626_v2, %v1628_v4  ;;  %v7405_v9 = vld [vmem:[#allocation78_spill] sm:$0xff]  ;;  %v7407_v2 = vstv %s3922_s25  ;;  %v7409_v58 = vld [vmem:[#allocation125_spill] sm:$0xff]  ;;  %7416 = vst [vmem:[#allocation90_spill] sm:$0xff] %v5124_v11 }
 0x1f3   : > { %7400 = vst [vmem:[#allocation123_spill] sm:$0xff] %v5069_v29  ;;  %7402 = vst [vmem:[#allocation74_spill] sm:$0xff] %v5075_v49  ;;  %v5083_v1 = vmul.f32 %v7405_v9, %v7383_v59  ;;  %v722_v27 = vsel %vm698_vm5, %v720_v39, %v721_v21  ;;  %v5095_v32 = vmul.f32 %v7407_v2, %v7383_v59  ;;  %v7411_v21 = vld [vmem:[#allocation80_spill] sm:$0xff]  ;;  %v7412_v4 = vld [vmem:[#allocation81_spill] sm:$0xff] }
 0x1f4   : > { %7403 = vst [vmem:[#allocation75_spill] sm:$0xff] %v5078_v44  ;;  %v5107_v39 = vmul.f32 %v7411_v21, %v7383_v59  ;;  %v5111_v2 = vmul.f32 %v7412_v4, %v7383_v59  ;;  %v7413_v49 = vld [vmem:[#allocation82_spill] sm:$0xff]  ;;  %v5120_v44 = vmul.f32 %v7414_v48, %v7383_v59  ;;  %v5128_v22 = vmul.f32 %v7417_v20, %v7383_v59  ;;  %v7451_v13 = vld [vmem:[#allocation31_spill] sm:$0xff] }
 0x1f5   : > { %7408 = vst [vmem:[#allocation76_spill] sm:$0xff] %v5095_v32  ;;  %v5132_v10 = vmul.f32 %v7418_v31, %v7383_v59  ;;  %v5140_v46 = vmul.f32 %v7422_v63, %v7383_v59  ;;  %v774_v23 = vsel %vm698_vm5, %v7429_v35, %v7427_v25  ;;  %v5154_v41 = vmul.f32 %v7430_v36, %v7383_v59  ;;  %v7434_v35 = vld [vmem:[#allocation91_spill] sm:$0xff] }
 0x1f6   : > { %725 = vrot.lane.b32.xlu1 %v722_v27, %s7216_s28  ;;  %750 = vrot.lane.b32.xlu0 %v7409_v58, %s7216_s28  ;;  %v5116_v58 = vmul.f32 %v7413_v49, %v7383_v59  ;;  %v7420_v27 = vld [vmem:[#allocation87_spill] sm:$0xff]  ;;  %v5159_v8 = vmul.f32 %v7432_v33, %v7383_v59  ;;  %v5168_v25 = vmul.f32 %v7434_v35, %v7383_v59  ;;  %v7442_v33 = vld [vmem:[#allocation94_spill] sm:$0xff]  ;;  %v7452_v36 = vrot.slane %v7451_v13, 6 }
 0x1f7   : > { %7419 = vst [vmem:[#allocation137_spill] sm:$0xff] %v5132_v10  ;;  %v5136_v40 = vmul.f32 %v7420_v27, %v7383_v59  ;;  %7423 = vst [vmem:[#allocation128_spill] sm:$0xff] %v5140_v46  ;;  %v7441_v35 = vld [vmem:[#allocation71_spill] sm:$0xff]  ;;  %v7446_v46 = vld [vmem:[#allocation96_spill] sm:$0xff]  ;;  %v5243_v13 = vmul.f32 %v7384_v57, %v5183_v51  ;;  %v7464_v63 = vrot.slane %v7404_v53, 6  ;;  %p7938_p8 = scmp.ne.s32.totalorder %s7935_s13, 0 }
 0x1f8   : > { %7431 = vst [vmem:[#allocation77_spill] sm:$0xff] %v5154_v41  ;;  %7433 = vst [vmem:[#allocation129_spill] sm:$0xff] %v5159_v8  ;;  %v5198_v16 = vmul.f32 %v7441_v35, %v5170_v17  ;;  %v5203_v41 = vmul.f32 %v7442_v33, %v7383_v59  ;;  %v7444_v8 = vstv %s3892_s6  ;;  %v5217_v35 = vmul.f32 %v7446_v46, %v7383_v59  ;;  %s3119_s6 = sld [smem:[#allocation6 + $0x32]] }
 0x1f9   : > { %7421 = vst [vmem:[#allocation101_spill] sm:$0xff] %v5136_v40  ;;  %7435 = vst [vmem:[#allocation78_spill] sm:$0xff] %v5168_v25  ;;  %v5221_v25 = vmul.f32 %v7448_v38, %v7383_v59  ;;  %v7450_v33 = vrot.slane %v4427_v7, 6  ;;  %v7454_v46 = vrot.slane %v4465_v55, 6  ;;  %v7459_v55 = vrot.slane %v4496_v0, 5 }
 0x1fa   : > { %752 = vrot.lane.b32.xlu1 %v749_v37, %s7216_s28  ;;  %777 = vrot.lane.b32.xlu0 %v774_v23, %s7216_s28  ;;  %v7436_v23 = vld [vmem:[#allocation92_spill] sm:$0xff]  ;;  %v7443_v37 = vld [vmem:[#allocation95_spill] sm:$0xff]  ;;  %7447 = vst [vmem:[#allocation79_spill] sm:$0xff] %v5217_v35  ;;  %v6990_v40 = vrot.slane %v5198_v16, 5  ;;  %7457 = vst [vmem:[#allocation81_spill] sm:$0xff] %v5243_v13 }
 0x1fb   : > { %v5177_v19 = vmul.f32 %v7436_v23, %v7383_v59  ;;  %v7438_v23 = vld [vmem:[#allocation93_spill] sm:$0xff]  ;;  %7449 = vst [vmem:[#allocation80_spill] sm:$0xff] %v5221_v25 }
 0x1fc   : > { %v5190_v43 = vmul.f32 %v7438_v23, %v7383_v59  ;;  %v5207_v23 = vmul.f32 %v7443_v37, %v7383_v59  ;;  %v842_v37 = vsel %vm839_vm8, %v7452_v36, %v7450_v33  ;;  %v2193_v36 = vmul.f32 %v7384_v57, %v5170_v17  ;;  %v7458_v33 = vld [vmem:[#allocation131_spill] sm:$0xff] }
 0x1fd   : > { %7437 = vst [vmem:[#allocation132_spill] sm:$0xff] %v5177_v19  ;;  %v7455_v19 = vld [vmem:[#allocation36_spill] sm:$0xff] }
 0x1fe   : > { %775 = vrot.lane.b32.xlu1 %v7439_v14, %s7216_s28  ;;  %800 = vrot.lane.b32.xlu0 %v7440_v56, %s7216_s28  ;;  %v5212_v14 = vmul.f32 %v7444_v8, %v5170_v17  ;;  %v7453_v8 = vld [vmem:[#allocation72_spill] sm:$0xff]  ;;  %v7456_v35 = vrot.slane %v7455_v19, 6  ;;  %v2199_v0 = vrot.slane %v2193_v36, 2  ;;  %v7470_v36 = vrot.slane %v5036_v62, 2 }
 0x1ff   : > { %v2097_v10 = vmul.f32 %v7453_v8, %v5170_v17  ;;  %v2098_v56 = vmul.f32 %v7453_v8, %v5183_v51  ;;  %v7460_v19 = vld [vmem:[#allocation124_spill] sm:$0xff]  ;;  %v7462_v8 = vrot.slane %v7398_v24, 5  ;;  %v7465_v24 = vrot.slane %v7406_v28, 6 }
 0x200   : > { %7445 = vst [vmem:[#allocation125_spill] sm:$0xff] %v5212_v14  ;;  %v865_v38 = vsel %vm839_vm8, %v7456_v35, %v7454_v46  ;;  %v7461_v46 = vrot.slane %v7460_v19, 5  ;;  %v6989_v19 = vrot.slane %v5243_v13, 2  ;;  %v7476_v62 = vrot.slane %v5041_v50, 7 }
 0x201   : > { %v5259_v7 = vsel %vm674_vm6, %v7462_v8, %v6990_v40  ;;  %v2103_v57 = vrot.slane %v2097_v10, 6  ;;  %v2105_v25 = vrot.slane %v2098_v56, 6  ;;  %v7467_v56 = vstv %s3898_s12  ;;  %v5317_v40 = vpop.permute.xlu0 %1173  ;;  %s3436_s12 = smov 122  }
 0x202   : > { %802 = vrot.lane.b32.xlu1 %v4599_v12, %s7216_s28  ;;  %821 = vrot.lane.b32.xlu0 %v7458_v33, %s7216_s28  ;;  %v820_v35 = vsel %vm674_vm6, %v7461_v46, %v7459_v55  ;;  %v7463_v12 = vrot.slane %v5212_v14, 6  ;;  %v2143_v55 = vmul.f32 %v7387_v26, %v5170_v17  ;;  %v5282_v8 = vmul.f32 %v7467_v56, %v5170_v17 }
 0x203   : > { %v5274_v46 = vsel %vm839_vm8, %v7465_v24, %v2103_v57  ;;  %v5277_v10 = vsel %vm839_vm8, %v2103_v57, %v2105_v25  ;;  %v5296_v24 = vsel %vm888_vm7, %v2199_v0, %v6989_v19  ;;  %v1656_v57 = vmul.f32 %v7388_v61, %v5170_v17  ;;  %7475 = vst [vmem:[#allocation119_spill] sm:$0xff] %v5317_v40 }
 0x204   : > { %v5266_v33 = vsel %vm839_vm8, %v7464_v63, %v7463_v12  ;;  %7466 = vst [vmem:[#allocation82_spill] sm:$0xff] %v5277_v10  ;;  %7468 = vst [vmem:[#allocation83_spill] sm:$0xff] %v5282_v8  ;;  %v5286_v63 = vmul.f32 %v7387_v26, %v5183_v51  ;;  %v5291_v12 = vsel %vm888_vm7, %v7470_v36, %v2199_v0  ;;  %v2149_v25 = vrot.slane %v2143_v55, 2 }
 0x205   : > { %7471 = vst [vmem:[#allocation85_spill] sm:$0xff] %v5291_v12  ;;  %7472 = vst [vmem:[#allocation86_spill] sm:$0xff] %v5296_v24  ;;  %v6994_v26 = vrot.slane %v5282_v8, 7  ;;  %v2285_v56 = vmul.f32 %v7390_v45, %v5170_v17  ;;  %v1657_v36 = vmul.f32 %v7388_v61, %v5183_v51  ;;  %v7473_v0 = vrot.slane %v5045_v60, 2 }
 0x206   : > { %7469 = vst [vmem:[#allocation84_spill] sm:$0xff] %v5286_v63  ;;  %823 = vrot.lane.b32.xlu1 %v820_v35, %s7216_s28  ;;  %845 = vrot.lane.b32.xlu0 %v842_v37, %s7243_s29  ;;  %v1662_v19 = vrot.slane %v1656_v57, 7  ;;  %v2286_v35 = vmul.f32 %v7390_v45, %v5183_v51  ;;  %v2168_v37 = vmul.f32 %v7405_v9, %v5170_v17  ;;  %v7478_v60 = vrot.slane %v5286_v63, 2 }
 0x207   : > { %v5311_v55 = vsel %vm888_vm7, %v7473_v0, %v2149_v25  ;;  %v5324_v61 = vsel %vm1004_vm10, %v7476_v62, %v6994_v26  ;;  %v2291_v57 = vrot.slane %v2285_v56, 7  ;;  %v7480_v45 = vrot.slane %v5049_v6, 7 }
 0x208   : > { %7474 = vst [vmem:[#allocation87_spill] sm:$0xff] %v5311_v55  ;;  %7477 = vst [vmem:[#allocation120_spill] sm:$0xff] %v5324_v61  ;;  %v5329_v0 = vsel %vm888_vm7, %v2149_v25, %v7478_v60  ;;  %v1664_v55 = vrot.slane %v1657_v36, 7  ;;  %v2293_v40 = vrot.slane %v2286_v35, 7  ;;  %v2174_v8 = vrot.slane %v2168_v37, 2 }
 0x209   : > { %7479 = vst [vmem:[#allocation126_spill] sm:$0xff] %v5329_v0  ;;  %v5334_v14 = vsel %vm1004_vm10, %v7480_v45, %v1662_v19  ;;  %v1675_v50 = vmul.f32 %v7399_v15, %v5170_v17  ;;  %v7482_v25 = vrot.slane %v5053_v42, 7  ;;  %v1676_v36 = vmul.f32 %v7399_v15, %v5183_v51 }
 0x20a   : > { %7481 = vst [vmem:[#allocation130_spill] sm:$0xff] %v5334_v14  ;;  %870 = vrot.lane.b32.xlu1 %v865_v38, %s7243_s29  ;;  %872 = vrot.lane.b32.xlu0 %v4619_v52, %s7243_s29  ;;  %v5347_v56 = vsel %vm1004_vm10, %v1662_v19, %v1664_v55  ;;  %v5353_v37 = vsel %vm1004_vm10, %v2291_v57, %v2293_v40  ;;  %v7486_v38 = vrot.slane %v5083_v1, 2  ;;  %v7489_v55 = vstv %s3922_s25  ;;  %v7666_v14 = vld [vmem:[#allocation153_spill] sm:$0xff]  ;;  %s3120_s25 = sld [smem:[#allocation6 + $0x39]] }
 0x20b   : > { %v5344_v62 = vsel %vm1004_vm10, %v7482_v25, %v2291_v57  ;;  %7484 = vst [vmem:[#allocation72_spill] sm:$0xff] %v5347_v56  ;;  %7485 = vst [vmem:[#allocation36_spill] sm:$0xff] %v5353_v37  ;;  %v1681_v60 = vrot.slane %v1675_v50, 7  ;;  %v5362_v45 = vmul.f32 %v7405_v9, %v5183_v51  ;;  %v1683_v19 = vrot.slane %v1676_v36, 7 }
 0x20c   : > { %7483 = vst [vmem:[#allocation31_spill] sm:$0xff] %v5344_v62  ;;  %v5358_v52 = vsel %vm888_vm7, %v7486_v38, %v2174_v8  ;;  %v5367_v25 = vmul.f32 %v7489_v55, %v5170_v17  ;;  %v1694_v15 = vmul.f32 %v7410_v30, %v5170_v17  ;;  %v1695_v40 = vmul.f32 %v7410_v30, %v5183_v51  ;;  %v5383_v38 = vpop.permute.xlu0 %1189  ;;  %v7494_v55 = vld [vmem:[#allocation136_spill] sm:$0xff] }
 0x20d   : > { %7487 = vst [vmem:[#allocation131_spill] sm:$0xff] %v5358_v52  ;;  %7488 = vst [vmem:[#allocation124_spill] sm:$0xff] %v5362_v45  ;;  %v7491_v1 = vrot.slane %v5069_v29, 7  ;;  %v6997_v50 = vrot.slane %v5362_v45, 2  ;;  %v2122_v9 = vmul.f32 %v7411_v21, %v5170_v17  ;;  %v1711_v36 = vmul.f32 %v7412_v4, %v5170_v17  ;;  %v5402_v52 = vpop.permute.xlu1 %1209  ;;  %v7588_v45 = vld [vmem:[#allocation132_spill] sm:$0xff] }
 0x20e   : > { %7490 = vst [vmem:[#allocation165_spill] sm:$0xff] %v5367_v25  ;;  %7493 = vst [vmem:[#allocation167_spill] sm:$0xff] %v5383_v38  ;;  %894 = vrot.lane.b32.xlu1 %v7494_v55, %s7243_s29  ;;  %896 = vrot.lane.b32.xlu0 %v4630_v34, %s7243_s29  ;;  %v5390_v30 = vsel %vm1004_vm10, %v1681_v60, %v1683_v19  ;;  %v1700_v26 = vrot.slane %v1694_v15, 3  ;;  %v1702_v35 = vrot.slane %v1695_v40, 3  ;;  %v7499_v34 = vrot.slane %v5095_v32, 7  ;;  %v7556_v32 = vld [vmem:[#allocation32_spill] sm:$0xff] }
 0x20f   : > { %v5376_v57 = vsel %vm1004_vm10, %v7491_v1, %v1681_v60  ;;  %7495 = vst [vmem:[#allocation136_spill] sm:$0xff] %v5390_v30  ;;  %v6996_v1 = vrot.slane %v5367_v25, 7  ;;  %v2128_v29 = vrot.slane %v2122_v9, 2  ;;  %v1717_v56 = vrot.slane %v1711_v36, 3  ;;  %7498 = vst [vmem:[#allocation170_spill] sm:$0xff] %v5402_v52 }
 0x210   : > { %7492 = vst [vmem:[#allocation166_spill] sm:$0xff] %v5376_v57  ;;  %v5396_v57 = vsel %vm888_vm7, %v2174_v8, %v6997_v50  ;;  %v5400_v55 = vmul.f32 %v7412_v4, %v5183_v51  ;;  %v7501_v19 = vrot.slane %v5103_v3, 3  ;;  %v5417_v15 = vsel %vm1078_vm9, %v1700_v26, %v1702_v35 }
 0x211   : > { %7496 = vst [vmem:[#allocation168_spill] sm:$0xff] %v5396_v57  ;;  %v5409_v60 = vsel %vm1004_vm10, %v7499_v34, %v6996_v1  ;;  %7503 = vst [vmem:[#allocation173_spill] sm:$0xff] %v5417_v15  ;;  %v2123_v4 = vmul.f32 %v7411_v21, %v5183_v51  ;;  %v7504_v40 = vrot.slane %v5107_v39, 2  ;;  %v7506_v36 = vrot.slane %v5111_v2, 3  ;;  %v5473_v15 = vpop.permute.xlu1 %843 }
 0x212   : > { %7497 = vst [vmem:[#allocation169_spill] sm:$0xff] %v5400_v55  ;;  %7500 = vst [vmem:[#allocation171_spill] sm:$0xff] %v5409_v60  ;;  %v5414_v8 = vsel %vm1078_vm9, %v7501_v19, %v1700_v26  ;;  %v6998_v3 = vrot.slane %v5400_v55, 3  ;;  %v2381_v19 = vmul.f32 %v7413_v49, %v5170_v17  ;;  %v7508_v26 = vld [vmem:[#allocation97_spill] sm:$0xff]  ;;  %917 = vrot.lane.b32.xlu0 %v4579_v54, %s7243_s29  ;;  %v7554_v60 = vld [vmem:[#allocation138_spill] sm:$0xff]  ;;  %v1800_v24 = vstv %s3121_s26 }
 0x213   : > { %7502 = vst [vmem:[#allocation172_spill] sm:$0xff] %v5414_v8  ;;  %v5424_v9 = vsel %vm888_vm7, %v7504_v40, %v2128_v29  ;;  %v5429_v34 = vsel %vm1078_vm9, %v7506_v36, %v1717_v56  ;;  %915 = vrot.lane.b32.xlu1 %v7508_v26, %s7243_s29  ;;  %v2130_v21 = vrot.slane %v2123_v4, 2  ;;  %v1730_v39 = vmul.f32 %v7414_v48, %v5170_v17  ;;  %v5457_v26 = vpop.permute.xlu0 %1229 }
 0x214   : > { %7505 = vst [vmem:[#allocation174_spill] sm:$0xff] %v5424_v9  ;;  %7507 = vst [vmem:[#allocation175_spill] sm:$0xff] %v5429_v34  ;;  %v5442_v2 = vmul.f32 %v7413_v49, %v5183_v51  ;;  %v5446_v35 = vmul.f32 %v7414_v48, %v5183_v51  ;;  %v5451_v40 = vsel %vm1078_vm9, %v1717_v56, %v6998_v3  ;;  %v2387_v36 = vrot.slane %v2381_v19, 3 }
 0x215   : > { %7511 = vst [vmem:[#allocation177_spill] sm:$0xff] %v5451_v40  ;;  %v2260_v54 = vmul.f32 %v7415_v47, %v5170_v17  ;;  %v1749_v4 = vmul.f32 %v7417_v20, %v5170_v17  ;;  %7512 = vst [vmem:[#allocation178_spill] sm:$0xff] %v5457_v26  ;;  %v5460_v49 = vsel %vm888_vm7, %v2128_v29, %v2130_v21  ;;  %v1736_v1 = vrot.slane %v1730_v39, 3 }
 0x216   : > { %7509 = vst [vmem:[#allocation97_spill] sm:$0xff] %v5442_v2  ;;  %7510 = vst [vmem:[#allocation176_spill] sm:$0xff] %v5446_v35  ;;  %v7000_v48 = vrot.slane %v5442_v2, 3  ;;  %v7001_v50 = vrot.slane %v5446_v35, 3  ;;  %v7514_v56 = vrot.slane %v5116_v58, 3  ;;  %v5471_v25 = vmul.f32 %v7417_v20, %v5183_v51  ;;  %940 = vrot.lane.b32.xlu0 %v4589_v18, %s7243_s29  ;;  %v7660_v35 = vld [vmem:[#allocation108_spill] sm:$0xff] }
 0x217   : > { %7513 = vst [vmem:[#allocation179_spill] sm:$0xff] %v5460_v49  ;;  %v2266_v3 = vrot.slane %v2260_v54, 7  ;;  %v1755_v9 = vrot.slane %v1749_v4, 3  ;;  %942 = vrot.lane.b32.xlu1 %v4584_v5, %s7243_s29  ;;  %v7517_v29 = vrot.slane %v5120_v44, 3  ;;  %v7521_v39 = vrot.slane %v5124_v11, 7  ;;  %v7528_v5 = vld [vmem:[#allocation98_spill] sm:$0xff]  ;;  %v5545_v49 = vpop.permute.xlu1 %1033 }
 0x218   : > { %v5467_v19 = vsel %vm1078_vm9, %v7514_v56, %v2387_v36  ;;  %7516 = vst [vmem:[#allocation181_spill] sm:$0xff] %v5471_v25  ;;  %v5487_v21 = vsel %vm1078_vm9, %v2387_v36, %v7000_v48  ;;  %v5492_v20 = vsel %vm1078_vm9, %v1736_v1, %v7001_v50  ;;  %v7523_v44 = vrot.slane %v5128_v22, 3  ;;  %v7527_v48 = vld [vmem:[#allocation100_spill] sm:$0xff] }
 0x219   : > { %7515 = vst [vmem:[#allocation180_spill] sm:$0xff] %v5467_v19  ;;  %v5482_v58 = vsel %vm1078_vm9, %v7517_v29, %v1736_v1  ;;  %7519 = vst [vmem:[#allocation183_spill] sm:$0xff] %v5487_v21  ;;  %v5498_v18 = vsel %vm1004_vm10, %v7521_v39, %v2266_v3  ;;  %v7003_v36 = vrot.slane %v5471_v25, 3  ;;  %v2261_v4 = vmul.f32 %v7415_v47, %v5183_v51  ;;  %v7531_v47 = vld [vmem:[#allocation88_spill] sm:$0xff] }
 0x21a   : > { %7518 = vst [vmem:[#allocation182_spill] sm:$0xff] %v5482_v58  ;;  %7520 = vst [vmem:[#allocation184_spill] sm:$0xff] %v5492_v20  ;;  %v5503_v54 = vsel %vm1078_vm9, %v7523_v44, %v1755_v9  ;;  %v2331_v1 = vmul.f32 %v7418_v31, %v5170_v17  ;;  %v5512_v56 = vmul.f32 %v7418_v31, %v5183_v51  ;;  %v5528_v31 = vpop.permute.xlu0 %678  ;;  %v7557_v25 = vrot.slane %v7556_v32, 7  ;;  %v7563_v32 = vld [vmem:[#allocation91_spill] sm:$0xff]  ;;  %v7664_v20 = vld [vmem:[#allocation158_spill] sm:$0xff] }
 0x21b   : > { %7522 = vst [vmem:[#allocation185_spill] sm:$0xff] %v5498_v18  ;;  %7524 = vst [vmem:[#allocation186_spill] sm:$0xff] %v5503_v54  ;;  %v2218_v29 = vmul.f32 %v7420_v27, %v5170_v17  ;;  %v2219_v22 = vmul.f32 %v7420_v27, %v5183_v51  ;;  %v5521_v39 = vsel %vm1078_vm9, %v1755_v9, %v7003_v36  ;;  %v2268_v44 = vrot.slane %v2261_v4, 7  ;;  %v7529_v18 = vld [vmem:[#allocation102_spill] sm:$0xff] }
 0x21c   : > { %7525 = vst [vmem:[#allocation187_spill] sm:$0xff] %v5512_v56  ;;  %7526 = vst [vmem:[#allocation188_spill] sm:$0xff] %v5521_v39  ;;  %v5526_v50 = vmul.f32 %v7527_v48, %v7383_v59  ;;  %965 = vrot.lane.b32.xlu1 %v7528_v5, %s7243_s29  ;;  %967 = vrot.lane.b32.xlu0 %v7529_v18, %s7243_s29  ;;  %v2337_v27 = vrot.slane %v2331_v1, 3  ;;  %v7006_v11 = vrot.slane %v5512_v56, 3  ;;  %v7533_v5 = vld [vmem:[#allocation79_spill] sm:$0xff]  ;;  %v7535_v18 = vld [vmem:[#allocation137_spill] sm:$0xff] }
 0x21d   : > { %v2224_v9 = vrot.slane %v2218_v29, 6  ;;  %v2226_v36 = vrot.slane %v2219_v22, 6  ;;  %v5536_v4 = vsel %vm1004_vm10, %v2266_v3, %v2268_v44  ;;  %v2356_v2 = vmul.f32 %v7531_v47, %v5170_v17  ;;  %7534 = vst [vmem:[#allocation102_spill] sm:$0xff] %v5545_v49  ;;  %v7539_v22 = vld [vmem:[#allocation101_spill] sm:$0xff] }
 0x21e   : > { %7530 = vst [vmem:[#allocation100_spill] sm:$0xff] %v5536_v4  ;;  %v5542_v21 = vmul.f32 %v7531_v47, %v5183_v51  ;;  %v7536_v1 = vrot.slane %v7535_v18, 3  ;;  %v5555_v3 = vsel %vm1078_vm9, %v2337_v27, %v7006_v11  ;;  %v7540_v44 = vrot.slane %v7539_v22, 6  ;;  %v7543_v18 = vld [vmem:[#allocation89_spill] sm:$0xff]  ;;  %v7546_v22 = vld [vmem:[#allocation103_spill] sm:$0xff] }
 0x21f   : > { %7538 = vst [vmem:[#allocation79_spill] sm:$0xff] %v5555_v3  ;;  %v5563_v47 = vsel %vm839_vm8, %v2224_v9, %v2226_v36  ;;  %v2362_v19 = vrot.slane %v2356_v2, 3  ;;  %v7549_v36 = vld [vmem:[#allocation37_spill] sm:$0xff]  ;;  %v2311_v8 = vmul.f32 %v7543_v18, %v5183_v51  ;;  %v2501_v30 = vmul.f32 %v7563_v32, %v5170_v17 }
 0x220   : > { %7532 = vst [vmem:[#allocation98_spill] sm:$0xff] %v5542_v21  ;;  %v5550_v29 = vsel %vm1078_vm9, %v7536_v1, %v2337_v27  ;;  %v5560_v4 = vsel %vm839_vm8, %v7540_v44, %v2224_v9  ;;  %7542 = vst [vmem:[#allocation101_spill] sm:$0xff] %v5563_v47  ;;  %v2310_v1 = vmul.f32 %v7543_v18, %v5170_v17  ;;  %v7545_v27 = vld [vmem:[#allocation57_spill] sm:$0xff]  ;;  %990 = vrot.lane.b32.xlu0 %v7546_v22, %s7243_s29 }
 0x221   : > { %7537 = vst [vmem:[#allocation88_spill] sm:$0xff] %v5550_v29  ;;  %7541 = vst [vmem:[#allocation137_spill] sm:$0xff] %v5560_v4  ;;  %v7544_v29 = vld [vmem:[#allocation73_spill] sm:$0xff]  ;;  %992 = vrot.lane.b32.xlu1 %v7545_v27, %s7243_s29  ;;  %v7550_v9 = vrot.slane %v7549_v36, 7  ;;  %v7551_v47 = vstv %s4018_s15  ;;  %v7555_v27 = vrot.slane %v7554_v60, 7  ;;  %v2318_v3 = vrot.slane %v2311_v8, 3 }
 0x222   : > { %v5570_v56 = vmul.f32 %v7544_v29, %v7383_v59  ;;  %v7547_v44 = vld [vmem:[#allocation133_spill] sm:$0xff]  ;;  %v5586_v4 = vmul.f32 %v7551_v47, %v5170_v17  ;;  %v7553_v59 = vld [vmem:[#allocation80_spill] sm:$0xff]  ;;  %v2316_v47 = vrot.slane %v2310_v1, 3  ;;  %s3124_s15 = sld [smem:[#allocation6 + $0x55]] }
 0x223   : > { %v7548_v11 = vrot.slane %v7547_v44, 7  ;;  %v1030_v22 = vsel %vm1004_vm10, %v7557_v25, %v7555_v27  ;;  %v7558_v44 = vld [vmem:[#allocation128_spill] sm:$0xff]  ;;  %v5611_v25 = vmul.f32 %v7563_v32, %v5183_v51  ;;  %v5629_v32 = vpop.permute.xlu1 %1321 }
 0x224   : > { %7552 = vst [vmem:[#allocation89_spill] sm:$0xff] %v5586_v4  ;;  %v7559_v39 = vrot.slane %v7558_v44, 3  ;;  %v7567_v44 = vld [vmem:[#allocation39_spill] sm:$0xff]  ;;  %7574 = vst [vmem:[#allocation80_spill] sm:$0xff] %v5629_v32  ;;  %1035 = vrot.lane.b32.xlu0 %v1030_v22, %s7287_s16  ;;  %v7582_v22 = vld [vmem:[#allocation78_spill] sm:$0xff] }
 0x225   : > { %v1007_v2 = vsel %vm1004_vm10, %v7550_v9, %v7548_v11  ;;  %v7561_v11 = vrot.slane %v5542_v21, 3  ;;  %v5604_v9 = vpop.permute.xlu0 %868  ;;  %7564 = vst [vmem:[#allocation103_spill] sm:$0xff] %v5611_v25  ;;  %v7568_v21 = vrot.slane %v7567_v44, 7  ;;  %v7572_v8 = vld [vmem:[#allocation92_spill] sm:$0xff] }
 0x226   : > { %v5597_v36 = vsel %vm1078_vm9, %v7559_v39, %v2362_v19  ;;  %v7565_v39 = vld [vmem:[#allocation38_spill] sm:$0xff]  ;;  %v2643_v60 = vmul.f32 %v7572_v8, %v5170_v17  ;;  %1010 = vrot.lane.b32.xlu1 %v1007_v2, %s7287_s16  ;;  %v7580_v2 = vld [vmem:[#allocation93_spill] sm:$0xff] }
 0x227   : > { %7560 = vst [vmem:[#allocation73_spill] sm:$0xff] %v5597_v36  ;;  %v5602_v18 = vsel %vm1078_vm9, %v2362_v19, %v7561_v11  ;;  %v7566_v27 = vrot.slane %v7565_v39, 7  ;;  %v7569_v11 = vld [vmem:[#allocation77_spill] sm:$0xff]  ;;  %v5627_v36 = vmul.f32 %v7572_v8, %v5183_v51  ;;  %v7576_v39 = vrot.slane %v5586_v4, 5 }
 0x228   : > { %7562 = vst [vmem:[#allocation57_spill] sm:$0xff] %v5602_v18  ;;  %v7570_v1 = vrot.slane %v7569_v11, 3  ;;  %v7013_v8 = vrot.slane %v5611_v25, 4  ;;  %v2526_v57 = vmul.f32 %v7580_v2, %v5170_v17 }
 0x229   : > { %v1055_v19 = vsel %vm1004_vm10, %v7568_v21, %v7566_v27  ;;  %7573 = vst [vmem:[#allocation37_spill] sm:$0xff] %v5627_v36  ;;  %v5634_v21 = vsel %vm1078_vm9, %v2316_v47, %v2318_v3  ;;  %v7577_v27 = vld [vmem:[#allocation129_spill] sm:$0xff]  ;;  %v5649_v3 = vmul.f32 %v7580_v2, %v5183_v51  ;;  %v7589_v2 = vrot.slane %v7588_v45, 1  ;;  %v7595_v45 = vld [vmem:[#allocation140_spill] sm:$0xff] }
 0x22a   : > { %v5621_v18 = vsel %vm1078_vm9, %v7570_v1, %v2316_v47  ;;  %7575 = vst [vmem:[#allocation138_spill] sm:$0xff] %v5634_v21  ;;  %v7578_v44 = vrot.slane %v7577_v27, 5  ;;  %v2507_v1 = vrot.slane %v2501_v30, 4  ;;  %v7583_v47 = vrot.slane %v7582_v22, 4  ;;  %1062 = vrot.lane.b32.xlu0 %v7595_v45, %s7287_s16  ;;  %v7656_v21 = vld [vmem:[#allocation156_spill] sm:$0xff] }
 0x22b   : > { %7571 = vst [vmem:[#allocation133_spill] sm:$0xff] %v5621_v18  ;;  %v2649_v18 = vrot.slane %v2643_v60, 1  ;;  %7581 = vst [vmem:[#allocation128_spill] sm:$0xff] %v5649_v3  ;;  %v7586_v60 = vld [vmem:[#allocation94_spill] sm:$0xff]  ;;  %v7591_v22 = vrot.slane %v5627_v36, 1  ;;  %v2532_v25 = vrot.slane %v2526_v57, 4 }
 0x22c   : > { %v5641_v11 = vsel %vm674_vm6, %v7578_v44, %v7576_v39  ;;  %v5654_v4 = vsel %vm192_vm0, %v7583_v47, %v2507_v1  ;;  %v5659_v30 = vsel %vm192_vm0, %v2507_v1, %v7013_v8  ;;  %v2593_v39 = vmul.f32 %v7586_v60, %v5170_v17  ;;  %v5678_v8 = vpop.permute.xlu0 %1008  ;;  %v7596_v36 = vld [vmem:[#allocation95_spill] sm:$0xff] }
 0x22d   : > { %7579 = vst [vmem:[#allocation32_spill] sm:$0xff] %v5641_v11  ;;  %7584 = vst [vmem:[#allocation91_spill] sm:$0xff] %v5654_v4  ;;  %v5665_v44 = vmul.f32 %v7586_v60, %v5183_v51  ;;  %v5670_v11 = vsel %vm698_vm5, %v7589_v2, %v2649_v18  ;;  %v5675_v47 = vsel %vm698_vm5, %v2649_v18, %v7591_v22  ;;  %v7594_v60 = vld [vmem:[#allocation139_spill] sm:$0xff]  ;;  %v7597_v22 = vrot.slane %v5190_v43, 4 }
 0x22e   : > { %7585 = vst [vmem:[#allocation38_spill] sm:$0xff] %v5659_v30  ;;  %7590 = vst [vmem:[#allocation77_spill] sm:$0xff] %v5670_v11  ;;  %v5680_v30 = vpop.permute.xlu1 %1175  ;;  %1037 = vrot.lane.b32.xlu1 %v7594_v60, %s7287_s16  ;;  %v2599_v2 = vrot.slane %v2593_v39, 1  ;;  %v2480_v18 = vmul.f32 %v7596_v36, %v5170_v17  ;;  %v2481_v57 = vmul.f32 %v7596_v36, %v5183_v51  ;;  %v7601_v39 = vld [vmem:[#allocation96_spill] sm:$0xff]  ;;  %v7603_v4 = vrot.slane %v5203_v41, 1  ;;  %v7609_v41 = vld [vmem:[#allocation141_spill] sm:$0xff] }
 0x22f   : > { %7587 = vst [vmem:[#allocation39_spill] sm:$0xff] %v5665_v44  ;;  %7592 = vst [vmem:[#allocation92_spill] sm:$0xff] %v5675_v47  ;;  %v5694_v1 = vsel %vm192_vm0, %v7597_v22, %v2532_v25  ;;  %v7599_v47 = vrot.slane %v5649_v3, 4  ;;  %v2618_v45 = vmul.f32 %v7601_v39, %v5170_v17  ;;  %v5705_v11 = vmul.f32 %v7601_v39, %v5183_v51 }
 0x230   : > { %7593 = vst [vmem:[#allocation93_spill] sm:$0xff] %v5680_v30  ;;  %7598 = vst [vmem:[#allocation78_spill] sm:$0xff] %v5694_v1  ;;  %v5710_v36 = vsel %vm698_vm5, %v7603_v4, %v2599_v2  ;;  %v7605_v43 = vrot.slane %v5665_v44, 1  ;;  %v2486_v3 = vrot.slane %v2480_v18, 4  ;;  %v7607_v1 = vld [vmem:[#allocation99_spill] sm:$0xff]  ;;  %1086 = vrot.lane.b32.xlu0 %v7609_v41, %s7287_s16  ;;  %v7610_v4 = vrot.slane %v5207_v23, 4 }
 0x231   : > { %v5699_v60 = vsel %vm192_vm0, %v2532_v25, %v7599_v47  ;;  %7602 = vst [vmem:[#allocation132_spill] sm:$0xff] %v5705_v11  ;;  %7604 = vst [vmem:[#allocation139_spill] sm:$0xff] %v5710_v36  ;;  %v2488_v25 = vrot.slane %v2481_v57, 4  ;;  %v2624_v47 = vrot.slane %v2618_v45, 1  ;;  %v2689_v27 = vmul.f32 %v7607_v1, %v5170_v17  ;;  %v7648_v44 = vld [vmem:[#allocation106_spill] sm:$0xff] }
 0x232   : > { %7600 = vst [vmem:[#allocation94_spill] sm:$0xff] %v5699_v60  ;;  %v5715_v22 = vsel %vm698_vm5, %v2599_v2, %v7605_v43  ;;  %v7016_v60 = vrot.slane %v5705_v11, 1  ;;  %v5722_v39 = vmul.f32 %v7607_v1, %v5183_v51  ;;  %1060 = vrot.lane.b32.xlu1 %v1055_v19, %s7287_s16  ;;  %v5730_v2 = vsel %vm192_vm0, %v7610_v4, %v2486_v3  ;;  %v7622_v11 = vld [vmem:[#allocation143_spill] sm:$0xff] }
 0x233   : > { %7606 = vst [vmem:[#allocation140_spill] sm:$0xff] %v5715_v22  ;;  %7611 = vst [vmem:[#allocation96_spill] sm:$0xff] %v5730_v2  ;;  %v5733_v18 = vsel %vm192_vm0, %v2486_v3, %v2488_v25  ;;  %v2572_v57 = vmul.f32 %v7527_v48, %v5170_v17  ;;  %v2577_v45 = vrot.slane %v5526_v50, 1  ;;  %v7613_v1 = vrot.slane %v7533_v5, 1  ;;  %v5749_v3 = vpop.permute.xlu0 %1058  ;;  %v5751_v25 = vpop.permute.xlu1 %1191  ;;  %v7653_v22 = vld [vmem:[#allocation154_spill] sm:$0xff] }
 0x234   : > { %7608 = vst [vmem:[#allocation95_spill] sm:$0xff] %v5722_v39  ;;  %7612 = vst [vmem:[#allocation99_spill] sm:$0xff] %v5733_v18  ;;  %v5746_v23 = vsel %vm698_vm5, %v2624_v47, %v7016_v60  ;;  %v2695_v43 = vrot.slane %v2689_v27, 5  ;;  %v7019_v41 = vrot.slane %v5722_v39, 5  ;;  %v2573_v50 = vmul.f32 %v7527_v48, %v5183_v51  ;;  %v7621_v48 = vld [vmem:[#allocation142_spill] sm:$0xff]  ;;  %1107 = vrot.lane.b32.xlu0 %v7622_v11, %s7287_s16  ;;  %v7628_v11 = vld [vmem:[#allocation144_spill] sm:$0xff] }
 0x235   : > { %v5741_v19 = vsel %vm698_vm5, %v7613_v1, %v2624_v47  ;;  %7615 = vst [vmem:[#allocation189_spill] sm:$0xff] %v5746_v23  ;;  %7616 = vst [vmem:[#allocation190_spill] sm:$0xff] %v5749_v3  ;;  %v2578_v4 = vrot.slane %v2572_v57, 1  ;;  %v2668_v5 = vmul.f32 %v7544_v29, %v5170_v17  ;;  %v2669_v1 = vmul.f32 %v7544_v29, %v5183_v51  ;;  %v7645_v18 = vld [vmem:[#allocation151_spill] sm:$0xff] }
 0x236   : > { %7614 = vst [vmem:[#allocation141_spill] sm:$0xff] %v5741_v19  ;;  %7617 = vst [vmem:[#allocation191_spill] sm:$0xff] %v5751_v25  ;;  %v7618_v47 = vrot.slane %v7553_v59, 5  ;;  %v5767_v60 = vsel %vm674_vm6, %v2695_v43, %v7019_v41  ;;  %v2673_v57 = vrot.slane %v5570_v56, 5  ;;  %1084 = vrot.lane.b32.xlu1 %v7621_v48, %s7287_s16  ;;  %v2580_v59 = vrot.slane %v2573_v50, 1  ;;  %v7637_v41 = vld [vmem:[#allocation146_spill] sm:$0xff] }
 0x237   : > { %7620 = vst [vmem:[#allocation193_spill] sm:$0xff] %v5767_v60  ;;  %v5775_v29 = vsel %vm698_vm5, %v2577_v45, %v2578_v4  ;;  %v2674_v23 = vrot.slane %v2668_v5, 5  ;;  %v5779_v39 = vpop.permute.xlu0 %1193  ;;  %v7629_v45 = vld [vmem:[#allocation104_spill] sm:$0xff]  ;;  %v1820_v25 = vstv %s3122_s20 }
 0x238   : > { %v5762_v27 = vsel %vm674_vm6, %v7618_v47, %v2695_v43  ;;  %7623 = vst [vmem:[#allocation142_spill] sm:$0xff] %v5775_v29  ;;  %v2676_v47 = vrot.slane %v2669_v1, 5  ;;  %v5782_v43 = vsel %vm698_vm5, %v2578_v4, %v2580_v59  ;;  %1130 = vrot.lane.b32.xlu0 %v7629_v45, %s7287_s16  ;;  %v7632_v1 = vld [vmem:[#allocation145_spill] sm:$0xff]  ;;  %v7633_v4 = vld [vmem:[#allocation35_spill] sm:$0xff]  ;;  %v7635_v59 = vld [vmem:[#allocation59_spill] sm:$0xff]  ;;  %v1822_v3 = vmul.f32 %v1820_v25, %v5170_v17 }
 0x239   : > { %7619 = vst [vmem:[#allocation192_spill] sm:$0xff] %v5762_v27  ;;  %v5777_v27 = vpop.permute.xlu1 %1213  ;;  %7625 = vst [vmem:[#allocation194_spill] sm:$0xff] %v5782_v43  ;;  %v5785_v56 = vsel %vm674_vm6, %v2673_v57, %v2674_v23  ;;  %v7641_v29 = vld [vmem:[#allocation134_spill] sm:$0xff]  ;;  %v1823_v12 = vmul.f32 %v1820_v25, %v5183_v51 }
 0x23a   : > { %7624 = vst [vmem:[#allocation143_spill] sm:$0xff] %v5777_v27  ;;  %7626 = vst [vmem:[#allocation195_spill] sm:$0xff] %v5785_v56  ;;  %v5788_v48 = vsel %vm674_vm6, %v2674_v23, %v2676_v47  ;;  %1105 = vrot.lane.b32.xlu1 %v7628_v11, %s7287_s16  ;;  %v7636_v47 = vld [vmem:[#allocation147_spill] sm:$0xff]  ;;  %v7639_v56 = vld [vmem:[#allocation149_spill] sm:$0xff]  ;;  %v7642_v60 = vrot.slane %v7641_v29, 5  ;;  %v1780_v27 = vstv %s3120_s25 }
 0x23b   : > { %7627 = vst [vmem:[#allocation196_spill] sm:$0xff] %v5788_v48  ;;  %v5796_v5 = vpop.permute.xlu0 %1211  ;;  %v1782_v13 = vmul.f32 %v1780_v27, %v5170_v17 }
 0x23c   : > { %7631 = vst [vmem:[#allocation104_spill] sm:$0xff] %v5796_v5  ;;  %1157 = vrot.lane.b32.xlu0 %v7633_v4, %s7287_s16 }
 0x23d   : > { %v5794_v50 = vpop.permute.xlu1 %1231 }
 0x23e   : > { %7630 = vst [vmem:[#allocation144_spill] sm:$0xff] %v5794_v50  ;;  %1132 = vrot.lane.b32.xlu1 %v7632_v1, %s7287_s16  ;;  %v7638_v1 = vld [vmem:[#allocation148_spill] sm:$0xff]  ;;  %v7683_v50 = vld [vmem:[#allocation162_spill] sm:$0xff] }
 0x23f   : > { %v5804_v23 = vpop.permute.xlu0 %1233 }
 0x240   : > { %7634 = vst [vmem:[#allocation145_spill] sm:$0xff] %v5804_v23  ;;  %1256 = vrot.lane.b32.xlu0 %v7636_v47, %s7177_s17 }
 0x241   : > { %v5802_v57 = vpop.permute.xlu1 %729 }
 0x242   : > { %1155 = vrot.lane.b32.xlu1 %v7635_v59, %s7287_s16  ;;  %v7640_v59 = vld [vmem:[#allocation105_spill] sm:$0xff] }
 0x243   : > { %v5812_v45 = vpop.permute.xlu0 %682 }
 0x244   : > { %1277 = vrot.lane.b32.xlu0 %v7638_v1, %s7177_s17 }
 0x245   : > { %v5810_v11 = vpop.permute.xlu1 %779 }
 0x246   : > { %1254 = vrot.lane.b32.xlu1 %v7637_v41, %s7177_s17  ;;  %v7643_v41 = vld [vmem:[#allocation34_spill] sm:$0xff] }
 0x247   : > { %v5820_v48 = vpop.permute.xlu0 %754  ;;  %v7644_v19 = vrot.slane %v7643_v41, 5 }
 0x248   : > { %1300 = vrot.lane.b32.xlu0 %v7640_v59, %s7177_s17  ;;  %v7647_v59 = vld [vmem:[#allocation152_spill] sm:$0xff] }
 0x249   : > { %v5818_v4 = vpop.permute.xlu1 %847  ;;  %v1320_v1 = vsel %vm674_vm6, %v7644_v19, %v7642_v60  ;;  %v7649_v60 = vld [vmem:[#allocation62_spill] sm:$0xff] }
 0x24a   : > { %1275 = vrot.lane.b32.xlu1 %v7639_v56, %s7177_s17 }
 0x24b   : > { %v5828_v43 = vpop.permute.xlu0 %825 }
 0x24c   : > { %1323 = vrot.lane.b32.xlu0 %v1320_v1, %s7335_s0 }
 0x24d   : > { %v5826_v47 = vpop.permute.xlu1 %919 }
 0x24e   : > { %1302 = vrot.lane.b32.xlu1 %v7645_v18, %s7177_s17  ;;  %v7650_v18 = vld [vmem:[#allocation63_spill] sm:$0xff] }
 0x24f   : > { %v5840_v56 = vpop.permute.xlu0 %944 }
 0x250   : > { %1346 = vrot.lane.b32.xlu0 %v7648_v44, %s7335_s0 }
 0x251   : > { %v5838_v2 = vpop.permute.xlu1 %969 }
 0x252   : > { %7646 = vst [vmem:[#allocation35_spill] sm:$0xff] %v5838_v2  ;;  %1348 = vrot.lane.b32.xlu1 %v7647_v59, %s7335_s0  ;;  %v7654_v59 = vld [vmem:[#allocation155_spill] sm:$0xff]  ;;  %v1978_v2 = vstv %s3129_s1 }
 0x253   : > { %v5848_v41 = vpop.permute.xlu0 %1012 }
 0x254   : > { %1367 = vrot.lane.b32.xlu0 %v7650_v18, %s7335_s0 }
 0x255   : > { %v5846_v29 = vpop.permute.xlu1 %1109 }
 0x256   : > { %1369 = vrot.lane.b32.xlu1 %v7649_v60, %s7335_s0  ;;  %v7657_v60 = vld [vmem:[#allocation107_spill] sm:$0xff] }
 0x257   : > { %v5856_v1 = vpop.permute.xlu0 %1134 }
 0x258   : > { %7652 = vst [vmem:[#allocation147_spill] sm:$0xff] %v5856_v1  ;;  %1394 = vrot.lane.b32.xlu0 %v7654_v59, %s7335_s0 }
 0x259   : > { %v5854_v19 = vpop.permute.xlu1 %1159 }
 0x25a   : > { %7651 = vst [vmem:[#allocation59_spill] sm:$0xff] %v5854_v19  ;;  %1392 = vrot.lane.b32.xlu1 %v7653_v22, %s7335_s0  ;;  %v7661_v22 = vld [vmem:[#allocation157_spill] sm:$0xff] }
 0x25b   : > { %v5864_v36 = vpop.permute.xlu0 %1304 }
 0x25c   : > { %7655 = vst [vmem:[#allocation146_spill] sm:$0xff] %v5864_v36  ;;  %1417 = vrot.lane.b32.xlu0 %v7657_v60, %s7335_s0 }
 0x25d   : > { %v5862_v44 = vpop.permute.xlu1 %1279 }
 0x25e   : > { %1419 = vrot.lane.b32.xlu1 %v7656_v21, %s7335_s0  ;;  %v7665_v21 = vld [vmem:[#allocation159_spill] sm:$0xff] }
 0x25f   : > { %v5872_v54 = vpop.permute.xlu0 %1371 }
 0x260   : > { %7659 = vst [vmem:[#allocation149_spill] sm:$0xff] %v5872_v54  ;;  %1444 = vrot.lane.b32.xlu0 %v7661_v22, %s7335_s0  ;;  %v7668_v22 = vld [vmem:[#allocation109_spill] sm:$0xff] }
 0x261   : > { %v5870_v18 = vpop.permute.xlu1 %1325  ;;  %v7669_v6 = vrot.slane %v7668_v22, 6 }
 0x262   : > { %7658 = vst [vmem:[#allocation148_spill] sm:$0xff] %v5870_v18  ;;  %1442 = vrot.lane.b32.xlu1 %v7660_v35, %s7335_s0  ;;  %v7667_v35 = vrot.slane %v7666_v14, 5 }
 0x263   : > { %v5880_v37 = vpop.permute.xlu0 %1421 }
 0x264   : > { %7663 = vst [vmem:[#allocation134_spill] sm:$0xff] %v5880_v37  ;;  %1465 = vrot.lane.b32.xlu0 %v7665_v21, %s7335_s0  ;;  %v7671_v21 = vld [vmem:[#allocation64_spill] sm:$0xff] }
 0x265   : > { %v5878_v59 = vpop.permute.xlu1 %1396  ;;  %v7672_v42 = vrot.slane %v7671_v21, 6 }
 0x266   : > { %7662 = vst [vmem:[#allocation105_spill] sm:$0xff] %v5878_v59  ;;  %1463 = vrot.lane.b32.xlu1 %v7664_v20, %s7335_s0  ;;  %v7670_v20 = vld [vmem:[#allocation110_spill] sm:$0xff] }
 0x267   : > { %v5888_v58 = vpop.permute.xlu0 %706 }
 0x268   : > { %1484 = vrot.lane.b32.xlu0 %v7669_v6, %s3436_s12  ;;  %v7675_v6 = vld [vmem:[#allocation116_spill] sm:$0xff] }
 0x269   : > { %v5886_v60 = vpop.permute.xlu1 %680 }
 0x26a   : > { %1467 = vrot.lane.b32.xlu1 %v7667_v35, %s7335_s0  ;;  %v7673_v35 = vld [vmem:[#allocation114_spill] sm:$0xff] }
 0x26b   : > { %v5898_v62 = vpop.permute.xlu0 %727  ;;  %v7674_v55 = vrot.slane %v7673_v35, 6  ;;  %v7680_v35 = vld [vmem:[#allocation115_spill] sm:$0xff] }
 0x26c   : > { %1488 = vrot.lane.b32.xlu0 %v7672_v42, %s3436_s12  ;;  %v7678_v42 = vld [vmem:[#allocation69_spill] sm:$0xff] }
 0x26d   : > { %v5896_v37 = vpop.permute.xlu1 %704 }
 0x26e   : > { %1486 = vrot.lane.b32.xlu1 %v7670_v20, %s3436_s12  ;;  %v7677_v20 = vld [vmem:[#allocation161_spill] sm:$0xff] }
 0x26f   : > { %v5907_v14 = vpop.permute.xlu0 %750 }
 0x270   : > { %1511 = vrot.lane.b32.xlu0 %v7675_v6, %s3436_s12 }
 0x271   : > { %v5905_v30 = vpop.permute.xlu1 %725 }
 0x272   : > { %1509 = vrot.lane.b32.xlu1 %v7674_v55, %s3436_s12  ;;  %v7681_v55 = vld [vmem:[#allocation117_spill] sm:$0xff] }
 0x273   : > { %v5916_v40 = vpop.permute.xlu0 %777 }
 0x274   : > { %7676 = vst [vmem:[#allocation34_spill] sm:$0xff] %v5916_v40  ;;  %1534 = vrot.lane.b32.xlu0 %v7678_v42, %s3436_s12 }
 0x275   : > { %v5914_v22 = vpop.permute.xlu1 %752 }
 0x276   : > { %1513 = vrot.lane.b32.xlu1 %v7677_v20, %s3436_s12  ;;  %v7684_v20 = vld [vmem:[#allocation66_spill] sm:$0xff] }
 0x277   : > { %v5924_v18 = vpop.permute.xlu0 %800  ;;  %v7685_v42 = vrot.slane %v7684_v20, 2  ;;  %v7691_v20 = vld [vmem:[#allocation122_spill] sm:$0xff] }
 0x278   : > { %7679 = vst [vmem:[#allocation151_spill] sm:$0xff] %v5924_v18  ;;  %1555 = vrot.lane.b32.xlu0 %v7681_v55, %s3436_s12  ;;  %v7687_v55 = vld [vmem:[#allocation163_spill] sm:$0xff] }
 0x279   : > { %v5922_v21 = vpop.permute.xlu1 %775 }
 0x27a   : > { %1536 = vrot.lane.b32.xlu1 %v7680_v35, %s3436_s12  ;;  %v7686_v35 = vld [vmem:[#allocation118_spill] sm:$0xff] }
 0x27b   : > { %v5932_v59 = vpop.permute.xlu0 %821 }
 0x27c   : > { %1559 = vrot.lane.b32.xlu0 %v7685_v42, %s3436_s12 }
 0x27d   : > { %v5930_v6 = vpop.permute.xlu1 %802 }
 0x27e   : > { %7682 = vst [vmem:[#allocation152_spill] sm:$0xff] %v5930_v6  ;;  %1557 = vrot.lane.b32.xlu1 %v7683_v50, %s3436_s12  ;;  %v7689_v50 = vld [vmem:[#allocation67_spill] sm:$0xff] }
 0x27f   : > { %v5941_v63 = vpop.permute.xlu0 %845  ;;  %v7690_v34 = vrot.slane %v7689_v50, 2  ;;  %v7697_v50 = vld [vmem:[#allocation74_spill] sm:$0xff] }
 0x280   : > { %1582 = vrot.lane.b32.xlu0 %v7687_v55, %s3436_s12  ;;  %v7695_v55 = vld [vmem:[#allocation68_spill] sm:$0xff] }
 0x281   : > { %v5939_v61 = vpop.permute.xlu1 %823  ;;  %v7696_v23 = vrot.slane %v7695_v55, 2 }
 0x282   : > { %1580 = vrot.lane.b32.xlu1 %v7686_v35, %s3436_s12  ;;  %v7694_v35 = vld [vmem:[#allocation164_spill] sm:$0xff] }
 0x283   : > { %v5949_v32 = vpop.permute.xlu0 %872 }
 0x284   : > { %1605 = vrot.lane.b32.xlu0 %v7691_v20, %s3436_s12  ;;  %v7698_v20 = vld [vmem:[#allocation75_spill] sm:$0xff] }
 0x285   : > { %v5947_v0 = vpop.permute.xlu1 %870 }
 0x286   : > { %7688 = vst [vmem:[#allocation106_spill] sm:$0xff] %v5947_v0  ;;  %1584 = vrot.lane.b32.xlu1 %v7690_v34, %s3436_s12  ;;  %v1766_v34 = vstv %s3119_s6 }
 0x287   : > { %v5958_v36 = vpop.permute.xlu0 %896  ;;  %v1768_v55 = vmul.f32 %v1766_v34, %v5170_v17 }
 0x288   : > { %7693 = vst [vmem:[#allocation63_spill] sm:$0xff] %v5958_v36  ;;  %1609 = vrot.lane.b32.xlu0 %v7696_v23, %s3436_s12 }
 0x289   : > { %v5956_v42 = vpop.permute.xlu1 %894 }
 0x28a   : > { %7692 = vst [vmem:[#allocation62_spill] sm:$0xff] %v5956_v42  ;;  %1607 = vrot.lane.b32.xlu1 %v7694_v35, %s3436_s12  ;;  %v5977_v35 = vld [vmem:[#allocation5] sm:$0xff] }
 0x28b   : > { %v5967_v5 = vpop.permute.xlu0 %917  ;;  %7699 = vst [vmem:[#allocation154_spill] sm:$0xff] %v5977_v35  ;;  %v1767_v23 = vmul.f32 %v5977_v35, %v1766_v34  ;;  %v1801_v36 = vmul.f32 %v5977_v35, %v1800_v24  ;;  %v1821_v0 = vmul.f32 %v5977_v35, %v1820_v25 }
 0x28c   : > { %1632 = vrot.lane.b32.xlu0 %v7698_v20, %s3436_s12  ;;  %v1781_v20 = vmul.f32 %v5977_v35, %v1780_v27 }
 0x28d   : > { %v5965_v26 = vpop.permute.xlu1 %915 }
 0x28e   : > { %1630 = vrot.lane.b32.xlu1 %v7697_v50, %s3436_s12 }
 0x28f   : > { %v5975_v19 = vpop.permute.xlu0 %940 }
 0x290   : > { %1773 = vrot.lane.b32.xlu0 %v1768_v55, %s7216_s28  ;;  %v1783_v55 = vmul.f32 %v1780_v27, %v5183_v51 }
 0x291   : > { %v5973_v52 = vpop.permute.xlu1 %942 }
 0x292   : > { %1771 = vrot.lane.b32.xlu1 %v1767_v23, %s7216_s28 }
 0x293   : > { %v5985_v50 = vpop.permute.xlu0 %967 }
 0x294   : > { %7700 = vst [vmem:[#allocation155_spill] sm:$0xff] %v5985_v50  ;;  %1789 = vrot.lane.b32.xlu0 %v1782_v13, %s7216_s28  ;;  %v1803_v13 = vmul.f32 %v1800_v24, %v5183_v51 }
 0x295   : > { %v5983_v42 = vpop.permute.xlu1 %965 }
 0x296   : > { %1787 = vrot.lane.b32.xlu1 %v1781_v20, %s7216_s28  ;;  %v1802_v20 = vmul.f32 %v1800_v24, %v5170_v17  ;;  %v1861_v24 = vstv %s3124_s15 }
 0x297   : > { %v5993_v23 = vpop.permute.xlu0 %990  ;;  %v1863_v6 = vmul.f32 %v1861_v24, %v5170_v17 }
 0x298   : > { %7702 = vst [vmem:[#allocation107_spill] sm:$0xff] %v5993_v23  ;;  %1807 = vrot.lane.b32.xlu0 %v1801_v36, %s7216_s28 }
 0x299   : > { %v5991_v34 = vpop.permute.xlu1 %992  ;;  %v1869_v49 = vrot.slane %v1863_v6, 4 }
 0x29a   : > { %7701 = vst [vmem:[#allocation156_spill] sm:$0xff] %v5991_v34  ;;  %1791 = vrot.lane.b32.xlu1 %v1783_v55, %s7216_s28  ;;  %v1840_v34 = vstv %s3123_s14  ;;  %s7936_s14 = sld [smem:[#allocation199_spill]] }
 0x29b   : > { %v6001_v54 = vpop.permute.xlu0 %1035  ;;  %v1842_v23 = vmul.f32 %v1840_v34, %v5170_v17  ;;  %v1841_v27 = vmul.f32 %v5977_v35, %v1840_v34 }
 0x29c   : > { %7703 = vst [vmem:[#allocation108_spill] sm:$0xff] %v6001_v54  ;;  %1811 = vrot.lane.b32.xlu0 %v1803_v13, %s7216_s28  ;;  %v1843_v54 = vmul.f32 %v1840_v34, %v5183_v51  ;;  %v1862_v13 = vmul.f32 %v5977_v35, %v1861_v24  ;;  %v1864_v34 = vmul.f32 %v1861_v24, %v5183_v51 }
 0x29d   : > { %v5999_v50 = vpop.permute.xlu1 %1010  ;;  %v1848_v1 = vrot.slane %v1842_v23, 4 }
 0x29e   : > { %1809 = vrot.lane.b32.xlu1 %v1802_v20, %s7216_s28  ;;  %v1847_v20 = vrot.slane %v1841_v27, 4  ;;  %v1850_v23 = vrot.slane %v1843_v54, 4  ;;  %v1871_v24 = vrot.slane %v1864_v34, 4 }
 0x29f   : > { %v6011_v55 = vpop.permute.xlu0 %1062 }
 0x2a0   : > { %7704 = vst [vmem:[#allocation157_spill] sm:$0xff] %v6011_v55  ;;  %1829 = vrot.lane.b32.xlu0 %v1822_v3, %s7216_s28  ;;  %v1849_v10 = vsel %vm192_vm0, %v1847_v20, %v1848_v1  ;;  %v1886_v3 = vstv %s3125_s5  ;;  %v1851_v54 = vsel %vm192_vm0, %v1848_v1, %v1850_v23  ;;  %v1911_v23 = vstv %s6027_s21  ;;  %s7937_s20 = smov %s7936_s14  ;;  %s2945_s5 = scalar_lea.sflag [#allocation8], %s7900_s8 }
 0x2a1   : > { %v6009_v36 = vpop.permute.xlu1 %1037  ;;  %v1888_v25 = vmul.f32 %v1886_v3, %v5170_v17  ;;  %v1889_v20 = vmul.f32 %v1886_v3, %v5183_v51 }
 0x2a2   : > { %1827 = vrot.lane.b32.xlu1 %v1821_v0, %s7216_s28  ;;  %v1868_v0 = vrot.slane %v1862_v13, 4 }
 0x2a3   : > { %v6022_v55 = vpop.permute.xlu0 %1086  ;;  %v1896_v1 = vrot.slane %v1889_v20, 4 }
 0x2a4   : > { %7706 = vst [vmem:[#allocation159_spill] sm:$0xff] %v6022_v55  ;;  %1852 = vrot.lane.b32.xlu0 %v1849_v10, %s7216_s28  ;;  %v1870_v6 = vsel %vm192_vm0, %v1868_v0, %v1869_v49  ;;  %v1887_v10 = vmul.f32 %v5977_v35, %v1886_v3  ;;  %v1912_v3 = vmul.f32 %v5977_v35, %v1911_v23 }
 0x2a5   : > { %v6020_v18 = vpop.permute.xlu1 %1060 }
 0x2a6   : > { %7705 = vst [vmem:[#allocation158_spill] sm:$0xff] %v6020_v18  ;;  %1831 = vrot.lane.b32.xlu1 %v1823_v12, %s7216_s28  ;;  %v1894_v18 = vrot.slane %v1888_v25, 4  ;;  %v1893_v34 = vrot.slane %v1887_v10, 4  ;;  %v1916_v20 = vrot.slane %v1912_v3, 5 }
 0x2a7   : > { %v6033_v55 = vpop.permute.xlu0 %1107 }
 0x2a8   : > { %1873 = vrot.lane.b32.xlu0 %v1870_v6, %s7216_s28  ;;  %v1895_v6 = vsel %vm192_vm0, %v1893_v34, %v1894_v18 }
 0x2a9   : > { %v6031_v27 = vpop.permute.xlu1 %1084 }
 0x2aa   : > { %7707 = vst [vmem:[#allocation153_spill] sm:$0xff] %v6031_v27  ;;  %1854 = vrot.lane.b32.xlu1 %v1851_v54, %s7216_s28  ;;  %v1872_v27 = vsel %vm192_vm0, %v1869_v49, %v1871_v24  ;;  %v1913_v49 = vmul.f32 %v1911_v23, %v5170_v17 }
 0x2ab   : > { %v6044_v13 = vpop.permute.xlu0 %1130 }
 0x2ac   : > { %7708 = vst [vmem:[#allocation109_spill] sm:$0xff] %v6044_v13  ;;  %1877 = vrot.lane.b32.xlu0 %v1871_v24, %s7216_s28  ;;  %v1897_v13 = vsel %vm192_vm0, %v1894_v18, %v1896_v1 }
 0x2ad   : > { %v6042_v12 = vpop.permute.xlu1 %1105 }
 0x2ae   : > { %1875 = vrot.lane.b32.xlu1 %v1872_v27, %s7216_s28  ;;  %v1932_v27 = vstv %s3127_s4  ;;  %s3437_s4 = smov [#allocation11]  }
 0x2af   : > { %v6052_v54 = vpop.permute.xlu0 %1157  ;;  %v1934_v10 = vmul.f32 %v1932_v27, %v5170_v17  ;;  %v1935_v34 = vmul.f32 %v1932_v27, %v5183_v51  ;;  %v1933_v18 = vmul.f32 %v5977_v35, %v1932_v27 }
 0x2b0   : > { %7710 = vst [vmem:[#allocation64_spill] sm:$0xff] %v6052_v54  ;;  %1900 = vrot.lane.b32.xlu0 %v1897_v13, %s7216_s28  ;;  %v1917_v54 = vrot.slane %v1913_v49, 5 }
 0x2b1   : > { %v6050_v0 = vpop.permute.xlu1 %1132  ;;  %v1942_v3 = vrot.slane %v1935_v34, 1 }
 0x2b2   : > { %7709 = vst [vmem:[#allocation110_spill] sm:$0xff] %v6050_v0  ;;  %1898 = vrot.lane.b32.xlu1 %v1895_v6, %s7216_s28  ;;  %v1940_v6 = vrot.slane %v1934_v10, 1  ;;  %v1980_v10 = vmul.f32 %v1978_v2, %v5170_v17 }
 0x2b3   : > { %v6062_v24 = vpop.permute.xlu0 %1256 }
 0x2b4   : > { %7712 = vst [vmem:[#allocation116_spill] sm:$0xff] %v6062_v24  ;;  %1919 = vrot.lane.b32.xlu0 %v1916_v20, %s7243_s29  ;;  %v1918_v24 = vsel %vm674_vm6, %v1916_v20, %v1917_v54  ;;  %v1943_v34 = vsel %vm698_vm5, %v1940_v6, %v1942_v3 }
 0x2b5   : > { %v6060_v25 = vpop.permute.xlu1 %1155 }
 0x2b6   : > { %7711 = vst [vmem:[#allocation114_spill] sm:$0xff] %v6060_v25  ;;  %1902 = vrot.lane.b32.xlu1 %v1896_v1, %s7216_s28  ;;  %v1953_v25 = vstv %s3128_s30  ;;  %v1939_v1 = vrot.slane %v1933_v18, 1  ;;  %s7907_s28 = smov 80   ;;  %s3328_s30 = sshll.u32 %s3437_s4, 4  ;;  %s3329_s30 = int_to_ptr.vmem [resolvable:$false] %s3328_s30 }
 0x2b7   : > { %v6071_v13 = vpop.permute.xlu0 %1277  ;;  %v1955_v0 = vmul.f32 %v1953_v25, %v5170_v17  ;;  %v1956_v49 = vmul.f32 %v1953_v25, %v5183_v51  ;;  %v1954_v27 = vmul.f32 %v5977_v35, %v1953_v25  ;;  %v1979_v25 = vmul.f32 %v5977_v35, %v1978_v2  ;;  %s3330_s1 = scalar_lea.vmem %s3329_s30, 64 }
 0x2b8   : > { %7714 = vst [vmem:[#allocation69_spill] sm:$0xff] %v6071_v13  ;;  %1923 = vrot.lane.b32.xlu0 %v1917_v54, %s7243_s29  ;;  %v1941_v20 = vsel %vm698_vm5, %v1939_v1, %v1940_v6 }
 0x2b9   : > { %v6069_v23 = vpop.permute.xlu1 %1254  ;;  %v1961_v40 = vrot.slane %v1955_v0, 1  ;;  %v1963_v38 = vrot.slane %v1956_v49, 1  ;;  %v1960_v54 = vrot.slane %v1954_v27, 1  ;;  %v1981_v0 = vmul.f32 %v1978_v2, %v5183_v51 }
 0x2ba   : > { %7713 = vst [vmem:[#allocation161_spill] sm:$0xff] %v6069_v23  ;;  %1921 = vrot.lane.b32.xlu1 %v1918_v24, %s7243_s29  ;;  %v1985_v6 = vrot.slane %v1979_v25, 1  ;;  %v2003_v27 = vstv %s3130_s3  ;;  %v2028_v25 = vstv %s3131_s18 }
 0x2bb   : > { %v6081_v13 = vpop.permute.xlu0 %1300  ;;  %v1964_v1 = vsel %vm698_vm5, %v1961_v40, %v1963_v38  ;;  %v2004_v2 = vmul.f32 %v5977_v35, %v2003_v27 }
 0x2bc   : > { %7716 = vst [vmem:[#allocation117_spill] sm:$0xff] %v6081_v13  ;;  %1946 = vrot.lane.b32.xlu0 %v1943_v34, %s7243_s29  ;;  %v1962_v13 = vsel %vm698_vm5, %v1960_v54, %v1961_v40  ;;  %v1988_v34 = vrot.slane %v1981_v0, 1  ;;  %v2005_v54 = vmul.f32 %v2003_v27, %v5170_v17  ;;  %v2006_v40 = vmul.f32 %v2003_v27, %v5183_v51  ;;  %v7722_v27 = vld [vmem:[#allocation58_spill] sm:$0xff] }
 0x2bd   : > { %v6079_v23 = vpop.permute.xlu1 %1275  ;;  %v2030_v0 = vmul.f32 %v2028_v25, %v5170_v17  ;;  %v2031_v17 = vmul.f32 %v2028_v25, %v5183_v51 }
 0x2be   : > { %7715 = vst [vmem:[#allocation115_spill] sm:$0xff] %v6079_v23  ;;  %1944 = vrot.lane.b32.xlu1 %v1941_v20, %s7243_s29  ;;  %v1986_v23 = vrot.slane %v1980_v10, 1 }
 0x2bf   : > { %v6091_v18 = vpop.permute.xlu0 %1323 }
 0x2c0   : > { %7718 = vst [vmem:[#allocation66_spill] sm:$0xff] %v6091_v18  ;;  %1967 = vrot.lane.b32.xlu0 %v1964_v1, %s7243_s29  ;;  %v1987_v20 = vsel %vm698_vm5, %v1985_v6, %v1986_v23  ;;  %v1989_v1 = vsel %vm698_vm5, %v1986_v23, %v1988_v34  ;;  %v2013_v6 = vrot.slane %v2006_v40, 1  ;;  %v2036_v40 = vrot.slane %v2030_v0, 5 }
 0x2c1   : > { %v6089_v24 = vpop.permute.xlu1 %1302  ;;  %v2038_v0 = vrot.slane %v2031_v17, 5  ;;  %v7729_v17 = vld [vmem:[#allocation111_spill] sm:$0xff] }
 0x2c2   : > { %7717 = vst [vmem:[#allocation162_spill] sm:$0xff] %v6089_v24  ;;  %1965 = vrot.lane.b32.xlu1 %v1962_v13, %s7243_s29 }
 0x2c3   : > { %v6100_v49 = vpop.permute.xlu0 %1346 }
 0x2c4   : > { %7720 = vst [vmem:[#allocation163_spill] sm:$0xff] %v6100_v49  ;;  %1990 = vrot.lane.b32.xlu0 %v1987_v20, %s7243_s29  ;;  %v2011_v49 = vrot.slane %v2005_v54, 1  ;;  %v2029_v20 = vmul.f32 %v5977_v35, %v2028_v25  ;;  %v7727_v25 = vld [vmem:[#allocation71_spill] sm:$0xff] }
 0x2c5   : > { %v6098_v3 = vpop.permute.xlu1 %1348 }
 0x2c6   : > { %7719 = vst [vmem:[#allocation118_spill] sm:$0xff] %v6098_v3  ;;  %1969 = vrot.lane.b32.xlu1 %v1963_v38, %s7243_s29  ;;  %v2010_v38 = vrot.slane %v2004_v2, 1  ;;  %v3276_v3 = vld [vmem:[#allocation4 + $0x10] sm:$0x3f]  ;;  %v2014_v54 = vsel %vm698_vm5, %v2011_v49, %v2013_v6 }
 0x2c7   : > { %v6110_v10 = vpop.permute.xlu0 %1367  ;;  %v593_v18 = vmul.f32 %v3276_v3, %v7722_v27  ;;  %v2035_v27 = vrot.slane %v2029_v20, 5 }
 0x2c8   : > { %1994 = vrot.lane.b32.xlu0 %v1988_v34, %s7243_s29  ;;  %v2012_v23 = vsel %vm698_vm5, %v2010_v38, %v2011_v49  ;;  %v7725_v34 = vld [vmem:[#allocation61_spill] sm:$0xff] }
 0x2c9   : > { %v6108_v13 = vpop.permute.xlu1 %1369  ;;  %v7726_v2 = vrot.slane %v7725_v34, 4  ;;  %v2037_v49 = vsel %vm674_vm6, %v2035_v27, %v2036_v40 }
 0x2ca   : > { %7721 = vst [vmem:[#allocation67_spill] sm:$0xff] %v6108_v13  ;;  %1992 = vrot.lane.b32.xlu1 %v1989_v1, %s7243_s29 }
 0x2cb   : > { %v6120_v13 = vpop.permute.xlu0 %1394  ;;  %v648_v1 = vadd.f32 %v7726_v2, %v593_v18 }
 0x2cc   : > { %7724 = vst [vmem:[#allocation164_spill] sm:$0xff] %v6120_v13  ;;  %2017 = vrot.lane.b32.xlu0 %v2014_v54, %s7243_s29  ;;  %v2052_v13 = vmul.f32 %v7727_v25, %v5183_v51  ;;  %v2039_v54 = vsel %vm674_vm6, %v2036_v40, %v2038_v0  ;;  %v606_v51 = vstv %s3066_s22  ;;  %v7732_v25 = vrot.slane %v5198_v16, 5 }
 0x2cd   : > { %v6118_v24 = vpop.permute.xlu1 %1392  ;;  %v736_v38 = vadd.f32 %v5802_v57, %v648_v1  ;;  %v7728_v57 = vld [vmem:[#allocation60_spill] sm:$0xff]  ;;  %v7730_v1 = vld [vmem:[#allocation150_spill] sm:$0xff] }
 0x2ce   : > { %7723 = vst [vmem:[#allocation122_spill] sm:$0xff] %v6118_v24  ;;  %2015 = vrot.lane.b32.xlu1 %v2012_v23, %s7243_s29  ;;  %v2059_v34 = vrot.slane %v2052_v13, 5  ;;  %v601_v2 = vmul.f32 %v3276_v3, %v7728_v57  ;;  %v7731_v27 = vrot.slane %v7730_v1, 4  ;;  %v3278_v1 = vld [vmem:[#allocation4 + $0x8] sm:$0xff] }
 0x2cf   : > { %v6131_v24 = vpop.permute.xlu0 %1417  ;;  %v832_v23 = vadd.f32 %v5828_v43, %v736_v38  ;;  %v734_v43 = vadd.f32 %v5905_v30, %v7729_v17 }
 0x2d0   : > { %2040 = vrot.lane.b32.xlu0 %v2037_v49, %s7243_s29  ;;  %v667_v38 = vadd.f32 %v7731_v27, %v601_v2  ;;  %v608_v27 = vmul.f32 %v3278_v1, %v606_v51 }
 0x2d1   : > { %v6129_v35 = vpop.permute.xlu1 %1419  ;;  %v830_v0 = vadd.f32 %v5932_v59, %v734_v43  ;;  %v7733_v59 = vld [vmem:[#allocation113_spill] sm:$0xff] }
 0x2d2   : > { %2019 = vrot.lane.b32.xlu1 %v2013_v6, %s7243_s29  ;;  %v926_v6 = vadd.f32 %v5826_v47, %v832_v23  ;;  %v609_v23 = vmul.f32 %v3276_v3, %v606_v51  ;;  %v761_v30 = vadd.f32 %v5820_v48, %v667_v38  ;;  %v759_v16 = vadd.f32 %v5907_v14, %v7733_v59  ;;  %v7734_v48 = vld [vmem:[#allocation160_spill] sm:$0xff] }
 0x2d3   : > { %v6142_v20 = vpop.permute.xlu0 %1444  ;;  %v924_v57 = vadd.f32 %v5965_v26, %v830_v0  ;;  %v735_v43 = vadd.f32 %v5898_v62, %v7734_v48  ;;  %v7748_v59 = vld [vmem:[#allocation108_spill] sm:$0xff]  ;;  %v7750_v48 = vld [vmem:[#allocation147_spill] sm:$0xff] }
 0x2d4   : > { %2061 = vrot.lane.b32.xlu0 %v5259_v7, %s7243_s29  ;;  %v1019_v13 = vadd.f32 %v5848_v41, %v926_v6  ;;  %v2060_v7 = vsel %vm674_vm6, %v7732_v25, %v2059_v34  ;;  %v689_v41 = vadd.f32 %v5812_v45, %v609_v23 }
 0x2d5   : > { %v6140_v18 = vpop.permute.xlu1 %1442  ;;  %v831_v45 = vadd.f32 %v5939_v61, %v735_v43  ;;  %v1017_v14 = vadd.f32 %v5678_v8, %v924_v57  ;;  %v7745_v57 = vld [vmem:[#allocation85_spill] sm:$0xff] }
 0x2d6   : > { %2042 = vrot.lane.b32.xlu1 %v2039_v54, %s7243_s29  ;;  %v3277_v54 = vld [vmem:[#allocation4] sm:$0xff]  ;;  %v1116_v3 = vadd.f32 %v5846_v29, %v1019_v13  ;;  %v786_v62 = vadd.f32 %v5810_v11, %v689_v41  ;;  %v7736_v13 = vld [vmem:[#allocation121_spill] sm:$0xff] }
 0x2d7   : > { %v6156_v40 = vpop.permute.xlu0 %1465  ;;  %v607_v47 = vmul.f32 %v3277_v54, %v606_v51  ;;  %v925_v61 = vadd.f32 %v5967_v5, %v831_v45  ;;  %v1114_v8 = vadd.f32 %v6042_v12, %v1017_v14  ;;  %v688_v12 = vadd.f32 %v5886_v60, %v608_v27  ;;  %v7741_v54 = vld [vmem:[#allocation34_spill] sm:$0xff]  ;;  %v7747_v41 = vld [vmem:[#allocation152_spill] sm:$0xff]  ;;  %v7753_v14 = vld [vmem:[#allocation190_spill] sm:$0xff] }
 0x2d8   : > { %2065 = vrot.lane.b32.xlu0 %v2059_v34, %s7243_s29  ;;  %v854_v34 = vadd.f32 %v5818_v4, %v761_v30  ;;  %v852_v4 = vadd.f32 %v5473_v15, %v759_v16  ;;  %v7737_v15 = vrot.slane %v7406_v28, 6  ;;  %v7749_v16 = vld [vmem:[#allocation115_spill] sm:$0xff] }
 0x2d9   : > { %v6154_v49 = vpop.permute.xlu1 %1463  ;;  %v687_v2 = vadd.f32 %v5528_v31, %v607_v47  ;;  %v7735_v31 = vrot.slane %v7404_v53, 6  ;;  %v1200_v53 = vadd.f32 %v5779_v39, %v1116_v3  ;;  %v1018_v5 = vadd.f32 %v5999_v50, %v925_v61 }
 0x2da   : > { %2063 = vrot.lane.b32.xlu1 %v2060_v7, %s7243_s29  ;;  %v951_v29 = vadd.f32 %v5840_v56, %v854_v34  ;;  %v879_v56 = vadd.f32 %v5949_v32, %v786_v62  ;;  %v949_v51 = vadd.f32 %v5975_v19, %v852_v4  ;;  %v7738_v32 = vld [vmem:[#allocation112_spill] sm:$0xff]  ;;  %v7740_v7 = vld [vmem:[#allocation167_spill] sm:$0xff]  ;;  %v785_v47 = vadd.f32 %v7741_v54, %v688_v12  ;;  %v7751_v34 = vld [vmem:[#allocation157_spill] sm:$0xff]  ;;  %s7908_s29 = smov 96  }
 0x2db   : > { %v6173_v17 = vpop.permute.xlu0 %1484  ;;  %v784_v26 = vadd.f32 %v5922_v21, %v687_v2  ;;  %v1286_v39 = vadd.f32 %v5862_v44, %v1200_v53  ;;  %v711_v19 = vadd.f32 %v5888_v58, %v7738_v32  ;;  %v1115_v50 = vadd.f32 %v6033_v55, %v1018_v5  ;;  %v7742_v58 = vld [vmem:[#allocation35_spill] sm:$0xff]  ;;  %v7746_v2 = vld [vmem:[#allocation151_spill] sm:$0xff]  ;;  %v7754_v62 = vld [vmem:[#allocation106_spill] sm:$0xff] }
 0x2dc   : > { %2084 = vrot.lane.b32.xlu0 %v5266_v33, %s7287_s16  ;;  %v760_v33 = vadd.f32 %v5914_v22, %v7736_v13  ;;  %v1044_v0 = vadd.f32 %v6009_v36, %v951_v29  ;;  %v1198_v60 = vadd.f32 %v7740_v7, %v1114_v8  ;;  %v976_v23 = vadd.f32 %v7742_v58, %v879_v56  ;;  %v7744_v36 = vld [vmem:[#allocation82_spill] sm:$0xff]  ;;  %v7757_v56 = vld [vmem:[#allocation149_spill] sm:$0xff] }
 0x2dd   : > { %v6171_v6 = vpop.permute.xlu1 %1467  ;;  %v877_v11 = vadd.f32 %v5604_v9, %v784_v26  ;;  %v878_v4 = vadd.f32 %v7754_v62, %v785_v47  ;;  %v7755_v53 = vld [vmem:[#allocation110_spill] sm:$0xff]  ;;  %v7761_v32 = vld [vmem:[#allocation81_spill] sm:$0xff]  ;;  %v7768_v47 = vld [vmem:[#allocation59_spill] sm:$0xff] }
 0x2de   : > { %2082 = vrot.lane.b32.xlu1 %v7735_v31, %s7287_s16  ;;  %v853_v22 = vadd.f32 %v5941_v63, %v760_v33  ;;  %v1284_v3 = vadd.f32 %v7749_v16, %v1198_v60  ;;  %v1141_v43 = vadd.f32 %v7750_v48, %v1044_v0  ;;  %v1069_v26 = vadd.f32 %v7751_v34, %v976_v23  ;;  %v7752_v31 = vld [vmem:[#allocation109_spill] sm:$0xff]  ;;  %v7756_v33 = vld [vmem:[#allocation191_spill] sm:$0xff]  ;;  %v7760_v12 = vld [vmem:[#allocation86_spill] sm:$0xff] }
 0x2df   : > { %v6192_v38 = vpop.permute.xlu0 %1488  ;;  %v974_v9 = vadd.f32 %v5983_v42, %v877_v11  ;;  %v7743_v42 = vld [vmem:[#allocation102_spill] sm:$0xff]  ;;  %v1199_v61 = vadd.f32 %v7756_v33, %v1115_v50  ;;  %v7758_v11 = vld [vmem:[#allocation63_spill] sm:$0xff]  ;;  %v7775_v34 = vld [vmem:[#allocation117_spill] sm:$0xff] }
 0x2e0   : > { %2109 = vrot.lane.b32.xlu0 %v5274_v46, %s7287_s16  ;;  %v7739_v46 = vld [vmem:[#allocation65_spill] sm:$0xff]  ;;  %v950_v63 = vadd.f32 %v5973_v52, %v853_v22  ;;  %v1042_v30 = vadd.f32 %v7743_v42, %v949_v51  ;;  %v807_v52 = vadd.f32 %v7747_v41, %v711_v19  ;;  %v1376_v8 = vadd.f32 %v6110_v10, %v1284_v3  ;;  %v7759_v22 = vld [vmem:[#allocation114_spill] sm:$0xff]  ;;  %v7767_v60 = vld [vmem:[#allocation143_spill] sm:$0xff] }
 0x2e1   : > { %v6190_v21 = vpop.permute.xlu1 %1486  ;;  %v710_v44 = vadd.f32 %v5896_v37, %v7739_v46  ;;  %v1067_v29 = vadd.f32 %v7753_v14, %v974_v9  ;;  %v1378_v51 = vadd.f32 %v7757_v56, %v1286_v39  ;;  %v7762_v19 = vrot.slane %v7761_v32, 2  ;;  %v7763_v9 = vld [vmem:[#allocation62_spill] sm:$0xff]  ;;  %v7764_v46 = vld [vmem:[#allocation155_spill] sm:$0xff]  ;;  %v7766_v39 = vld [vmem:[#allocation156_spill] sm:$0xff] }
 0x2e2   : > { %2107 = vrot.lane.b32.xlu1 %v7737_v15, %s7287_s16  ;;  %v1043_v55 = vadd.f32 %v7748_v59, %v950_v63  ;;  %v1139_v45 = vadd.f32 %v7752_v31, %v1042_v30  ;;  %v901_v15 = vadd.f32 %v7758_v11, %v807_v52  ;;  %v7765_v63 = vld [vmem:[#allocation69_spill] sm:$0xff]  ;;  %v1472_v10 = vadd.f32 %v6154_v49, %v1376_v8  ;;  %v7769_v23 = vld [vmem:[#allocation170_spill] sm:$0xff]  ;;  %v7772_v52 = vld [vmem:[#allocation67_spill] sm:$0xff] }
 0x2e3   : > { %v6217_v25 = vpop.permute.xlu0 %1511  ;;  %v806_v37 = vadd.f32 %v7746_v2, %v710_v44  ;;  %v1164_v5 = vadd.f32 %v7759_v22, %v1067_v29  ;;  %v975_v44 = vadd.f32 %v7764_v46, %v878_v4  ;;  %v1285_v50 = vadd.f32 %v7765_v63, %v1199_v61  ;;  %v7773_v16 = vld [vmem:[#allocation158_spill] sm:$0xff]  ;;  %v7782_v61 = vld [vmem:[#allocation145_spill] sm:$0xff]  ;;  %v7783_v56 = vld [vmem:[#allocation64_spill] sm:$0xff] }
 0x2e4   : > { %2203 = vrot.lane.b32.xlu0 %v7745_v57, %s7287_s16  ;;  %v1140_v13 = vadd.f32 %v7755_v53, %v1043_v55  ;;  %v997_v7 = vadd.f32 %v7766_v39, %v901_v15  ;;  %v1220_v54 = vadd.f32 %v7767_v60, %v1141_v43  ;;  %v1166_v58 = vadd.f32 %v7768_v47, %v1069_v26  ;;  %v7770_v57 = vld [vmem:[#allocation107_spill] sm:$0xff]  ;;  %v7774_v3 = vld [vmem:[#allocation178_spill] sm:$0xff]  ;;  %v7776_v26 = vld [vmem:[#allocation125_spill] sm:$0xff] }
 0x2e5   : > { %v6215_v28 = vpop.permute.xlu1 %1509  ;;  %v900_v0 = vadd.f32 %v7763_v9, %v806_v37  ;;  %v1218_v42 = vadd.f32 %v7769_v23, %v1139_v45  ;;  %v7771_v37 = vld [vmem:[#allocation104_spill] sm:$0xff]  ;;  %v1377_v59 = vadd.f32 %v7772_v52, %v1285_v50  ;;  %v1068_v49 = vadd.f32 %v7773_v16, %v975_v44  ;;  %v7778_v45 = vld [vmem:[#allocation87_spill] sm:$0xff]  ;;  %v7779_v14 = vld [vmem:[#allocation162_spill] sm:$0xff] }
 0x2e6   : > { %2111 = vrot.lane.b32.xlu1 %v7744_v36, %s7287_s16  ;;  %v1219_v41 = vadd.f32 %v7771_v37, %v1140_v13  ;;  %v1238_v48 = vadd.f32 %v7774_v3, %v1164_v5  ;;  %v7777_v31 = vrot.slane %v7776_v26, 6  ;;  %v1474_v4 = vadd.f32 %v6171_v6, %v1378_v51  ;;  %v7780_v53 = vld [vmem:[#allocation127_spill] sm:$0xff]  ;;  %v7784_v15 = vld [vmem:[#allocation122_spill] sm:$0xff]  ;;  %v7786_v9 = vld [vmem:[#allocation164_spill] sm:$0xff] }
 0x2e7   : > { %v6241_v27 = vpop.permute.xlu0 %1534  ;;  %v996_v2 = vadd.f32 %v7770_v57, %v900_v0  ;;  %v1309_v43 = vadd.f32 %v7775_v34, %v1218_v42  ;;  %v1473_v62 = vadd.f32 %v6156_v40, %v1377_v59  ;;  %v7781_v13 = vrot.slane %v7780_v53, 7  ;;  %v7785_v5 = vld [vmem:[#allocation146_spill] sm:$0xff]  ;;  %v7787_v40 = vld [vmem:[#allocation175_spill] sm:$0xff]  ;;  %v7789_v50 = vld [vmem:[#allocation153_spill] sm:$0xff] }
 0x2e8   : > { %2207 = vrot.lane.b32.xlu0 %v7762_v19, %s7287_s16  ;;  %v1310_v29 = vadd.f32 %v7779_v14, %v1219_v41  ;;  %v1240_v8 = vadd.f32 %v7782_v61, %v1166_v58  ;;  %v1165_v11 = vadd.f32 %v7783_v56, %v1068_v49  ;;  %v7788_v6 = vld [vmem:[#allocation159_spill] sm:$0xff]  ;;  %v7790_v39 = vld [vmem:[#allocation80_spill] sm:$0xff]  ;;  %v7791_v47 = vld [vmem:[#allocation126_spill] sm:$0xff] }
 0x2e9   : > { %v6239_v1 = vpop.permute.xlu1 %1513  ;;  %v1401_v22 = vadd.f32 %v7784_v15, %v1309_v43  ;;  %v1091_v51 = vadd.f32 %v7788_v6, %v997_v7  ;;  %v1330_v60 = vadd.f32 %v7790_v39, %v1238_v48  ;;  %v7795_v37 = vld [vmem:[#allocation83_spill] sm:$0xff]  ;;  %v7797_v52 = vld [vmem:[#allocation144_spill] sm:$0xff] }
 0x2ea   : > { %2205 = vrot.lane.b32.xlu1 %v7760_v12, %s7287_s16  ;;  %v1311_v12 = vadd.f32 %v7785_v5, %v1220_v54  ;;  %v1402_v0 = vadd.f32 %v7786_v9, %v1310_v29  ;;  %v7792_v54 = vld [vmem:[#allocation84_spill] sm:$0xff]  ;;  %v7796_v41 = vrot.slane %v7795_v37, 7  ;;  %v7803_v29 = vld [vmem:[#allocation93_spill] sm:$0xff]  ;;  %v7809_v15 = vld [vmem:[#allocation135_spill] sm:$0xff] }
 0x2eb   : > { %v1556_v36 = vpop.permute.xlu0 %1555  ;;  %v7793_v58 = vrot.slane %v7792_v54, 2  ;;  %v1493_v23 = vadd.f32 %v6173_v17, %v1401_v22  ;;  %v1426_v59 = vadd.f32 %v6131_v24, %v1330_v60  ;;  %v7799_v49 = vld [vmem:[#allocation148_spill] sm:$0xff]  ;;  %v7800_v17 = vld [vmem:[#allocation177_spill] sm:$0xff]  ;;  %v7805_v24 = vld [vmem:[#allocation66_spill] sm:$0xff]  ;;  %v7810_v22 = vrot.slane %v7809_v15, 7 }
 0x2ec   : > { %v1564_v55 = vadd.f32 %v1556_v36, %v1472_v10  ;;  %2153 = vrot.lane.b32.xlu0 %v7778_v45, %s7287_s16  ;;  %v1090_v10 = vadd.f32 %v7789_v50, %v996_v2  ;;  %v1494_v42 = vadd.f32 %v6190_v21, %v1402_v0  ;;  %v7794_v36 = vld [vmem:[#allocation120_spill] sm:$0xff]  ;;  %v1239_v2 = vadd.f32 %v7797_v52, %v1165_v11  ;;  %v7801_v21 = vld [vmem:[#allocation169_spill] sm:$0xff]  ;;  %v7817_v54 = vld [vmem:[#allocation118_spill] sm:$0xff] }
 0x2ed   : > { %v6263_v30 = vpop.permute.xlu1 %1536  ;;  %v1332_v3 = vadd.f32 %v7799_v49, %v1240_v8  ;;  %v7802_v45 = vrot.slane %v7801_v21, 3  ;;  %v7808_v8 = vld [vmem:[#allocation31_spill] sm:$0xff]  ;;  %v1518_v11 = vadd.f32 %v6215_v28, %v1426_v59  ;;  %v7816_v28 = vld [vmem:[#allocation184_spill] sm:$0xff]  ;;  %v7822_v52 = vld [vmem:[#allocation123_spill] sm:$0xff] }
 0x2ee   : > { %2086 = vrot.lane.b32.xlu1 %v7777_v31, %s7287_s16  ;;  %v1650_v33 = vadd.f32 %v7781_v13, %v1564_v55  ;;  %v7798_v55 = vld [vmem:[#allocation105_spill] sm:$0xff]  ;;  %v1331_v13 = vadd.f32 %v7805_v24, %v1239_v2  ;;  %v7823_v2 = vrot.slane %v7822_v52, 7 }
 0x2ef   : > { %v1560_v19 = vpop.permute.xlu0 %1559  ;;  %v1403_v16 = vadd.f32 %v7798_v55, %v1311_v12  ;;  %v7811_v12 = vld [vmem:[#allocation130_spill] sm:$0xff]  ;;  %v7813_v0 = vld [vmem:[#allocation161_spill] sm:$0xff] }
 0x2f0   : > { %v1566_v44 = vadd.f32 %v1560_v19, %v1474_v4  ;;  %v6287_v63 = vadd.f32 %v7787_v40, %v1650_v33  ;;  %2157 = vrot.lane.b32.xlu0 %v7793_v58, %s7287_s16  ;;  %v7804_v4 = vld [vmem:[#allocation119_spill] sm:$0xff]  ;;  %v7806_v33 = vld [vmem:[#allocation70_spill] sm:$0xff]  ;;  %v7812_v19 = vld [vmem:[#allocation116_spill] sm:$0xff] }
 0x2f1   : > { %v1558_v32 = vpop.permute.xlu1 %1557  ;;  %v1179_v53 = vadd.f32 %v7804_v4, %v1090_v10  ;;  %v7807_v61 = vrot.slane %v7806_v33, 7  ;;  %v1495_v56 = vadd.f32 %v6192_v38, %v1403_v16  ;;  %v7814_v40 = vld [vmem:[#allocation134_spill] sm:$0xff]  ;;  %v7833_v15 = vld [vmem:[#allocation181_spill] sm:$0xff] }
 0x2f2   : > { %v1565_v46 = vadd.f32 %v1558_v32, %v1473_v62  ;;  %2155 = vrot.lane.b32.xlu1 %v7791_v47, %s7287_s16  ;;  %v1652_v7 = vadd.f32 %v7796_v41, %v1566_v44  ;;  %v1180_v62 = vadd.f32 %v7803_v29, %v1091_v51  ;;  %v1427_v44 = vadd.f32 %v6129_v35, %v1331_v13  ;;  %v7815_v38 = vld [vmem:[#allocation182_spill] sm:$0xff]  ;;  %v7820_v35 = vld [vmem:[#allocation131_spill] sm:$0xff]  ;;  %v7821_v41 = vld [vmem:[#allocation72_spill] sm:$0xff] }
 0x2f3   : > { %v1583_v34 = vpop.permute.xlu0 %1582  ;;  %v1428_v6 = vadd.f32 %v7814_v40, %v1332_v3  ;;  %v7840_v40 = vld [vmem:[#allocation165_spill] sm:$0xff] }
 0x2f4   : > { %v1651_v57 = vadd.f32 %v7794_v36, %v1565_v46  ;;  %v1590_v26 = vadd.f32 %v1583_v34, %v1494_v42  ;;  %v6311_v14 = vadd.f32 %v7802_v45, %v1652_v7  ;;  %2297 = vrot.lane.b32.xlu0 %v7808_v8, %s7177_s17  ;;  %v1261_v9 = vadd.f32 %v7812_v19, %v1180_v62  ;;  %v7819_v36 = vld [vmem:[#allocation36_spill] sm:$0xff]  ;;  %v7828_v45 = vld [vmem:[#allocation124_spill] sm:$0xff]  ;;  %v7830_v62 = vld [vmem:[#allocation166_spill] sm:$0xff] }
 0x2f5   : > { %v1581_v48 = vpop.permute.xlu1 %1580  ;;  %v1260_v46 = vadd.f32 %v7813_v0, %v1179_v53  ;;  %v1520_v37 = vadd.f32 %v6239_v1, %v1428_v6  ;;  %v7827_v1 = vld [vmem:[#allocation168_spill] sm:$0xff]  ;;  %v7829_v29 = vrot.slane %v7828_v45, 2  ;;  %v7841_v6 = vrot.slane %v7840_v40, 7 }
 0x2f6   : > { %v1589_v43 = vadd.f32 %v1581_v48, %v1493_v23  ;;  %v6307_v31 = vadd.f32 %v7800_v17, %v1651_v57  ;;  %2295 = vrot.lane.b32.xlu1 %v7807_v61, %s7177_s17  ;;  %v1670_v32 = vadd.f32 %v7811_v12, %v1590_v26  ;;  %v1353_v58 = vadd.f32 %v7817_v54, %v1261_v9  ;;  %v7818_v23 = vld [vmem:[#allocation163_spill] sm:$0xff]  ;;  %v7831_v53 = vld [vmem:[#allocation136_spill] sm:$0xff]  ;;  %v7839_v9 = vld [vmem:[#allocation173_spill] sm:$0xff] }
 0x2f7   : > { %v1606_v50 = vpop.permute.xlu0 %1605  ;;  %v1352_v42 = vadd.f32 %v7818_v23, %v1260_v46  ;;  %v1519_v57 = vadd.f32 %v6217_v25, %v1427_v44  ;;  %v7826_v25 = vld [vmem:[#allocation186_spill] sm:$0xff]  ;;  %v7835_v12 = vld [vmem:[#allocation76_spill] sm:$0xff]  ;;  %v7846_v23 = vld [vmem:[#allocation97_spill] sm:$0xff] }
 0x2f8   : > { %v1669_v5 = vadd.f32 %v7810_v22, %v1589_v43  ;;  %v1614_v39 = vadd.f32 %v1606_v50, %v1518_v11  ;;  %v6334_v47 = vadd.f32 %v7816_v28, %v1670_v32  ;;  %2178 = vrot.lane.b32.xlu0 %v7820_v35, %s7287_s16  ;;  %v1449_v16 = vadd.f32 %v6142_v20, %v1353_v58  ;;  %v7824_v43 = vld [vmem:[#allocation176_spill] sm:$0xff]  ;;  %v7845_v58 = vld [vmem:[#allocation183_spill] sm:$0xff] }
 0x2f9   : > { %v1585_v51 = vpop.permute.xlu1 %1584  ;;  %v1448_v55 = vadd.f32 %v6140_v18, %v1352_v42  ;;  %v7825_v26 = vrot.slane %v7824_v43, 3  ;;  %v7834_v22 = vrot.slane %v7833_v15, 3  ;;  %v7838_v32 = vld [vmem:[#allocation172_spill] sm:$0xff]  ;;  %v7847_v42 = vrot.slane %v7846_v23, 3 }
 0x2fa   : > { %v1591_v10 = vadd.f32 %v1585_v51, %v1495_v56  ;;  %v6331_v60 = vadd.f32 %v7815_v38, %v1669_v5  ;;  %2299 = vrot.lane.b32.xlu1 %v7819_v36, %s7177_s17  ;;  %v1688_v59 = vadd.f32 %v7823_v2, %v1614_v39  ;;  %v1541_v20 = vadd.f32 %v6263_v30, %v1449_v16  ;;  %v7832_v56 = vld [vmem:[#allocation188_spill] sm:$0xff]  ;;  %v7837_v30 = vld [vmem:[#allocation171_spill] sm:$0xff]  ;;  %v7842_v51 = vld [vmem:[#allocation174_spill] sm:$0xff] }
 0x2fb   : > { %v1610_v3 = vpop.permute.xlu0 %1609  ;;  %v1540_v18 = vadd.f32 %v6241_v27, %v1448_v55  ;;  %v7836_v27 = vrot.slane %v7835_v12, 7  ;;  %v7843_v39 = vld [vmem:[#allocation179_spill] sm:$0xff]  ;;  %v7844_v38 = vld [vmem:[#allocation180_spill] sm:$0xff]  ;;  %v2418_v15 = vstv %s3148_s10  ;;  %v7861_v12 = vld [vmem:[#allocation98_spill] sm:$0xff] }
 0x2fc   : > { %v1671_v7 = vadd.f32 %v7821_v41, %v1591_v10  ;;  %v1616_v34 = vadd.f32 %v1610_v3, %v1520_v37  ;;  %v6354_v21 = vadd.f32 %v7826_v25, %v1688_v59  ;;  %2182 = vrot.lane.b32.xlu0 %v7829_v29, %s7287_s16  ;;  %v7850_v41 = vld [vmem:[#allocation185_spill] sm:$0xff]  ;;  %v7851_v2 = vld [vmem:[#allocation100_spill] sm:$0xff]  ;;  %v7854_v3 = vld [vmem:[#allocation187_spill] sm:$0xff] }
 0x2fd   : > { %v1608_v49 = vpop.permute.xlu1 %1607  ;;  %v7852_v59 = vld [vmem:[#allocation88_spill] sm:$0xff]  ;;  %v7856_v25 = vld [vmem:[#allocation137_spill] sm:$0xff] }
 0x2fe   : > { %v1615_v48 = vadd.f32 %v1608_v49, %v1519_v57  ;;  %v6351_v17 = vadd.f32 %v7825_v26, %v1671_v7  ;;  %2180 = vrot.lane.b32.xlu1 %v7827_v1, %s7287_s16  ;;  %v1690_v24 = vadd.f32 %v7831_v53, %v1616_v34  ;;  %v7848_v57 = vld [vmem:[#allocation90_spill] sm:$0xff]  ;;  %v7853_v49 = vld [vmem:[#allocation79_spill] sm:$0xff]  ;;  %v2458_v26 = vstv %s3150_s11  ;;  %v7857_v1 = vld [vmem:[#allocation101_spill] sm:$0xff] }
 0x2ff   : > { %v1633_v33 = vpop.permute.xlu0 %1632  ;;  %v7849_v37 = vrot.slane %v7848_v57, 7  ;;  %v7865_v57 = vld [vmem:[#allocation129_spill] sm:$0xff] }
 0x300   : > { %v1689_v4 = vadd.f32 %v7830_v62, %v1615_v48  ;;  %v1637_v8 = vadd.f32 %v1633_v33, %v1541_v20  ;;  %v6370_v5 = vadd.f32 %v7834_v22, %v1690_v24  ;;  %2247 = vrot.lane.b32.xlu0 %v7837_v30, %s7177_s17  ;;  %v7855_v48 = vrot.slane %v7854_v3, 3  ;;  %v6442_v62 = vld [vmem:[#allocation5 + $0x8] sm:$0xff]  ;;  %v7860_v22 = vld [vmem:[#allocation57_spill] sm:$0xff] }
 0x301   : > { %v1631_v13 = vpop.permute.xlu1 %1630  ;;  %v2420_v40 = vmul.f32 %v6442_v62, %v2418_v15  ;;  %v7868_v3 = vld [vmem:[#allocation89_spill] sm:$0xff] }
 0x302   : > { %v1636_v61 = vadd.f32 %v1631_v13, %v1540_v18  ;;  %v6366_v11 = vadd.f32 %v7832_v56, %v1689_v4  ;;  %2245 = vrot.lane.b32.xlu1 %v7836_v27, %s7177_s17  ;;  %v6381_v0 = vadd.f32 %v7839_v9, %v1637_v8  ;;  %v7858_v18 = vld [vmem:[#allocation154_spill] sm:$0xff]  ;;  %v2460_v4 = vmul.f32 %v6442_v62, %v2458_v26  ;;  %v3280_v13 = vld [vmem:[#allocation5 + $0x10] sm:$0x3f] }
 0x303   : > { %v6385_v44 = vpop.permute.xlu0 %1773  ;;  %v2459_v20 = vmul.f32 %v7858_v18, %v2458_v26  ;;  %v2461_v33 = vmul.f32 %v3280_v13, %v2458_v26  ;;  %v7862_v27 = vrot.slane %v7861_v12, 3  ;;  %v2419_v9 = vmul.f32 %v7858_v18, %v2418_v15 }
 0x304   : > { %v6378_v19 = vadd.f32 %v7838_v32, %v1636_v61  ;;  %2132 = vrot.lane.b32.xlu0 %v7842_v51, %s7287_s16  ;;  %v7859_v61 = vld [vmem:[#allocation73_spill] sm:$0xff] }
 0x305   : > { %v6383_v46 = vpop.permute.xlu1 %1771 }
 0x306   : > { %2249 = vrot.lane.b32.xlu1 %v7841_v6, %s7177_s17 }
 0x307   : > { %v6394_v10 = vpop.permute.xlu0 %1789 }
 0x308   : > { %2391 = vrot.lane.b32.xlu0 %v7844_v38, %s7177_s17  ;;  %v7863_v38 = vld [vmem:[#allocation133_spill] sm:$0xff] }
 0x309   : > { %v6392_v50 = vpop.permute.xlu1 %1787 }
 0x30a   : > { %2134 = vrot.lane.b32.xlu1 %v7843_v39, %s7287_s16  ;;  %v2421_v39 = vmul.f32 %v3280_v13, %v2418_v15 }
 0x30b   : > { %v6402_v54 = vpop.permute.xlu0 %1807 }
 0x30c   : > { %2395 = vrot.lane.b32.xlu0 %v7847_v42, %s7177_s17  ;;  %v7864_v42 = vld [vmem:[#allocation138_spill] sm:$0xff] }
 0x30d   : > { %v6400_v28 = vpop.permute.xlu1 %1791 }
 0x30e   : > { %2393 = vrot.lane.b32.xlu1 %v7845_v58, %s7177_s17 }
 0x30f   : > { %v6411_v35 = vpop.permute.xlu0 %1811 }
 0x310   : > { %2272 = vrot.lane.b32.xlu0 %v7850_v41, %s7177_s17 }
 0x311   : > { %v6409_v36 = vpop.permute.xlu1 %1809 }
 0x312   : > { %2270 = vrot.lane.b32.xlu1 %v7849_v37, %s7177_s17  ;;  %v7866_v37 = vrot.slane %v7865_v57, 5  ;;  %v7871_v57 = vld [vmem:[#allocation38_spill] sm:$0xff] }
 0x313   : > { %v1830_v52 = vpop.permute.xlu0 %1829 }
 0x314   : > { %2341 = vrot.lane.b32.xlu0 %v7852_v59, %s7177_s17  ;;  %v2438_v59 = vstv %s3149_s9 }
 0x315   : > { %v6418_v7 = vpop.permute.xlu1 %1827  ;;  %v2441_v12 = vmul.f32 %v3280_v13, %v2438_v59  ;;  %v2404_v13 = vstv %s6484_s27 }
 0x316   : > { %2274 = vrot.lane.b32.xlu1 %v7851_v2, %s7177_s17 }
 0x317   : > { %v1853_v16 = vpop.permute.xlu0 %1852 }
 0x318   : > { %2345 = vrot.lane.b32.xlu0 %v7855_v48, %s7177_s17  ;;  %v7869_v48 = vrot.slane %v7868_v3, 5 }
 0x319   : > { %v1832_v55 = vpop.permute.xlu1 %1831 }
 0x31a   : > { %2343 = vrot.lane.b32.xlu1 %v7853_v49, %s7177_s17  ;;  %v7867_v49 = vld [vmem:[#allocation32_spill] sm:$0xff] }
 0x31b   : > { %v6431_v43 = vpop.permute.xlu0 %1873 }
 0x31c   : > { %2230 = vrot.lane.b32.xlu0 %v7857_v1, %s7287_s16  ;;  %v2439_v1 = vmul.f32 %v7858_v18, %v2438_v59 }
 0x31d   : > { %v6429_v34 = vpop.permute.xlu1 %1854 }
 0x31e   : > { %2228 = vrot.lane.b32.xlu1 %v7856_v25, %s7287_s16  ;;  %s7909_s16 = smov 112  }
 0x31f   : > { %v6439_v29 = vpop.permute.xlu0 %1877 }
 0x320   : > { %2467 = vrot.lane.b32.xlu0 %v2460_v4, %s7335_s0  ;;  %v1837_v4 = vadd.f32 %v1830_v52, %v6366_v11  ;;  %v7870_v11 = vld [vmem:[#allocation91_spill] sm:$0xff]  ;;  %v1778_v52 = vadd.f32 %v6385_v44, %v6381_v0 }
 0x321   : > { %v6437_v45 = vpop.permute.xlu1 %1875  ;;  %v7872_v0 = vld [vmem:[#allocation103_spill] sm:$0xff] }
 0x322   : > { %2465 = vrot.lane.b32.xlu1 %v2459_v20, %s7335_s0  ;;  %v2440_v20 = vmul.f32 %v6442_v62, %v2438_v59  ;;  %v7873_v44 = vrot.slane %v7872_v0, 4  ;;  %v2406_v59 = vmul.f32 %v6442_v62, %v2404_v13 }
 0x323   : > { %v6449_v24 = vpop.permute.xlu0 %1900 }
 0x324   : > { %2366 = vrot.lane.b32.xlu0 %v7859_v61, %s7177_s17 }
 0x325   : > { %v6447_v53 = vpop.permute.xlu1 %1898 }
 0x326   : > { %2469 = vrot.lane.b32.xlu1 %v2461_v33, %s7335_s0  ;;  %v1777_v33 = vadd.f32 %v6383_v46, %v6378_v19  ;;  %v1796_v19 = vadd.f32 %v6392_v50, %v6287_v63  ;;  %v1797_v63 = vadd.f32 %v6394_v10, %v6307_v31  ;;  %v1798_v50 = vadd.f32 %v6400_v28, %v6311_v14 }
 0x327   : > { %v6456_v56 = vpop.permute.xlu0 %1919  ;;  %v1816_v31 = vadd.f32 %v6402_v54, %v6331_v60  ;;  %v1817_v14 = vadd.f32 %v6409_v36, %v6334_v47  ;;  %v1836_v60 = vadd.f32 %v6418_v7, %v6354_v21  ;;  %v7879_v7 = vld [vmem:[#allocation94_spill] sm:$0xff] }
 0x328   : > { %2370 = vrot.lane.b32.xlu0 %v7862_v27, %s7177_s17  ;;  %v1838_v27 = vadd.f32 %v1832_v55, %v6370_v5  ;;  %v1859_v5 = vadd.f32 %v6429_v34, %v1778_v52  ;;  %v1882_v55 = vadd.f32 %v6431_v43, %v1796_v19  ;;  %v1884_v3 = vadd.f32 %v6439_v29, %v1798_v50 }
 0x329   : > { %v6454_v8 = vpop.permute.xlu1 %1902  ;;  %v1908_v29 = vadd.f32 %v6449_v24, %v1817_v14  ;;  %v7876_v24 = vld [vmem:[#allocation37_spill] sm:$0xff] }
 0x32a   : > { %2368 = vrot.lane.b32.xlu1 %v7860_v22, %s7177_s17 }
 0x32b   : > { %v1924_v32 = vpop.permute.xlu0 %1923 }
 0x32c   : > { %2427 = vrot.lane.b32.xlu0 %v2420_v40, %s7335_s0  ;;  %v1930_v46 = vadd.f32 %v1924_v32, %v1838_v27 }
 0x32d   : > { %v1922_v30 = vpop.permute.xlu1 %1921 }
 0x32e   : > { %2425 = vrot.lane.b32.xlu1 %v2419_v9, %s7335_s0  ;;  %v1929_v61 = vadd.f32 %v1922_v30, %v1837_v4  ;;  %v1858_v9 = vadd.f32 %v1853_v16, %v1777_v33  ;;  %v7875_v4 = vld [vmem:[#allocation92_spill] sm:$0xff] }
 0x32f   : > { %v1947_v51 = vpop.permute.xlu0 %1946 }
 0x330   : > { %2320 = vrot.lane.b32.xlu0 %v7863_v38, %s7177_s17  ;;  %v1951_v32 = vadd.f32 %v1947_v51, %v1859_v5 }
 0x331   : > { %v1945_v6 = vpop.permute.xlu1 %1944 }
 0x332   : > { %2429 = vrot.lane.b32.xlu1 %v2421_v39, %s7335_s0  ;;  %v1950_v30 = vadd.f32 %v1945_v6, %v1858_v9 }
 0x333   : > { %v1968_v23 = vpop.permute.xlu0 %1967 }
 0x334   : > { %2557 = vrot.lane.b32.xlu0 %v7866_v37, %s3436_s12  ;;  %v2405_v37 = vmul.f32 %v7858_v18, %v2404_v13 }
 0x335   : > { %v1966_v58 = vpop.permute.xlu1 %1965 }
 0x336   : > { %2322 = vrot.lane.b32.xlu1 %v7864_v42, %s7177_s17  ;;  %v1974_v34 = vadd.f32 %v1966_v58, %v1882_v55  ;;  %s6613_s17 = scalar_lea.vmem [#allocation11], %s3063_s2 }
 0x337   : > { %v1991_v2 = vpop.permute.xlu0 %1990  ;;  %s2959_s6 = sshll.u32 %s6613_s17, 4  ;;  %s6748_s6 = int_to_ptr.vmem [resolvable:$true] %s2959_s6 }
 0x338   : > { %2561 = vrot.lane.b32.xlu0 %v7869_v48, %s3436_s12  ;;  %s3324_s21 = scalar_lea.vmem %s6748_s6, 32  ;;  %p3331_p0 = scmp.lt.s32.totalorder %s6748_s6, %s3329_s30 }
 0x339   : > { %v1970_v41 = vpop.permute.xlu1 %1969  ;;  %p3325_p4 = scmp.ne.s32.totalorder %s6748_s6, %s3324_s21  ;;  %p3332_p3 = scmp.lt.s32.totalorder %s3330_s1, %s3324_s21 }
 0x33a   : > { %2559 = vrot.lane.b32.xlu1 %v7867_v49, %s3436_s12  ;;  %v1883_v49 = vadd.f32 %v6437_v45, %v1797_v63  ;;  %v1976_v28 = vadd.f32 %v1970_v41, %v1884_v3  ;;  %v1907_v45 = vadd.f32 %v6447_v53, %v1816_v31  ;;  %v1928_v41 = vadd.f32 %v6456_v56, %v1836_v60 }
 0x33b   : > { %v6480_v25 = vpop.permute.xlu0 %1994  ;;  %p3326_p2 = pnand %p3325_p4, %p7938_p8  ;;  %p3333_p5 = por %p3332_p3, %p3331_p0 }
 0x33c   : > { %2447 = vrot.lane.b32.xlu0 %v2440_v20, %s7335_s0  ;;  %v1975_v10 = vadd.f32 %v1968_v23, %v1883_v49  ;;  %v7874_v20 = vld [vmem:[#allocation77_spill] sm:$0xff]  ;;  %v1999_v47 = vadd.f32 %v1991_v2, %v1907_v45  ;;  %v7880_v2 = vld [vmem:[#allocation128_spill] sm:$0xff] }
 0x33d   : > { %v1993_v26 = vpop.permute.xlu1 %1992  ;;  %v7881_v56 = vrot.slane %v7880_v2, 4  ;;  %v7890_v49 = vld [vmem:[#allocation132_spill] sm:$0xff]  ;;  %p3327_p12 = pneg %p3326_p2 }
 0x33e   : > { %2445 = vrot.lane.b32.xlu1 %v2439_v1, %s7335_s0  ;;  %v2000_v54 = vadd.f32 %v1993_v26, %v1908_v29 }
 0x33f   : > { %v2018_v22 = vpop.permute.xlu0 %2017  ;;  %p3334_p11 = pnand %p3333_p5, %p3327_p12 }
 0x340   : > { %v2025_v40 = vadd.f32 %v2018_v22, %v1929_v61  ;;  %2511 = vrot.lane.b32.xlu0 %v7870_v11, %s7335_s0  ;;  %v7877_v61 = vrot.slane %v7876_v24, 1  ;;  %v7878_v22 = vld [vmem:[#allocation78_spill] sm:$0xff] }
 0x341   : > { %v2016_v15 = vpop.permute.xlu1 %2015 }
 0x342   : > { %2449 = vrot.lane.b32.xlu1 %v2441_v12, %s7335_s0  ;;  %v2024_v12 = vadd.f32 %v2016_v15, %v1928_v41  ;;  %v7883_v15 = vld [vmem:[#allocation140_spill] sm:$0xff] }
 0x343   : > { %v2041_v38 = vpop.permute.xlu0 %2040 }
 0x344   : > { %v6502_v42 = vadd.f32 %v2041_v38, %v1950_v30  ;;  %2515 = vrot.lane.b32.xlu0 %v7873_v44, %s7335_s0  ;;  %v7882_v30 = vld [vmem:[#allocation139_spill] sm:$0xff] }
 0x345   : > { %v2020_v39 = vpop.permute.xlu1 %2019 }
 0x346   : > { %v2026_v16 = vadd.f32 %v2020_v39, %v1930_v46  ;;  %2513 = vrot.lane.b32.xlu1 %v7871_v57, %s7335_s0  ;;  %v7884_v57 = vld [vmem:[#allocation39_spill] sm:$0xff] }
 0x347   : > { %v2062_v43 = vpop.permute.xlu0 %2061  ;;  %v7885_v0 = vrot.slane %v7884_v57, 1 }
 0x348   : > { %v2070_v1 = vadd.f32 %v2062_v43, %v1974_v34  ;;  %2411 = vrot.lane.b32.xlu0 %v2406_v59, %s7335_s0  ;;  %v7889_v59 = vld [vmem:[#allocation189_spill] sm:$0xff] }
 0x349   : > { %v2043_v6 = vpop.permute.xlu1 %2042 }
 0x34a   : > { %v6517_v48 = vadd.f32 %v2043_v6, %v1951_v32  ;;  %2409 = vrot.lane.b32.xlu1 %v2405_v37, %s7335_s0 }
 0x34b   : > { %v2066_v62 = vpop.permute.xlu0 %2065 }
 0x34c   : > { %v2072_v58 = vadd.f32 %v2066_v62, %v1976_v28  ;;  %2655 = vrot.lane.b32.xlu0 %v7875_v4, %s3436_s12  ;;  %v7893_v28 = vld [vmem:[#allocation193_spill] sm:$0xff] }
 0x34d   : > { %v2064_v18 = vpop.permute.xlu1 %2063 }
 0x34e   : > { %v2071_v51 = vadd.f32 %v2064_v18, %v1975_v10  ;;  %2653 = vrot.lane.b32.xlu1 %v7874_v20, %s3436_s12  ;;  %v7892_v10 = vld [vmem:[#allocation192_spill] sm:$0xff]  ;;  %v7896_v20 = vld [vmem:[#allocation142_spill] sm:$0xff] }
 0x34f   : > { %v2085_v23 = vpop.permute.xlu0 %2084 }
 0x350   : > { %v2092_v33 = vadd.f32 %v2085_v23, %v2000_v54  ;;  %2536 = vrot.lane.b32.xlu0 %v7878_v22, %s7335_s0  ;;  %v7898_v23 = vld [vmem:[#allocation195_spill] sm:$0xff]  ;;  %v7899_v22 = vld [vmem:[#allocation196_spill] sm:$0xff] }
 0x351   : > { %v2083_v36 = vpop.permute.xlu1 %2082 }
 0x352   : > { %v2091_v53 = vadd.f32 %v2083_v36, %v1999_v47  ;;  %2657 = vrot.lane.b32.xlu1 %v7877_v61, %s3436_s12  ;;  %v7897_v36 = vld [vmem:[#allocation194_spill] sm:$0xff] }
 0x353   : > { %v2110_v9 = vpop.permute.xlu0 %2109 }
 0x354   : > { %v2117_v21 = vadd.f32 %v2110_v9, %v2025_v40  ;;  %2540 = vrot.lane.b32.xlu0 %v7881_v56, %s7335_s0  ;;  %v1818_v40 = vadd.f32 %v6411_v35, %v6351_v17  ;;  %v7887_v17 = vld [vmem:[#allocation99_spill] sm:$0xff]  ;;  %v7888_v35 = vld [vmem:[#allocation141_spill] sm:$0xff] }
 0x355   : > { %v2108_v27 = vpop.permute.xlu1 %2107 }
 0x356   : > { %v2116_v11 = vadd.f32 %v2108_v27, %v2024_v12  ;;  %2538 = vrot.lane.b32.xlu1 %v7879_v7, %s7335_s0  ;;  %v1909_v13 = vadd.f32 %v6454_v8, %v1818_v40 }
 0x357   : > { %v2204_v52 = vpop.permute.xlu0 %2203 }
 0x358   : > { %v2212_v46 = vadd.f32 %v2204_v52, %v2116_v11  ;;  %2605 = vrot.lane.b32.xlu0 %v7883_v15, %s3436_s12  ;;  %v2001_v44 = vadd.f32 %v6480_v25, %v1909_v13  ;;  %v7891_v25 = vrot.slane %v7890_v49, 1 }
 0x359   : > { %v2112_v26 = vpop.permute.xlu1 %2111 }
 0x35a   : > { %v2118_v19 = vadd.f32 %v2112_v26, %v2026_v16  ;;  %2603 = vrot.lane.b32.xlu1 %v7882_v30, %s3436_s12  ;;  %v7886_v16 = vld [vmem:[#allocation96_spill] sm:$0xff] }
 0x35b   : > { %v2208_v38 = vpop.permute.xlu0 %2207 }
 0x35c   : > { %v2214_v55 = vadd.f32 %v2208_v38, %v2118_v19  ;;  %2490 = vrot.lane.b32.xlu0 %v7886_v16, %s7335_s0 }
 0x35d   : > { %v2206_v39 = vpop.permute.xlu1 %2205 }
 0x35e   : > { %v2213_v5 = vadd.f32 %v2206_v39, %v2117_v21  ;;  %2607 = vrot.lane.b32.xlu1 %v7885_v0, %s3436_s12 }
 0x35f   : > { %v2154_v50 = vpop.permute.xlu0 %2153 }
 0x360   : > { %v2162_v34 = vadd.f32 %v2154_v50, %v2070_v1  ;;  %2628 = vrot.lane.b32.xlu0 %v7888_v35, %s3436_s12 }
 0x361   : > { %v2087_v63 = vpop.permute.xlu1 %2086 }
 0x362   : > { %v2093_v32 = vadd.f32 %v2087_v63, %v2001_v44  ;;  %2492 = vrot.lane.b32.xlu1 %v7887_v17, %s7335_s0  ;;  %s7928_s0 = sld [smem:[#allocation18_spill]] }
 0x363   : > { %v2158_v6 = vpop.permute.xlu0 %2157 }
 0x364   : > { %v2164_v37 = vadd.f32 %v2158_v6, %v2072_v58  ;;  %2632 = vrot.lane.b32.xlu0 %v7891_v25, %s3436_s12 }
 0x365   : > { %v2156_v8 = vpop.permute.xlu1 %2155 }
 0x366   : > { %v2163_v43 = vadd.f32 %v2156_v8, %v2071_v51  ;;  %2630 = vrot.lane.b32.xlu1 %v7889_v59, %s3436_s12  ;;  %v7894_v51 = vld [vmem:[#allocation95_spill] sm:$0xff] }
 0x367   : > { %v2298_v31 = vpop.permute.xlu0 %2297  ;;  %v7895_v58 = vrot.slane %v7894_v51, 5 }
 0x368   : > { %v2305_v14 = vadd.f32 %v2298_v31, %v2213_v5  ;;  %2701 = vrot.lane.b32.xlu0 %v7893_v28, %s3436_s12 }
 0x369   : > { %v2296_v3 = vpop.permute.xlu1 %2295 }
 0x36a   : > { %v2304_v1 = vadd.f32 %v2296_v3, %v2212_v46  ;;  %2699 = vrot.lane.b32.xlu1 %v7892_v10, %s3436_s12 }
 0x36b   : > { %v2179_v62 = vpop.permute.xlu0 %2178 }
 0x36c   : > { %v2187_v29 = vadd.f32 %v2179_v62, %v2091_v53  ;;  %2582 = vrot.lane.b32.xlu0 %v7896_v20, %s3436_s12 }
 0x36d   : > { %v2300_v18 = vpop.permute.xlu1 %2299 }
 0x36e   : > { %v2306_v45 = vadd.f32 %v2300_v18, %v2214_v55  ;;  %2703 = vrot.lane.b32.xlu1 %v7895_v58, %s3436_s12 }
 0x36f   : > { %v2183_v60 = vpop.permute.xlu0 %2182 }
 0x370   : > { %v2189_v54 = vadd.f32 %v2183_v60, %v2093_v32  ;;  %2678 = vrot.lane.b32.xlu0 %v7898_v23, %s3436_s12 }
 0x371   : > { %v2181_v4 = vpop.permute.xlu1 %2180 }
 0x372   : > { %v2188_v47 = vadd.f32 %v2181_v4, %v2092_v33  ;;  %2584 = vrot.lane.b32.xlu1 %v7897_v36, %s3436_s12 }
 0x373   : > { %v2248_v24 = vpop.permute.xlu0 %2247 }
 0x374   : > { %v2255_v61 = vadd.f32 %v2248_v24, %v2163_v43 }
 0x375   : > { %v2246_v41 = vpop.permute.xlu1 %2245 }
 0x376   : > { %v2254_v53 = vadd.f32 %v2246_v41, %v2162_v34  ;;  %2680 = vrot.lane.b32.xlu1 %v7899_v22, %s3436_s12  ;;  %s3169_s12 = sshll.u32 %s7928_s0, 5 }
 0x377   : > { %v2133_v27 = vpop.permute.xlu0 %2132  ;;  %s6746_s15 = scalar_lea.hbm %s7936_s14, %s3169_s12 }
 0x378   : > { %v2138_v11 = vadd.f32 %v2133_v27, %v6502_v42 }
 0x379   : > { %v2250_v12 = vpop.permute.xlu1 %2249 }
 0x37a   : > { %v2256_v9 = vadd.f32 %v2250_v12, %v2164_v37 }
 0x37b   : > { %v2392_v21 = vpop.permute.xlu0 %2391 }
 0x37c   : > { %v2400_v2 = vadd.f32 %v2392_v21, %v2304_v1 }
 0x37d   : > { %v2135_v33 = vpop.permute.xlu1 %2134 }
 0x37e   : > { %v2139_v7 = vadd.f32 %v2135_v33, %v6517_v48 }
 0x37f   : > { %v2396_v26 = vpop.permute.xlu0 %2395 }
 0x380   : > { %v2402_v19 = vadd.f32 %v2396_v26, %v2306_v45 }
 0x381   : > { %v2394_v56 = vpop.permute.xlu1 %2393 }
 0x382   : > { %v2401_v52 = vadd.f32 %v2394_v56, %v2305_v14 }
 0x383   : > { %v2273_v30 = vpop.permute.xlu0 %2272 }
 0x384   : > { %v2280_v40 = vadd.f32 %v2273_v30, %v2188_v47 }
 0x385   : > { %v2271_v46 = vpop.permute.xlu1 %2270 }
 0x386   : > { %v2279_v15 = vadd.f32 %v2271_v46, %v2187_v29 }
 0x387   : > { %v2342_v38 = vpop.permute.xlu0 %2341 }
 0x388   : > { %v6583_v5 = vadd.f32 %v2342_v38, %v2254_v53 }
 0x389   : > { %v2275_v39 = vpop.permute.xlu1 %2274 }
 0x38a   : > { %v2281_v13 = vadd.f32 %v2275_v39, %v2189_v54 }
 0x38b   : > { %v2346_v42 = vpop.permute.xlu0 %2345 }
 0x38c   : > { %v6587_v0 = vadd.f32 %v2346_v42, %v2256_v9 }
 0x38d   : > { %v2344_v55 = vpop.permute.xlu1 %2343 }
 0x38e   : > { %v6585_v57 = vadd.f32 %v2344_v55, %v2255_v61 }
 0x38f   : > { %v2231_v16 = vpop.permute.xlu0 %2230 }
 0x390   : > { %v6591_v63 = vadd.f32 %v2231_v16, %v2139_v7 }
 0x391   : > { %v2229_v48 = vpop.permute.xlu1 %2228 }
 0x392   : > { %v6589_v44 = vadd.f32 %v2229_v48, %v2138_v11 }
 0x393   : > { %v2468_v32 = vpop.permute.xlu0 %2467 }
 0x394   : > { %v2475_v17 = vadd.f32 %v2468_v32, %v2401_v52 }
 0x395   : > { %v2466_v50 = vpop.permute.xlu1 %2465 }
 0x396   : > { %v2474_v34 = vadd.f32 %v2466_v50, %v2400_v2 }
 0x397   : > { %v2367_v8 = vpop.permute.xlu0 %2366 }
 0x398   : > { %v2375_v43 = vadd.f32 %v2367_v8, %v2279_v15 }
 0x399   : > { %v2470_v35 = vpop.permute.xlu1 %2469 }
 0x39a   : > { %v2476_v6 = vadd.f32 %v2470_v35, %v2402_v19 }
 0x39b   : > { %v2371_v59 = vpop.permute.xlu0 %2370 }
 0x39c   : > { %v2377_v49 = vadd.f32 %v2371_v59, %v2281_v13 }
 0x39d   : > { %v2369_v37 = vpop.permute.xlu1 %2368 }
 0x39e   : > { %v2376_v30 = vadd.f32 %v2369_v37, %v2280_v40 }
 0x39f   : > { %v2428_v3 = vpop.permute.xlu0 %2427 }
 0x3a0   : > { %v2435_v16 = vadd.f32 %v2428_v3, %v6585_v57 }
 0x3a1   : > { %v2426_v25 = vpop.permute.xlu1 %2425 }
 0x3a2   : > { %v2434_v48 = vadd.f32 %v2426_v25, %v6583_v5 }
 0x3a3   : > { %v2321_v1 = vpop.permute.xlu0 %2320 }
 0x3a5   : > { %v2430_v31 = vpop.permute.xlu1 %2429 }
 0x3a6   : > { %v2436_v40 = vadd.f32 %v2430_v31, %v6587_v0 }
 0x3a7   : > { %v2558_v10 = vpop.permute.xlu0 %2557 }
 0x3a8   : > { %v2566_v47 = vadd.f32 %v2558_v10, %v2474_v34 }
 0x3a9   : > { %v6593_v14 = vpop.permute.xlu1 %2322 }
 0x3ab   : > { %v2562_v18 = vpop.permute.xlu0 %2561 }
 0x3ac   : > { %v2568_v53 = vadd.f32 %v2562_v18, %v2476_v6  ;;  %v2326_v18 = vadd.f32 %v2321_v1, %v6589_v44  ;;  %v2327_v44 = vadd.f32 %v6593_v14, %v6591_v63 }
 0x3ad   : > { %v2560_v28 = vpop.permute.xlu1 %2559 }
 0x3ae   : > { %v2567_v54 = vadd.f32 %v2560_v28, %v2475_v17 }
 0x3af   : > { %v2448_v45 = vpop.permute.xlu0 %2447 }
 0x3b0   : > { %v2455_v13 = vadd.f32 %v2448_v45, %v2376_v30 }
 0x3b1   : > { %v2446_v62 = vpop.permute.xlu1 %2445 }
 0x3b2   : > { %v2454_v46 = vadd.f32 %v2446_v62, %v2375_v43 }
 0x3b3   : > { %v2512_v51 = vpop.permute.xlu0 %2511 }
 0x3b4   : > { %v2520_v8 = vadd.f32 %v2512_v51, %v2434_v48 }
 0x3b5   : > { %v2450_v29 = vpop.permute.xlu1 %2449 }
 0x3b6   : > { %v2456_v55 = vadd.f32 %v2450_v29, %v2377_v49 }
 0x3b7   : > { %v2516_v20 = vpop.permute.xlu0 %2515 }
 0x3b8   : > { %v2522_v5 = vadd.f32 %v2516_v20, %v2436_v40 }
 0x3b9   : > { %v2514_v58 = vpop.permute.xlu1 %2513 }
 0x3ba   : > { %v2521_v6 = vadd.f32 %v2514_v58, %v2435_v16 }
 0x3bb   : > { %v6595_v60 = vpop.permute.xlu0 %2411 }
 0x3bd   : > { %v2410_v4 = vpop.permute.xlu1 %2409 }
 0x3be   : > { %v2415_v51 = vadd.f32 %v2410_v4, %v2326_v18 }
 0x3bf   : > { %v2656_v23 = vpop.permute.xlu0 %2655 }
 0x3c0   : > { %v2663_v24 = vadd.f32 %v2656_v23, %v2567_v54 }
 0x3c1   : > { %v2654_v36 = vpop.permute.xlu1 %2653 }
 0x3c2   : > { %v2662_v41 = vadd.f32 %v2654_v36, %v2566_v47  ;;  %v2727_v22 = vrot.slane %v2663_v24, 1 }
 0x3c3   : > { %v2537_v27 = vpop.permute.xlu0 %2536 }
 0x3c4   : > { %v2726_v61 = vrot.slane %v2662_v41, 1  ;;  %v2545_v15 = vadd.f32 %v2537_v27, %v2454_v46 }
 0x3c5   : > { %v2658_v12 = vpop.permute.xlu1 %2657 }
 0x3c6   : > { %v2664_v9 = vadd.f32 %v2658_v12, %v2568_v53  ;;  %v2728_v11 = vsel %vm698_vm5, %v2726_v61, %v2727_v22  ;;  %v2416_v53 = vadd.f32 %v6595_v60, %v2327_v44 }
 0x3c7   : > { %v2541_v7 = vpop.permute.xlu0 %2540 }
 0x3c8   : > { %v2729_v33 = vrot.slane %v2664_v9, 1  ;;  %v2547_v32 = vadd.f32 %v2541_v7, %v2456_v55 }
 0x3c9   : > { %v2539_v21 = vpop.permute.xlu1 %2538 }
 0x3ca   : > { %v2730_v2 = vsel %vm698_vm5, %v2727_v22, %v2729_v33  ;;  %v2546_v50 = vadd.f32 %v2539_v21, %v2455_v13 }
 0x3cb   : > { %v2606_v26 = vpop.permute.xlu0 %2605 }
 0x3cc   : > { %v2613_v10 = vadd.f32 %v2606_v26, %v2521_v6 }
 0x3cd   : > { %v2604_v56 = vpop.permute.xlu1 %2603 }
 0x3ce   : > { %v2612_v37 = vadd.f32 %v2604_v56, %v2520_v8 }
 0x3cf   : > { %v2491_v19 = vpop.permute.xlu0 %2490 }
 0x3d0   : > { %v2496_v1 = vadd.f32 %v2491_v19, %v2415_v51 }
 0x3d1   : > { %v2608_v52 = vpop.permute.xlu1 %2607 }
 0x3d2   : > { %v2614_v58 = vadd.f32 %v2608_v52, %v2522_v5 }
 0x3d3   : > { %v2629_v38 = vpop.permute.xlu0 %2628 }
 0x3d4   : > { %v2637_v42 = vadd.f32 %v2629_v38, %v2545_v15  ;;  %v7901_v15 = vlaneseq  ;;  %v7902_v38 = vld [vmem:[#allocation26_spill] sm:$0xff] }
 0x3d5   : > { %v2493_v39 = vpop.permute.xlu1 %2492 }
 0x3d6   : > { %v2734_v34 = vadd.f32 %v2728_v11, %v2637_v42  ;;  %v2497_v27 = vadd.f32 %v2493_v39, %v2416_v53  ;;  %vm2763_vm11 = vcmp.lt.s32.totalorder %v7901_v15, 16  ;;  %vm2792_vm12 = vcmp.ge.s32.totalorder %v7901_v15, 16 }
 0x3d7   : > { %v2633_v35 = vpop.permute.xlu0 %2632  ;;  %vm2793_vm13 = vcmp.lt.s32.totalorder %v7901_v15, 32  ;;  %vm6645_vm15 = vcmp.ge.s32.totalorder %v7901_v15, 32  ;;  %vm6650_vm0 = vcmp.lt.s32.totalorder %v7901_v15, 48  ;;  %vm6660_vm2 = vcmp.ge.s32.totalorder %v7901_v15, 48 }
 0x3d8   : > { %v2639_v43 = vadd.f32 %v2633_v35, %v2547_v32  ;;  %v2740_v25 = vrot.slane %v2734_v34, 2  ;;  %vm2794_vm14 = vmand %vm2792_vm12, %vm2793_vm13  ;;  %vm6665_vm3 = vcmp.lt.s32.totalorder %v7901_v15, 64  ;;  %vm6681_vm6 = vcmp.lt.s32.totalorder %v7901_v15, 80 }
 0x3d9   : > { %v2631_v17 = vpop.permute.xlu1 %2630  ;;  %vm2802_vm1 = vmand %vm6645_vm15, %vm6650_vm0  ;;  %vm6692_vm8 = vcmp.ge.s32.totalorder %v7901_v15, 80  ;;  %vm6697_vm9 = vcmp.lt.s32.totalorder %v7901_v15, 96  ;;  %vm6713_vm12 = vcmp.lt.s32.totalorder %v7901_v15, 112  ;;  %vm6729_vm15 = vcmp.lt.s32.totalorder %v7901_v15, 128 }
 0x3da   : > { %v2638_v59 = vadd.f32 %v2631_v17, %v2546_v50  ;;  %v2736_v49 = vadd.f32 %v2729_v33, %v2639_v43  ;;  %vm2810_vm4 = vmand %vm6660_vm2, %vm6665_vm3 }
 0x3db   : > { %v2702_v3 = vpop.permute.xlu0 %2701  ;;  %vm2847_vm10 = vmand %vm6692_vm8, %vm6697_vm9 }
 0x3dc   : > { %v2735_v28 = vadd.f32 %v2730_v2, %v2638_v59  ;;  %v2743_v45 = vrot.slane %v2736_v49, 2  ;;  %v2709_v47 = vadd.f32 %v2702_v3, %v2613_v10 }
 0x3dd   : > { %v2700_v57 = vpop.permute.xlu1 %2699 }
 0x3de   : > { %v2741_v62 = vrot.slane %v2735_v28, 2  ;;  %v2708_v29 = vadd.f32 %v2700_v57, %v2612_v37  ;;  %v2715_v36 = vrot.slane %v2709_v47, 1 }
 0x3df   : > { %v2583_v41 = vpop.permute.xlu0 %2582 }
 0x3e0   : > { %v2714_v54 = vrot.slane %v2708_v29, 1  ;;  %v2742_v0 = vsel %vm888_vm7, %v2740_v25, %v2741_v62  ;;  %v2744_v31 = vsel %vm888_vm7, %v2741_v62, %v2743_v45  ;;  %v2588_v4 = vadd.f32 %v2583_v41, %v2496_v1 }
 0x3e1   : > { %v2704_v23 = vpop.permute.xlu1 %2703 }
 0x3e2   : > { %v2710_v20 = vadd.f32 %v2704_v23, %v2614_v58  ;;  %v2716_v24 = vsel %vm698_vm5, %v2714_v54, %v2715_v36 }
 0x3e3   : > { %v2679_v12 = vpop.permute.xlu0 %2678 }
 0x3e4   : > { %v2717_v61 = vrot.slane %v2710_v20, 1  ;;  %v2684_v9 = vadd.f32 %v2679_v12, %v2588_v4 }
 0x3e5   : > { %v2585_v22 = vpop.permute.xlu1 %2584 }
 0x3e6   : > { %v2718_v11 = vsel %vm698_vm5, %v2715_v36, %v2717_v61  ;;  %v2589_v33 = vadd.f32 %v2585_v22, %v2497_v27  ;;  %v2721_v21 = vadd.f32 %v2716_v24, %v2684_v9  ;;  %vm6676_vm5 = vcmp.ge.s32.totalorder %v7901_v15, 64 }
 0x3e7   : > { %vm2832_vm7 = vmand %vm6676_vm5, %vm6681_vm6 }
 0x3e8   : > { %v2747_v2 = vadd.f32 %v2742_v0, %v2721_v21 }
 0x3e9   : > { %v2681_v7 = vpop.permute.xlu1 %2680 }
 0x3ea   : > { %v2685_v63 = vadd.f32 %v2681_v7, %v2589_v33  ;;  %v3161_v14 = vmul.f32 -1.442695, %v2747_v2 }
 0x3ec   : > { %v2722_v56 = vadd.f32 %v2718_v11, %v2685_v63  ;;  %3267 = vpow2.f32 %v3161_v14 }
 0x3ee   : > { %v2748_v26 = vadd.f32 %v2744_v31, %v2722_v56 }
 0x3f0   : > { %v3162_v52 = vmul.f32 -1.442695, %v2748_v26 }
 0x3f2   : > { %3269 = vpow2.f32 %v3162_v52 }
 0x3f6   : > { %v3268_v60 = vpop.eup %3267 }
 0x3f7   : > { %v2755_v19 = vadd.f32 1.0, %v3268_v60 }
 0x3f9   : > { %3271 = vrcp.f32 %v2755_v19 }
 0x3fc   : > { %v3270_v46 = vpop.eup %3269 }
 0x3fd   : > { %v2756_v30 = vadd.f32 1.0, %v3270_v46 }
 0x3ff   : > { %3273 = vrcp.f32 %v2756_v30 }
 0x403   : > { %v3272_v39 = vpop.eup %3271 }
 0x404   : > { %v2773_v13 = vrot.slane %v3272_v39, %v7902_v38  ;;  %2765 = vst.msk [vmem:[%s6613_s17] sm:$0x1] %vm2763_vm11, %v3272_v39  ;;  %v2812_v8 = vcombine.high %v3272_v39, %v3272_v39 }
 0x406   : > { %v2774_v55 = vcombine.high %v2773_v13, %v2773_v13  ;;  %v2781_v50 = vrot.slane %v2773_v13, %v7902_v38  ;;  %v2819_v43 = vrot.slane %v2812_v8, %v7902_v38 }
 0x408   : > { %v2788_v48 = vrot.slane %v2774_v55, %v7902_v38  ;;  %v2796_v17 = vcombine.high %v2781_v50, %v2781_v50  ;;  %v2826_v10 = vrot.slane %v2819_v43, %v7902_v38  ;;  %v2834_v49 = vcombine.high %v2819_v43, %v2819_v43 }
 0x409   : > { %v3274_v42 = vpop.eup %3273 }
 0x40a   : > { %v2873_v16 = vrot.slane %v3274_v42, %v7902_v38  ;;  %2865 = vst.msk [vmem:[%s6613_s17 + $0x1] sm:$0x1] %vm2763_vm11, %v3274_v42  ;;  %2789 = vrot.lane.b32.xlu0 %v2788_v48, %s7903_s7  ;;  %v2804_v59 = vcombine.high %v2788_v48, %v2788_v48  ;;  %v2903_v40 = vcombine.high %v3274_v42, %v3274_v42  ;;  %vm6708_vm11 = vcmp.ge.s32.totalorder %v7901_v15, 96 }
 0x40b   : > { %v2841_v5 = vrot.slane %v2834_v49, %v7902_v38  ;;  %v2849_v3 = vcombine.high %v2826_v10, %v2826_v10  ;;  %vm2855_vm13 = vmand %vm6708_vm11, %vm6713_vm12 }
 0x40c   : > { %v2874_v32 = vcombine.high %v2873_v16, %v2873_v16  ;;  %v2881_v35 = vrot.slane %v2873_v16, %v7902_v38  ;;  %v2910_v28 = vrot.slane %v2903_v40, %v7902_v38 }
 0x40d   : > { %v2857_v45 = vcombine.high %v2841_v5, %v2841_v5 }
 0x40e   : > { %v2888_v34 = vrot.slane %v2874_v32, %v7902_v38  ;;  %2797 = vrot.lane.b32.xlu0 %v2796_v17, %s7904_s19  ;;  %v2893_v6 = vcombine.high %v2881_v35, %v2881_v35  ;;  %v2917_v18 = vrot.slane %v2910_v28, %v7902_v38  ;;  %v2922_v25 = vcombine.high %v2910_v28, %v2910_v28 }
 0x410   : > { %2889 = vrot.lane.b32.xlu1 %v2888_v34, %s7903_s7  ;;  %v2898_v37 = vcombine.high %v2888_v34, %v2888_v34  ;;  %v2929_v57 = vrot.slane %v2922_v25, %v7902_v38  ;;  %v2934_v62 = vcombine.high %v2917_v18, %v2917_v18 }
 0x412   : > { %2805 = vrot.lane.b32.xlu0 %v2804_v59, %s7905_s24  ;;  %v2939_v29 = vcombine.high %v2929_v57, %v2929_v57 }
 0x414   : > { %2894 = vrot.lane.b32.xlu1 %v2893_v6, %s7904_s19 }
 0x416   : > { %2827 = vrot.lane.b32.xlu0 %v2826_v10, %s7906_s23 }
 0x418   : > { %2899 = vrot.lane.b32.xlu1 %v2898_v37, %s7905_s24 }
 0x41a   : > { %2842 = vrot.lane.b32.xlu0 %v2841_v5, %s7907_s28 }
 0x41c   : > { %2918 = vrot.lane.b32.xlu1 %v2917_v18, %s7906_s23 }
 0x41e   : > { %2850 = vrot.lane.b32.xlu0 %v2849_v3, %s7908_s29 }
 0x420   : > { %2930 = vrot.lane.b32.xlu1 %v2929_v57, %s7907_s28 }
 0x422   : > { %2858 = vrot.lane.b32.xlu0 %v2857_v45, %s7909_s16 }
 0x424   : > { %2935 = vrot.lane.b32.xlu1 %v2934_v62, %s7908_s29 }
 0x428   : > { %2940 = vrot.lane.b32.xlu1 %v2939_v29, %s7909_s16 }
 0x47c   : > { %v2790_v58 = vpop.permute.xlu0 %2789 }
 0x47d   : > { %2795 = vst.msk [vmem:[%s6613_s17] sm:$0x1] %vm2794_vm14, %v2790_v58 }
 0x480   : > { %v2798_v31 = vpop.permute.xlu0 %2797 }
 0x481   : > { %2803 = vst.msk [vmem:[%s6613_s17] sm:$0x1] %vm2802_vm1, %v2798_v31 }
 0x482   : > { %v2890_v0 = vpop.permute.xlu1 %2889 }
 0x483   : > { %2892 = vst.msk [vmem:[%s6613_s17 + $0x1] sm:$0x1] %vm2794_vm14, %v2890_v0  ;;  %vm6724_vm14 = vcmp.ge.s32.totalorder %v7901_v15, 112 }
 0x484   : > { %v2806_v1 = vpop.permute.xlu0 %2805  ;;  %vm2863_vm0 = vmand %vm6724_vm14, %vm6729_vm15 }
 0x485   : > { %2811 = vst.msk [vmem:[%s6613_s17] sm:$0x1] %vm2810_vm4, %v2806_v1 }
 0x486   : > { %v2895_v44 = vpop.permute.xlu1 %2894 }
 0x487   : > { %2897 = vst.msk [vmem:[%s6613_s17 + $0x1] sm:$0x1] %vm2802_vm1, %v2895_v44 }
 0x488   : > { %v2828_v61 = vpop.permute.xlu0 %2827 }
 0x489   : > { %2833 = vst.msk [vmem:[%s6613_s17] sm:$0x1] %vm2832_vm7, %v2828_v61 }
 0x48a   : > { %v2900_v53 = vpop.permute.xlu1 %2899 }
 0x48b   : > { %2902 = vst.msk [vmem:[%s6613_s17 + $0x1] sm:$0x1] %vm2810_vm4, %v2900_v53 }
 0x48c   : > { %v2843_v27 = vpop.permute.xlu0 %2842 }
 0x48d   : > { %2848 = vst.msk [vmem:[%s6613_s17] sm:$0x1] %vm2847_vm10, %v2843_v27 }
 0x48e   : > { %v2919_v12 = vpop.permute.xlu1 %2918 }
 0x48f   : > { %2921 = vst.msk [vmem:[%s6613_s17 + $0x1] sm:$0x1] %vm2832_vm7, %v2919_v12 }
 0x490   : > { %v2851_v21 = vpop.permute.xlu0 %2850 }
 0x491   : > { %2856 = vst.msk [vmem:[%s6613_s17] sm:$0x1] %vm2855_vm13, %v2851_v21 }
 0x492   : > { %v2931_v33 = vpop.permute.xlu1 %2930 }
 0x493   : > { %2933 = vst.msk [vmem:[%s6613_s17 + $0x1] sm:$0x1] %vm2847_vm10, %v2931_v33 }
 0x494   : > { %v2859_v2 = vpop.permute.xlu0 %2858 }
 0x495   : > { %2864 = vst.msk [vmem:[%s6613_s17] sm:$0x1] %vm2863_vm0, %v2859_v2 }
 0x496   : > { %v2936_v7 = vpop.permute.xlu1 %2935 }
 0x497   : > { %2938 = vst.msk [vmem:[%s6613_s17 + $0x1] sm:$0x1] %vm2855_vm13, %v2936_v7 }
 0x49a   : > { %v2941_v63 = vpop.permute.xlu1 %2940 }
 0x49b   : > { %2943 = vst.msk [vmem:[%s6613_s17 + $0x1] sm:$0x1] %vm2863_vm0, %v2941_v63 }
 0x49c   : > { %3337 = shalt.err (!%p3334_p11)
}
 0x49d   : > { %s3338_s3 = scalar_lea.hbm %s6746_s15, 32  ;;  %s3342_s11 = scalar_lea.hbm %s7937_s20, 64 }
 0x49e   : > { %p3339_p13 = scmp.ne.s32.totalorder %s6746_s15, %s3338_s3  ;;  %p3343_p6 = scmp.lt.u32.totalorder %s6746_s15, %s7937_s20 }
 0x49f   : > { %p3344_p9 = scmp.lt.u32.totalorder %s3342_s11, %s3338_s3  ;;  %p3346_p4 = scmp.lt.u32.totalorder %s3338_s3, %s6746_s15 }
 0x4a0   : > { %p3340_p7 = pnand %p3339_p13, %p7938_p8 }
 0x4a1   : > { %p3345_p1 = por %p3344_p9, %p3343_p6 }
 0x4a2   : > { %p3341_p10 = pneg %p3340_p7 }
 0x4a3   : > { %p3347_p2 = por %p3346_p4, %p3345_p1 }
 0x4a5   : > { %p3348_p12 = pnand %p3347_p2, %p3341_p10 }
 0x4a7   : > { %3351 = shalt.err (!%p3348_p12)
}
 0x4a8   : > { %3176 = dma.vmem_to_hbm [thread:$0]  (%p7938_p8), %s6748_s6, 32, %s6746_s15, %s2945_s5  }
 0x4a9 PF: > { %s7939_s27 = sld [smem:[#allocation15_spill]]  ;;  %s7940_s8 = sld [smem:[#allocation21_spill]] }
 0x4aa   : > { %s7941_s2 = sld [smem:[#allocation20_spill]] }
 0x4af   : > { %s2971_s17 = sand.u32 1, %s7939_s27   ;;  %p7942_p0 = scmp.ne.s32.totalorder %s7940_s8, 0 }
 0x4b0   : > { %p7943_p3 = scmp.ge.s32.totalorder %s7941_s2, 2  ;;  %s2972_s7 = scalar_lea.sflag [#allocation8], %s2971_s17 }
 0x4b2   : > { %p3187_p5 = pnand %p7943_p3, %p7942_p0 }
 0x4b4   : > { %3385 = dma.done.wait (!%p3187_p5), %s2972_s7, 32  }
 0x4b5   : > { %3387 = vsyncadd (!%p3187_p5), %s2972_s7, 4294967264  ;;  %s19_s14 = sadd.s32 1, %s7941_s2   ;;  %s7944_s9 = sld [smem:[#allocation16_spill]] }
 0x4b6   : > { %p16_p11 = scmp.ge.s32.totalorder %s19_s14, 4   ;;  %s7945_s10 = sld [smem:[#allocation17_spill]] }
 0x4b7   : > { %s7946_s11 = sld [smem:[#allocation24_spill]]  ;;  %s7947_s12 = sld [smem:[#allocation19_spill]] }
 0x4b8   : > { %s7948_s13 = sld [smem:[#allocation22_spill]]  ;;  %18 = sbr.rel (!%p16_p11) target bundleno = 11 (0xb), region = 90 }
 0x4bf   :  { %2977 = vsyncpa [#allocation7], 1 }
 0x4c0   :  { %2979 = vsyncpa [#allocation7 + $0x1], 1 }
 0x4c1   :  { %2980 = vsyncpa [#allocation8], 1 }
 0x4c2   :  { %2982 = vsyncpa [#allocation8 + $0x1], 1 }
 0x4c3   :  { %2983 = vsyncpa [#allocation9], 1 }
 0x4c4   :  { %2985 = vsyncpa [#allocation9 + $0x1], 1 }

</bundles_post_ra>
